<compile_context>
chip_gen: v5e
topology: v5e:2x2
jax: 0.10.0
libtpu: 0.0.40
codegen_flags: <defaults>
</compile_context>

<pallas_src>
import functools

import jax
import jax.numpy as jnp
from jax.experimental import pallas as pl
from jax.experimental.pallas import tpu as pltpu

LMBDA = 0.5  # args.lmbda


def _kd4ctr_kernel(data_ref, label_ref,
                   w1_ref, b1_ref,
                   w2s_ref, w2t_ref, b2s_ref, b2t_ref,
                   out_ref, acc_ref,
                   *, b_total, tile_b, nb_per_core):
    c = pl.program_id(0)   # split / core index ("parallel")
    i = pl.program_id(1)   # batch-tile index within this split ("arbitrary")

    @pl.when(i == 0)
    def _init():
        acc_ref[c, 0] = 0.0
        acc_ref[c, 1] = 0.0

    x = data_ref[...]                                  # [TILE_B, F] f32
    y = label_ref[...]                                 # [TILE_B, 1] f32

    # ---- fused student|teacher layer-1: single MXU push, N = Hs + Ht ----
    h = jnp.dot(x, w1_ref[...], preferred_element_type=jnp.float32) + b1_ref[...]
    h = jnp.maximum(h, 0.0)                            # [TILE_B, Hs+Ht] f32

    # ---- layer-2 (out dim 1) on the VPU: multiply by zero-padded w2 rows and
    #      lane-reduce; avoids an N=1 MXU matmul and any lane slicing of h. ----
    z_s = jnp.sum(h * w2s_ref[...], axis=-1, keepdims=True) + b2s_ref[...]   # [TILE_B, 1]
    z_t = jnp.sum(h * w2t_ref[...], axis=-1, keepdims=True) + b2t_ref[...]   # [TILE_B, 1]

    # ---- mask ragged-tail rows and duplicated (index-clamped) tiles ----
    row = ((c * nb_per_core + i) * tile_b
           + jax.lax.broadcasted_iota(jnp.int32, (tile_b, 1), 0))
    valid = row < b_total

    # ---- base_loss: BCEWithLogits(z_s, y), stable softplus form ----
    bce = jnp.maximum(z_s, 0.0) - z_s * y + jnp.log1p(jnp.exp(-jnp.abs(z_s)))
    # ---- kd_loss: logit-matching MSE vs teacher ----
    sq = (z_s - z_t) ** 2

    # jnp.where masks any garbage (NaN/Inf) from the un-DMA'd pad rows.
    acc_ref[c, 0] += jnp.sum(jnp.where(valid, bce, 0.0))
    acc_ref[c, 1] += jnp.sum(jnp.where(valid, sq, 0.0))

    @pl.when(i == pl.num_programs(1) - 1)
    def _finalize():
        # Write this split's partial sums into lanes 0/1 of its own output tile.
        sub = jax.lax.broadcasted_iota(jnp.int32, (8, 128), 0)
        lane = jax.lax.broadcasted_iota(jnp.int32, (8, 128), 1)
        tile = jnp.where((sub == 0) & (lane == 0), acc_ref[c, 0],
                         jnp.where((sub == 0) & (lane == 1), acc_ref[c, 1], 0.0))
        out_ref[0] = tile


def kd4ctr_forward(data, label, student_params, teacher_params,
                   *, lmbda=LMBDA, tile_b=512, num_splits=2):
    """Returns f32[3] = (loss, base_loss, kd_loss)."""
    w1s, b1s, w2s, b2s = student_params
    w1t, b1t, w2t, b2t = teacher_params

    B, F = data.shape
    Hs = w1s.shape[1]
    Ht = w1t.shape[1]
    Hc = Hs + Ht

    # --- VMEM-aware tile cap (v7x has only 64 MiB / 32 MiB scoped): keep the
    #     double-buffered f32 data tile under ~16 MiB even for wide F.
    cap = max(128, (16 * 1024 * 1024) // (2 * F * 4))
    tile_b = int(min(tile_b, cap))
    tile_b = max(8, (tile_b // 8) * 8)

    # --- layer-1 fusion: one [F, Hs+Ht] weight so student+teacher share an MXU push
    w1_cat = jnp.concatenate([w1s, w1t], axis=1).astype(jnp.float32)
    b1_cat = jnp.concatenate([b1s.reshape(1, Hs), b1t.reshape(1, Ht)],
                             axis=1).astype(jnp.float32)

    # --- layer-2 rows zero-padded into the concatenated hidden layout (VPU path)
    w2s_cat = jnp.concatenate([w2s.reshape(1, Hs).astype(jnp.float32),
                               jnp.zeros((1, Ht), jnp.float32)], axis=1)
    w2t_cat = jnp.concatenate([jnp.zeros((1, Hs), jnp.float32),
                               w2t.reshape(1, Ht).astype(jnp.float32)], axis=1)
    b2s_ = jnp.asarray(b2s, jnp.float32).reshape(1, 1)
    b2t_ = jnp.asarray(b2t, jnp.float32).reshape(1, 1)

    # --- stream the ORIGINAL f32 data/label: no host-side cast, no host-side pad
    data_f = data if data.dtype == jnp.float32 else data.astype(jnp.float32)
    label_f = label if label.dtype == jnp.float32 else label.astype(jnp.float32)

    nb = pl.cdiv(B, tile_b)                 # total batch tiles
    nc = max(1, int(num_splits))            # 2 = v7x dual-TC; harmless on v5e/v6e
    nbpc = pl.cdiv(nb, nc)                  # tiles per split

    # Clamp the block index so no DMA ever starts fully past the array end;
    # the in-kernel row mask (computed from the *logical* index) zeroes any
    # duplicated or ragged rows.
    def tile_map(c, i):
        return (jnp.minimum(c * nbpc + i, nb - 1), 0)

    const = lambda c, i: (0, 0)  # weights / biases stay VMEM-resident across the grid

    grid_spec = pltpu.PrefetchScalarGridSpec(
        num_scalar_prefetch=0,
        grid=(nc, nbpc),
        in_specs=[
            pl.BlockSpec((tile_b, F), tile_map),   # data tile (pipelined)
            pl.BlockSpec((tile_b, 1), tile_map),   # label tile
            pl.BlockSpec((F, Hc), const),          # fused layer-1 weight
            pl.BlockSpec((1, Hc), const),          # fused layer-1 bias
            pl.BlockSpec((1, Hc), const),          # student layer-2 row
            pl.BlockSpec((1, Hc), const),          # teacher layer-2 row
            pl.BlockSpec((1, 1), const),           # student layer-2 bias
            pl.BlockSpec((1, 1), const),           # teacher layer-2 bias
        ],
        # one (8,128) partial-sum tile per split, written only at finalize
        out_specs=pl.BlockSpec((1, 8, 128), lambda c, i: (c, 0, 0)),
        scratch_shapes=[pltpu.SMEM((nc, 2), jnp.float32)],  # per-split [sum_bce, sum_sq]
    )

    kernel = functools.partial(_kd4ctr_kernel, b_total=B, tile_b=tile_b,
                               nb_per_core=nbpc)

    cost = pl.CostEstimate(
        flops=int(2 * B * F * Hc + 6 * B * Hc),
        transcendentals=int(2 * B),
        bytes_accessed=int(B * F * 4 + B * 4 + F * Hc * 4 + 4 * Hc * 4
                           + nc * 8 * 128 * 4),
    )

    partials = pl.pallas_call(
        kernel,
        out_shape=jax.ShapeDtypeStruct((nc, 8, 128), jnp.float32),
        grid_spec=grid_spec,
        compiler_params=pltpu.CompilerParams(
            dimension_semantics=("parallel", "arbitrary"),
            vmem_limit_bytes=32 * 1024 * 1024,   # within v5e/v6e/v7x scoped limits
        ),
        cost_estimate=cost,
    )(data_f, label_f, w1_cat, b1_cat, w2s_cat, w2t_cat, b2s_, b2t_)

    # --- trivial XLA epilogue: reduce nc*2 floats and compose the losses ---
    sums = jnp.sum(partials[:, 0, :2], axis=0)
    inv_b = jnp.float32(1.0 / B)
    base_loss = sums[0] * inv_b
    kd_loss = sums[1] * inv_b
    loss = base_loss + jnp.float32(lmbda) * kd_loss
    return jnp.stack([loss, base_loss, kd_loss])


def _init_mlp(key, f_in, hidden):
    k1, k2, k3, k4 = jax.random.split(key, 4)
    w1 = jax.random.normal(k1, (f_in, hidden), jnp.float32) * 0.05
    b1 = jax.random.normal(k2, (1, hidden), jnp.float32) * 0.01
    w2 = jax.random.normal(k3, (hidden, 1), jnp.float32) * 0.05
    b2 = jax.random.normal(k4, (1, 1), jnp.float32) * 0.01
    return (w1, b1, w2, b2)


def _reference(data, label, student_params, teacher_params, lmbda=LMBDA):
    """Pure-JAX f32 reference (same numerics as the PyTorch module)."""
    w1s, b1s, w2s, b2s = student_params
    w1t, b1t, w2t, b2t = teacher_params
    x = data.astype(jnp.float32)
    z_s = jnp.maximum(x @ w1s + b1s, 0.0) @ w2s + b2s
    z_t = jnp.maximum(x @ w1t + b1t, 0.0) @ w2t + b2t
    y = label.astype(jnp.float32)
    bce = jnp.maximum(z_s, 0.0) - z_s * y + jnp.log1p(jnp.exp(-jnp.abs(z_s)))
    base = jnp.mean(bce)
    kd = jnp.mean((z_s - z_t) ** 2)
    return jnp.stack([base + lmbda * kd, base, kd])


if __name__ == "__main__":
    # batch, dense features, student hidden, teacher hidden (B NOT a multiple of
    # the tile on purpose, to exercise the masked ragged tail + duplicated tile).
    B, F, HS, HT = 200, 32, 16, 64

    key = jax.random.PRNGKey(0)
    k_data, k_label, k_stu, k_tea = jax.random.split(key, 4)

    data = jax.random.normal(k_data, (B, F), jnp.float32)
    label = jax.random.bernoulli(k_label, 0.5, (B, 1)).astype(jnp.float32)

    student_params = _init_mlp(k_stu, F, HS)
    teacher_params = _init_mlp(k_tea, F, HT)

    ref = _reference(data, label, student_params, teacher_params)

    # Case 1: default big tile (ragged tail + fully-masked duplicate split tile).
    out = kd4ctr_forward(data, label, student_params, teacher_params)
    out = jax.block_until_ready(out)
    assert jnp.isfinite(out).all()
    loss, base_loss, kd_loss = [float(v) for v in out]
    assert abs(loss - (base_loss + LMBDA * kd_loss)) < 1e-5
    assert jnp.allclose(out, ref, rtol=1e-2, atol=1e-3), (out, ref)

    # Case 2: small tile so both splits do real work (true 2-way batch split).
    out2 = kd4ctr_forward(data, label, student_params, teacher_params, tile_b=128)
    out2 = jax.block_until_ready(out2)
    assert jnp.isfinite(out2).all()
    assert jnp.allclose(out2, ref, rtol=1e-2, atol=1e-3), (out2, ref)

    print("KERNEL_OK")
</pallas_src>

<mosaic_0001>
module attributes {stable_mosaic.version = 11 : i64} {
  func.func @_kd4ctr_kernel(%arg0: i32, %arg1: i32, %arg2: memref<512x32xf32, #tpu.memory_space<vmem>>, %arg3: memref<512x1xf32, #tpu.memory_space<vmem>>, %arg4: memref<32x80xf32, #tpu.memory_space<vmem>>, %arg5: memref<1x80xf32, #tpu.memory_space<vmem>>, %arg6: memref<1x80xf32, #tpu.memory_space<vmem>>, %arg7: memref<1x80xf32, #tpu.memory_space<vmem>>, %arg8: memref<1x1xf32, #tpu.memory_space<vmem>>, %arg9: memref<1x1xf32, #tpu.memory_space<vmem>>, %arg10: memref<1x8x128xf32, #tpu.memory_space<vmem>>, %arg11: memref<2x2xf32, #tpu.memory_space<smem>>) attributes {dimension_semantics = [#tpu.dimension_semantics<parallel>, #tpu.dimension_semantics<arbitrary>], iteration_bounds = array<i64: 2, 1>, scalar_prefetch = 0 : i64, scratch_operands = 1 : i64, tpu.core_type = #tpu.core_type<tc>, window_params = [{transform_indices = @transform_0, window_bounds = array<i64: 512, 32>}, {transform_indices = @transform_1, window_bounds = array<i64: 512, 1>}, {pipeline_mode = #tpu.pipeline_mode<synchronous>, transform_indices = @transform_2, window_bounds = array<i64: 32, 80>}, {pipeline_mode = #tpu.pipeline_mode<synchronous>, transform_indices = @transform_3, window_bounds = array<i64: 1, 80>}, {pipeline_mode = #tpu.pipeline_mode<synchronous>, transform_indices = @transform_4, window_bounds = array<i64: 1, 80>}, {pipeline_mode = #tpu.pipeline_mode<synchronous>, transform_indices = @transform_5, window_bounds = array<i64: 1, 80>}, {pipeline_mode = #tpu.pipeline_mode<synchronous>, transform_indices = @transform_6, window_bounds = array<i64: 1, 1>}, {pipeline_mode = #tpu.pipeline_mode<synchronous>, transform_indices = @transform_7, window_bounds = array<i64: 1, 1>}, {transform_indices = @transform_8, window_bounds = array<i64: 1, 8, 128>}]} {
    %c0_i32 = arith.constant 0 : i32
    %0 = arith.cmpi eq, %arg1, %c0_i32 : i32
    %1 = arith.extui %0 : i1 to i32
    %c0_i32_0 = arith.constant 0 : i32
    %2 = arith.cmpi ne, %1, %c0_i32_0 : i32
    scf.if %2 {
      %cst_30 = arith.constant 0.000000e+00 : f32
      %73 = arith.index_cast %arg0 : i32 to index
      %c0_31 = arith.constant 0 : index
      %74 = memref.load %arg11[%73, %c0_31] : memref<2x2xf32, #tpu.memory_space<smem>>
      memref.store %cst_30, %arg11[%73, %c0_31] : memref<2x2xf32, #tpu.memory_space<smem>>
      %cst_32 = arith.constant 0.000000e+00 : f32
      %75 = arith.index_cast %arg0 : i32 to index
      %c1_33 = arith.constant 1 : index
      %76 = memref.load %arg11[%75, %c1_33] : memref<2x2xf32, #tpu.memory_space<smem>>
      memref.store %cst_32, %arg11[%75, %c1_33] : memref<2x2xf32, #tpu.memory_space<smem>>
    } else {
    }
    %c0 = arith.constant 0 : index
    %c0_1 = arith.constant 0 : index
    %3 = vector.load %arg2[%c0, %c0_1] : memref<512x32xf32, #tpu.memory_space<vmem>>, vector<512x32xf32>
    %c0_2 = arith.constant 0 : index
    %c0_3 = arith.constant 0 : index
    %4 = vector.load %arg3[%c0_2, %c0_3] : memref<512x1xf32, #tpu.memory_space<vmem>>, vector<512x1xf32>
    %c0_4 = arith.constant 0 : index
    %c0_5 = arith.constant 0 : index
    %5 = vector.load %arg4[%c0_4, %c0_5] : memref<32x80xf32, #tpu.memory_space<vmem>>, vector<32x80xf32>
    %cst = arith.constant dense<0.000000e+00> : vector<512x80xf32>
    %6 = tpu.matmul %3, %5, %cst {dimension_numbers = #tpu.dot_dimension_numbers<[1], [0], [0], [1], [0, 0, 1, 1], [], []>} : vector<512x32xf32>, vector<32x80xf32>, vector<512x80xf32> -> vector<512x80xf32>
    %c0_6 = arith.constant 0 : index
    %c0_7 = arith.constant 0 : index
    %7 = vector.load %arg5[%c0_6, %c0_7] : memref<1x80xf32, #tpu.memory_space<vmem>>, vector<1x80xf32>
    %8 = vector.broadcast %7 : vector<1x80xf32> to vector<512x80xf32>
    %9 = arith.addf %6, %8 : vector<512x80xf32>
    %cst_8 = arith.constant 0.000000e+00 : f32
    %10 = vector.broadcast %cst_8 : f32 to vector<512x80xf32>
    %11 = arith.maximumf %9, %10 : vector<512x80xf32>
    %c0_9 = arith.constant 0 : index
    %c0_10 = arith.constant 0 : index
    %12 = vector.load %arg6[%c0_9, %c0_10] : memref<1x80xf32, #tpu.memory_space<vmem>>, vector<1x80xf32>
    %13 = vector.broadcast %12 : vector<1x80xf32> to vector<512x80xf32>
    %14 = arith.mulf %11, %13 : vector<512x80xf32>
    %cst_11 = arith.constant dense<0.000000e+00> : vector<512xf32>
    %15 = vector.multi_reduction <add>, %14, %cst_11 [1] : vector<512x80xf32> to vector<512xf32>
    %16 = vector.shape_cast %15 : vector<512xf32> to vector<512x1xf32>
    %c0_12 = arith.constant 0 : index
    %c0_13 = arith.constant 0 : index
    %17 = vector.load %arg8[%c0_12, %c0_13] : memref<1x1xf32, #tpu.memory_space<vmem>>, vector<1x1xf32>
    %18 = vector.broadcast %17 : vector<1x1xf32> to vector<512x1xf32>
    %19 = arith.addf %16, %18 : vector<512x1xf32>
    %c0_14 = arith.constant 0 : index
    %c0_15 = arith.constant 0 : index
    %20 = vector.load %arg7[%c0_14, %c0_15] : memref<1x80xf32, #tpu.memory_space<vmem>>, vector<1x80xf32>
    %21 = vector.broadcast %20 : vector<1x80xf32> to vector<512x80xf32>
    %22 = arith.mulf %11, %21 : vector<512x80xf32>
    %cst_16 = arith.constant dense<0.000000e+00> : vector<512xf32>
    %23 = vector.multi_reduction <add>, %22, %cst_16 [1] : vector<512x80xf32> to vector<512xf32>
    %24 = vector.shape_cast %23 : vector<512xf32> to vector<512x1xf32>
    %c0_17 = arith.constant 0 : index
    %c0_18 = arith.constant 0 : index
    %25 = vector.load %arg9[%c0_17, %c0_18] : memref<1x1xf32, #tpu.memory_space<vmem>>, vector<1x1xf32>
    %26 = vector.broadcast %25 : vector<1x1xf32> to vector<512x1xf32>
    %27 = arith.addf %24, %26 : vector<512x1xf32>
    %c1_i32 = arith.constant 1 : i32
    %28 = arith.muli %arg0, %c1_i32 : i32
    %29 = arith.addi %28, %arg1 : i32
    %c512_i32 = arith.constant 512 : i32
    %30 = arith.muli %29, %c512_i32 : i32
    %31 = tpu.iota {dimensions = array<i32: 0>} : vector<512x1xi32>
    %32 = vector.broadcast %30 : i32 to vector<512x1xi32>
    %33 = arith.addi %32, %31 : vector<512x1xi32>
    %c200_i32 = arith.constant 200 : i32
    %34 = vector.broadcast %c200_i32 : i32 to vector<512x1xi32>
    %35 = arith.cmpi slt, %33, %34 : vector<512x1xi32>
    %cst_19 = arith.constant 0.000000e+00 : f32
    %36 = vector.broadcast %cst_19 : f32 to vector<512x1xf32>
    %37 = arith.maximumf %19, %36 : vector<512x1xf32>
    %38 = arith.mulf %19, %4 : vector<512x1xf32>
    %39 = arith.subf %37, %38 : vector<512x1xf32>
    %40 = math.absf %19 : vector<512x1xf32>
    %cst_20 = arith.constant 0.000000e+00 : f32
    %41 = vector.broadcast %cst_20 : f32 to vector<512x1xf32>
    %42 = arith.subf %41, %40 : vector<512x1xf32>
    %43 = math.exp %42 : vector<512x1xf32>
    %44 = math.log1p %43 : vector<512x1xf32>
    %45 = arith.addf %39, %44 : vector<512x1xf32>
    %46 = arith.subf %19, %27 : vector<512x1xf32>
    %47 = arith.mulf %46, %46 : vector<512x1xf32>
    %48 = arith.index_cast %arg0 : i32 to index
    %c0_21 = arith.constant 0 : index
    %49 = memref.load %arg11[%48, %c0_21] : memref<2x2xf32, #tpu.memory_space<smem>>
    %cst_22 = arith.constant 0.000000e+00 : f32
    %50 = vector.broadcast %cst_22 : f32 to vector<512x1xf32>
    %51 = arith.select %35, %45, %50 : vector<512x1xi1>, vector<512x1xf32>
    %52 = vector.shape_cast %51 : vector<512x1xf32> to vector<1x512x1xf32>
    %cst_23 = arith.constant dense<0.000000e+00> : vector<1xf32>
    %53 = vector.multi_reduction <add>, %52, %cst_23 [1, 2] : vector<1x512x1xf32> to vector<1xf32>
    %54 = vector.shape_cast %53 : vector<1xf32> to vector<1x1x1xf32>
    %55 = vector.extract %54[0, 0, 0] : f32 from vector<1x1x1xf32>
    %56 = arith.addf %49, %55 : f32
    %57 = arith.index_cast %arg0 : i32 to index
    %c0_24 = arith.constant 0 : index
    %58 = memref.load %arg11[%57, %c0_24] : memref<2x2xf32, #tpu.memory_space<smem>>
    memref.store %56, %arg11[%57, %c0_24] : memref<2x2xf32, #tpu.memory_space<smem>>
    %59 = arith.index_cast %arg0 : i32 to index
    %c1 = arith.constant 1 : index
    %60 = memref.load %arg11[%59, %c1] : memref<2x2xf32, #tpu.memory_space<smem>>
    %cst_25 = arith.constant 0.000000e+00 : f32
    %61 = vector.broadcast %cst_25 : f32 to vector<512x1xf32>
    %62 = arith.select %35, %47, %61 : vector<512x1xi1>, vector<512x1xf32>
    %63 = vector.shape_cast %62 : vector<512x1xf32> to vector<1x512x1xf32>
    %cst_26 = arith.constant dense<0.000000e+00> : vector<1xf32>
    %64 = vector.multi_reduction <add>, %63, %cst_26 [1, 2] : vector<1x512x1xf32> to vector<1xf32>
    %65 = vector.shape_cast %64 : vector<1xf32> to vector<1x1x1xf32>
    %66 = vector.extract %65[0, 0, 0] : f32 from vector<1x1x1xf32>
    %67 = arith.addf %60, %66 : f32
    %68 = arith.index_cast %arg0 : i32 to index
    %c1_27 = arith.constant 1 : index
    %69 = memref.load %arg11[%68, %c1_27] : memref<2x2xf32, #tpu.memory_space<smem>>
    memref.store %67, %arg11[%68, %c1_27] : memref<2x2xf32, #tpu.memory_space<smem>>
    %c0_i32_28 = arith.constant 0 : i32
    %70 = arith.cmpi eq, %arg1, %c0_i32_28 : i32
    %71 = arith.extui %70 : i1 to i32
    %c0_i32_29 = arith.constant 0 : i32
    %72 = arith.cmpi ne, %71, %c0_i32_29 : i32
    scf.if %72 {
      %73 = tpu.iota {dimensions = array<i32: 0>} : vector<8x128xi32>
      %74 = tpu.iota {dimensions = array<i32: 1>} : vector<8x128xi32>
      %c0_i32_30 = arith.constant 0 : i32
      %75 = vector.broadcast %c0_i32_30 : i32 to vector<8x128xi32>
      %76 = arith.cmpi eq, %73, %75 : vector<8x128xi32>
      %c0_i32_31 = arith.constant 0 : i32
      %77 = vector.broadcast %c0_i32_31 : i32 to vector<8x128xi32>
      %78 = arith.cmpi eq, %74, %77 : vector<8x128xi32>
      %79 = arith.andi %76, %78 : vector<8x128xi1>
      %80 = arith.index_cast %arg0 : i32 to index
      %c0_32 = arith.constant 0 : index
      %81 = memref.load %arg11[%80, %c0_32] : memref<2x2xf32, #tpu.memory_space<smem>>
      %c0_i32_33 = arith.constant 0 : i32
      %82 = vector.broadcast %c0_i32_33 : i32 to vector<8x128xi32>
      %83 = arith.cmpi eq, %73, %82 : vector<8x128xi32>
      %c1_i32_34 = arith.constant 1 : i32
      %84 = vector.broadcast %c1_i32_34 : i32 to vector<8x128xi32>
      %85 = arith.cmpi eq, %74, %84 : vector<8x128xi32>
      %86 = arith.andi %83, %85 : vector<8x128xi1>
      %87 = arith.index_cast %arg0 : i32 to index
      %c1_35 = arith.constant 1 : index
      %88 = memref.load %arg11[%87, %c1_35] : memref<2x2xf32, #tpu.memory_space<smem>>
      %cst_36 = arith.constant 0.000000e+00 : f32
      %89 = vector.broadcast %88 : f32 to vector<8x128xf32>
      %90 = vector.broadcast %cst_36 : f32 to vector<8x128xf32>
      %91 = arith.select %86, %89, %90 : vector<8x128xi1>, vector<8x128xf32>
      %92 = vector.broadcast %81 : f32 to vector<8x128xf32>
      %93 = arith.select %79, %92, %91 : vector<8x128xi1>, vector<8x128xf32>
      %c0_37 = arith.constant 0 : index
      %c0_38 = arith.constant 0 : index
      %c0_39 = arith.constant 0 : index
      %94 = vector.load %arg10[%c0_37, %c0_38, %c0_39] : memref<1x8x128xf32, #tpu.memory_space<vmem>>, vector<1x8x128xf32>
      %95 = vector.shape_cast %94 : vector<1x8x128xf32> to vector<8x128xf32>
      %96 = vector.shape_cast %93 : vector<8x128xf32> to vector<1x8x128xf32>
      tpu.vector_store %arg10[%c0_37, %c0_38, %c0_39], %96 {strides = array<i32>} : memref<1x8x128xf32, #tpu.memory_space<vmem>>, vector<1x8x128xf32>,
    } else {
    }
    return
  }
  func.func @transform_0(%arg0: i32, %arg1: i32) -> (i32, i32) {
    %c1_i32 = arith.constant 1 : i32
    %0 = arith.muli %arg0, %c1_i32 : i32
    %1 = arith.addi %0, %arg1 : i32
    %c0_i32 = arith.constant 0 : i32
    %2 = arith.minsi %1, %c0_i32 : i32
    %c0_i32_0 = arith.constant 0 : i32
    %c0_i32_1 = arith.constant 0 : i32
    return %2, %c0_i32_0 : i32, i32
  }
  func.func @transform_1(%arg0: i32, %arg1: i32) -> (i32, i32) {
    %c1_i32 = arith.constant 1 : i32
    %0 = arith.muli %arg0, %c1_i32 : i32
    %1 = arith.addi %0, %arg1 : i32
    %c0_i32 = arith.constant 0 : i32
    %2 = arith.minsi %1, %c0_i32 : i32
    %c0_i32_0 = arith.constant 0 : i32
    %c0_i32_1 = arith.constant 0 : i32
    return %2, %c0_i32_0 : i32, i32
  }
  func.func @transform_2(%arg0: i32, %arg1: i32) -> (i32, i32) {
    %c0_i32 = arith.constant 0 : i32
    %c0_i32_0 = arith.constant 0 : i32
    %c0_i32_1 = arith.constant 0 : i32
    return %c0_i32, %c0_i32_0 : i32, i32
  }
  func.func @transform_3(%arg0: i32, %arg1: i32) -> (i32, i32) {
    %c0_i32 = arith.constant 0 : i32
    %c0_i32_0 = arith.constant 0 : i32
    %c0_i32_1 = arith.constant 0 : i32
    return %c0_i32, %c0_i32_0 : i32, i32
  }
  func.func @transform_4(%arg0: i32, %arg1: i32) -> (i32, i32) {
    %c0_i32 = arith.constant 0 : i32
    %c0_i32_0 = arith.constant 0 : i32
    %c0_i32_1 = arith.constant 0 : i32
    return %c0_i32, %c0_i32_0 : i32, i32
  }
  func.func @transform_5(%arg0: i32, %arg1: i32) -> (i32, i32) {
    %c0_i32 = arith.constant 0 : i32
    %c0_i32_0 = arith.constant 0 : i32
    %c0_i32_1 = arith.constant 0 : i32
    return %c0_i32, %c0_i32_0 : i32, i32
  }
  func.func @transform_6(%arg0: i32, %arg1: i32) -> (i32, i32) {
    %c0_i32 = arith.constant 0 : i32
    %c0_i32_0 = arith.constant 0 : i32
    %c0_i32_1 = arith.constant 0 : i32
    return %c0_i32, %c0_i32_0 : i32, i32
  }
  func.func @transform_7(%arg0: i32, %arg1: i32) -> (i32, i32) {
    %c0_i32 = arith.constant 0 : i32
    %c0_i32_0 = arith.constant 0 : i32
    %c0_i32_1 = arith.constant 0 : i32
    return %c0_i32, %c0_i32_0 : i32, i32
  }
  func.func @transform_8(%arg0: i32, %arg1: i32) -> (i32, i32, i32) {
    %c0_i32 = arith.constant 0 : i32
    %c0_i32_0 = arith.constant 0 : i32
    %c0_i32_1 = arith.constant 0 : i32
    return %arg0, %c0_i32, %c0_i32_0 : i32, i32, i32
  }
}

</mosaic_0001>

<bundles_post_ra>
// kernel: tpu_custom_call.1
= control target key start
LH: loop header
LB: loop body
LE: loop exit
PB: predicated region body
PF: predicated region fallthrough
CT: control target
= control target key end

     0   :  { %s7279_s0 = inlined_call_operand.vmem [shape: f32[200,32], index: 0, kind: input, shape index: {}]   ;;  %s7280_s1 = inlined_call_operand.vmem [shape: f32[200,1], index: 1, kind: input, shape index: {}]   ;;  %s7281_s2 = inlined_call_operand.vmem [shape: f32[32,80], index: 2, kind: input, shape index: {}]   ;;  %s7282_s3 = inlined_call_operand.vmem [shape: f32[1,80], index: 3, kind: input, shape index: {}]   ;;  %s7283_s4 = inlined_call_operand.vmem [shape: f32[1,80], index: 4, kind: input, shape index: {}]   ;;  %s7284_s5 = inlined_call_operand.vmem [shape: f32[1,80], index: 5, kind: input, shape index: {}]   ;;  %s7285_s6 = inlined_call_operand.<no memory space> [shape: f32[1,1], index: 6, kind: input, shape index: {}]   ;;  %s7286_s8 = inlined_call_operand.hbm [shape: f32[2,8,128], index: 8, kind: output, shape index: {}]   ;;  %s7287_s7 = inlined_call_operand.<no memory space> [shape: f32[1,1], index: 7, kind: input, shape index: {}]  }
   0x1   :  { %7351 = sst [smem:[#allocation75_spill]] %s7279_s0  ;;  %v13_v0 = vstv %s7285_s6  ;;  %v15_v1 = vstv %s7287_s7 }
   0x2   :  { %7352 = sst [smem:[#allocation76_spill]] %s7280_s1  ;;  %14 = vst [vmem:[#allocation3] sm:$0x1] %v13_v0 }
   0x3   :  { %7353 = sst [smem:[#allocation77_spill]] %s7281_s2  ;;  %16 = vst [vmem:[#allocation4] sm:$0x1] %v15_v1 }
   0x4   :  { %17 = vsyncpa [#allocation6], 0 }
   0x5   :  { %19 = vsyncpa [#allocation6 + $0x1], 0  ;;  %s4183_s9 = smov 0   ;;  %s4185_s10 = smov 0  }
   0x6   :  { %s4187_s11 = smov 0   ;;  %s4189_s12 = smov 0  }
   0x7   :  { %s4191_s13 = smov 0   ;;  %s4193_s14 = smov 0  }
   0x8 LB: > { %s3620_s6 = sadd.s32 4294967295, %s4129_s14   ;;  %s3621_s7 = sadd.s32 4294967294, %s4129_s14   ;;  %s4129_s14 = sphi %s4193_s14, %s25_s14   ;;  %s4125_s13 = sphi %s4191_s13, %s7688_s13   ;;  %s4121_s12 = sphi %s4189_s12, %s7687_s12   ;;  %s4117_s11 = sphi %s4187_s11, %s7686_s11   ;;  %s4113_s10 = sphi %s4185_s10, %s7685_s10   ;;  %s4109_s9 = sphi %s4183_s9, %s7684_s9  }
   0x9   : > { %s37_s15 = sadd.s32 1, %s4125_s13  ;;  %s234_s16 = sadd.s32 1, %s4117_s11 }
   0xa   : > { %p39_p0 = scmp.ge.s32.totalorder %s37_s15, 2  ;;  %p244_p1 = scmp.ne.s32.totalorder %s4117_s11, %s4113_s10 }
   0xb   : > { %p245_p2 = scmp.eq.s32.totalorder %s3620_s6, 1  ;;  %p250_p3 = scmp.ne.s32.totalorder %s4113_s10, %s4109_s9 }
   0xc   : > { %s7690_s15 = smov (%p39_p0, %s37_s15), 0  ;;  %p251_p5 = scmp.eq.s32.totalorder %s3621_s7, 1 }
   0xd   : > { %p4223_p4 = por %p245_p2, %p244_p1  ;;  %s231_s18 = ssub.s32 %s4125_s13, %s7690_s15 }
   0xe   : > { %p3624_p6 = scmp.ge.s32.totalorder %s4129_s14, 1  ;;  %p232_p7 = scmp.eq.s32.totalorder %s231_s18, 0 }
   0xf   : > { %p4230_p8 = por %p251_p5, %p250_p3  ;;  %p325_p9 = scmp.lt.s32.totalorder %s4129_s14, 3 }
  0x10   : > { %s4236_s20 = scalar_select %p232_p7, %s4117_s11, %s234_s16  }
  0x11   : > { %p326_p10 = pnand %p3624_p6, %p325_p9 }
  0x13   : > { %329 = sbr.rel (%p326_p10) target bundleno = 1035 (0x40b), region = 52 }
  0x18   : > { %s7356_s2 = sld [smem:[#allocation77_spill]]  ;;  %p375_p11 = scmp.lt.s32.totalorder %s4121_s12, 0  ;;  %vm552_vm0 = vcmask 261120   ;;  %v4339_v43 = vld [vmem:[%s7282_s3] ss:$0 sm:$0xff]  ;;  %vm1086_vm1 = vcmask 654336  }
  0x19   : > { %s7357_s0 = sld [smem:[#allocation75_spill]]  ;;  %v4344_v46 = vld [vmem:[%s7284_s5] ss:$0 sm:$0xff]  ;;  %vm3153_vm4 = vcmask 7168   ;;  %s4131_s16 = smov 0.0  }
  0x1a   : > { %s376_s27 = scalar_select %p375_p11, %s4121_s12, 0  ;;  %v4351_v49 = vld [vmem:[%s7283_s4] ss:$0 sm:$0xff] }
  0x1b   : > { %s7360_s1 = sld [smem:[#allocation76_spill]] }
  0x1c   : > { %s3626_s30 = sshll.u32 %s376_s27, 6  ;;  %s3696_s27 = sshll.u32 %s4121_s12, 9 }
  0x1d   : > { %p380_p12 = scmp.lt.s32.totalorder %s3626_s30, 24 }
  0x1e   : > { %v547_v2 = vld [vmem:[%s7356_s2 + $0x18] sm:$0xff]  ;;  %v546_v3 = vld [vmem:[%s7356_s2 + $0x10] sm:$0xff]  ;;  %v545_v4 = vld [vmem:[%s7356_s2 + $0x8] sm:$0xff] }
  0x1f   : > { %757 = vmatpush.msra.mxu0 %v547_v2  ;;  %3703 = vmatpush.msra.mxu1 %v547_v2  ;;  %v544_v5 = vld [vmem:[%s7356_s2] sm:$0xff]  ;;  %s7692_s30 = smov (!%p380_p12, %s3626_s30), 24 }
  0x20   : > { %3704 = vmatpush.msra.mxu2 %v547_v2  ;;  %3705 = vmatpush.msra.mxu3 %v547_v2  ;;  %s3627_s6 = sshll.u32 %s7692_s30, 3  ;;  %s3700_s30 = sshll.u32 %s4121_s12, 3 }
  0x21   : > { %758 = vmatpush.msra.mxu0 %v546_v3  ;;  %3706 = vmatpush.msra.mxu1 %v546_v3  ;;  %s4260_s18 = scalar_lea.vmem %s7357_s0, %s3627_s6  ;;  %s4641_s7 = scalar_lea.vmem %s7360_s1, %s3627_s6 }
  0x22   : > { %3707 = vmatpush.msra.mxu2 %v546_v3  ;;  %3708 = vmatpush.msra.mxu3 %v546_v3  ;;  %v416_v6 = vld [vmem:[%s4260_s18] sm:$0xff]  ;;  %v417_v10 = vld [vmem:[%s4260_s18 + $0x8] sm:$0xff]  ;;  %v418_v14 = vld [vmem:[%s4260_s18 + $0x10] sm:$0xff] }
  0x23   : > { %759 = vmatpush.msra.mxu0 %v545_v4  ;;  %3709 = vmatpush.msra.mxu1 %v545_v4  ;;  %v432_v7 = vld [vmem:[%s4260_s18 + $0x80] sm:$0xff]  ;;  %v433_v11 = vld [vmem:[%s4260_s18 + $0x88] sm:$0xff]  ;;  %v434_v15 = vld [vmem:[%s4260_s18 + $0x90] sm:$0xff] }
  0x24   : > { %3710 = vmatpush.msra.mxu2 %v545_v4  ;;  %3711 = vmatpush.msra.mxu3 %v545_v4  ;;  %v448_v8 = vld [vmem:[%s4260_s18 + $0x100] sm:$0xff]  ;;  %v465_v12 = vld [vmem:[%s4260_s18 + $0x188] sm:$0xff]  ;;  %v450_v16 = vld [vmem:[%s4260_s18 + $0x110] sm:$0xff] }
  0x25   : > { %760 = vmatpush.msra.mxu0 %v544_v5  ;;  %3712 = vmatpush.msra.mxu1 %v544_v5  ;;  %v464_v9 = vld [vmem:[%s4260_s18 + $0x180] sm:$0xff]  ;;  %v449_v13 = vld [vmem:[%s4260_s18 + $0x108] sm:$0xff]  ;;  %v419_v17 = vld [vmem:[%s4260_s18 + $0x18] sm:$0xff] }
  0x26   : > { %3713 = vmatpush.msra.mxu2 %v544_v5  ;;  %3714 = vmatpush.msra.mxu3 %v544_v5  ;;  %v435_v18 = vld [vmem:[%s4260_s18 + $0x98] sm:$0xff]  ;;  %v420_v20 = vld [vmem:[%s4260_s18 + $0x20] sm:$0xff]  ;;  %v437_v23 = vld [vmem:[%s4260_s18 + $0xa8] sm:$0xff] }
  0x27   : > { %3632 = vmatmul.msk.f32.vlgmr.msra.gmra.mxu0 %vm552_vm0, %v416_v6  ;;  %3648 = vmatmul.msk.f32.vlgmr.msra.gmra.mxu1 %vm552_vm0, %v432_v7  ;;  %v451_v19 = vld [vmem:[%s4260_s18 + $0x118] sm:$0xff]  ;;  %v436_v21 = vld [vmem:[%s4260_s18 + $0xa0] sm:$0xff]  ;;  %v421_v24 = vld [vmem:[%s4260_s18 + $0x28] sm:$0xff] }
  0x28   : > { %3664 = vmatmul.msk.f32.vlgmr.msra.gmra.mxu2 %vm552_vm0, %v448_v8  ;;  %3680 = vmatmul.msk.f32.vlgmr.msra.gmra.mxu3 %vm552_vm0, %v464_v9  ;;  %v452_v22 = vld [vmem:[%s4260_s18 + $0x120] sm:$0xff]  ;;  %v453_v25 = vld [vmem:[%s4260_s18 + $0x128] sm:$0xff]  ;;  %v438_v26 = vld [vmem:[%s4260_s18 + $0xb0] sm:$0xff] }
  0x29   : > { %v422_v27 = vld [vmem:[%s4260_s18 + $0x30] sm:$0xff]  ;;  %v439_v29 = vld [vmem:[%s4260_s18 + $0xb8] sm:$0xff]  ;;  %v440_v32 = vld [vmem:[%s4260_s18 + $0xc0] sm:$0xff] }
  0x2a   : > { %v454_v28 = vld [vmem:[%s4260_s18 + $0x130] sm:$0xff]  ;;  %v423_v30 = vld [vmem:[%s4260_s18 + $0x38] sm:$0xff]  ;;  %v424_v33 = vld [vmem:[%s4260_s18 + $0x40] sm:$0xff] }
  0x2b   : > { %v455_v31 = vld [vmem:[%s4260_s18 + $0x138] sm:$0xff]  ;;  %v456_v34 = vld [vmem:[%s4260_s18 + $0x140] sm:$0xff]  ;;  %v441_v35 = vld [vmem:[%s4260_s18 + $0xc8] sm:$0xff] }
  0x2c   : > { %v425_v36 = vld [vmem:[%s4260_s18 + $0x48] sm:$0xff]  ;;  %v442_v38 = vld [vmem:[%s4260_s18 + $0xd0] sm:$0xff]  ;;  %v459_v41 = vld [vmem:[%s4260_s18 + $0x158] sm:$0xff] }
  0x2d   : > { %v457_v37 = vld [vmem:[%s4260_s18 + $0x148] sm:$0xff]  ;;  %v458_v39 = vld [vmem:[%s4260_s18 + $0x150] sm:$0xff]  ;;  %v443_v42 = vld [vmem:[%s4260_s18 + $0xd8] sm:$0xff] }
  0x2e   : > { %v426_v40 = vld [vmem:[%s4260_s18 + $0x50] sm:$0xff]  ;;  %v427_v50 = vld [vmem:[%s4260_s18 + $0x58] sm:$0xff]  ;;  %v444_v51 = vld [vmem:[%s4260_s18 + $0xe0] sm:$0xff] }
  0x2f   : > { %3633 = vmatmul.msk.f32.gmra.mxu0 %vm552_vm0, %v417_v10  ;;  %3649 = vmatmul.msk.f32.gmra.mxu1 %vm552_vm0, %v433_v11  ;;  %v428_v0 = vld [vmem:[%s4260_s18 + $0x60] sm:$0xff] }
  0x30   : > { %3681 = vmatmul.msk.f32.gmra.mxu3 %vm552_vm0, %v465_v12  ;;  %3665 = vmatmul.msk.f32.gmra.mxu2 %vm552_vm0, %v449_v13  ;;  %v460_v1 = vld [vmem:[%s4260_s18 + $0x160] sm:$0xff] }
  0x37   : > { %3634 = vmatmul.msk.f32.gmra.mxu0 %vm552_vm0, %v418_v14  ;;  %3650 = vmatmul.msk.f32.gmra.mxu1 %vm552_vm0, %v434_v15 }
  0x38   : > { %3666 = vmatmul.msk.f32.gmra.mxu2 %vm552_vm0, %v450_v16 }
  0x3f   : > { %3635 = vmatmul.msk.f32.gmra.mxu0 %vm552_vm0, %v419_v17  ;;  %3651 = vmatmul.msk.f32.gmra.mxu1 %vm552_vm0, %v435_v18 }
  0x40   : > { %3667 = vmatmul.msk.f32.gmra.mxu2 %vm552_vm0, %v451_v19 }
  0x47   : > { %3636 = vmatmul.msk.f32.gmra.mxu0 %vm552_vm0, %v420_v20  ;;  %3652 = vmatmul.msk.f32.gmra.mxu1 %vm552_vm0, %v436_v21  ;;  %v445_v20 = vld [vmem:[%s4260_s18 + $0xe8] sm:$0xff] }
  0x48   : > { %3668 = vmatmul.msk.f32.gmra.mxu2 %vm552_vm0, %v452_v22  ;;  %v461_v21 = vld [vmem:[%s4260_s18 + $0x168] sm:$0xff]  ;;  %v466_v22 = vld [vmem:[%s4260_s18 + $0x190] sm:$0xff] }
  0x49   : > { %3682 = vmatmul.msk.f32.gmra.mxu3 %vm552_vm0, %v466_v22  ;;  %v431_v22 = vld [vmem:[%s4260_s18 + $0x78] sm:$0xff] }
  0x4f   : > { %3653 = vmatmul.msk.f32.gmra.mxu1 %vm552_vm0, %v437_v23  ;;  %3637 = vmatmul.msk.f32.gmra.mxu0 %vm552_vm0, %v421_v24 }
  0x50   : > { %3669 = vmatmul.msk.f32.gmra.mxu2 %vm552_vm0, %v453_v25 }
  0x57   : > { %3654 = vmatmul.msk.f32.gmra.mxu1 %vm552_vm0, %v438_v26  ;;  %3638 = vmatmul.msk.f32.gmra.mxu0 %vm552_vm0, %v422_v27 }
  0x58   : > { %3670 = vmatmul.msk.f32.gmra.mxu2 %vm552_vm0, %v454_v28 }
  0x5f   : > { %3655 = vmatmul.msk.f32.gmra.mxu1 %vm552_vm0, %v439_v29  ;;  %3639 = vmatmul.msk.f32.gmra.mxu0 %vm552_vm0, %v423_v30 }
  0x60   : > { %3671 = vmatmul.msk.f32.gmra.mxu2 %vm552_vm0, %v455_v31 }
  0x67   : > { %3656 = vmatmul.msk.f32.gmra.mxu1 %vm552_vm0, %v440_v32  ;;  %3640 = vmatmul.msk.f32.gmra.mxu0 %vm552_vm0, %v424_v33 }
  0x68   : > { %3672 = vmatmul.msk.f32.gmra.mxu2 %vm552_vm0, %v456_v34 }
  0x6f   : > { %3657 = vmatmul.msk.f32.gmra.mxu1 %vm552_vm0, %v441_v35  ;;  %3641 = vmatmul.msk.f32.gmra.mxu0 %vm552_vm0, %v425_v36  ;;  %v429_v36 = vld [vmem:[%s4260_s18 + $0x68] sm:$0xff] }
  0x70   : > { %3673 = vmatmul.msk.f32.gmra.mxu2 %vm552_vm0, %v457_v37  ;;  %v462_v37 = vld [vmem:[%s4260_s18 + $0x170] sm:$0xff] }
  0x77   : > { %3658 = vmatmul.msk.f32.gmra.mxu1 %vm552_vm0, %v442_v38  ;;  %3642 = vmatmul.msk.f32.gmra.mxu0 %vm552_vm0, %v426_v40  ;;  %v467_v38 = vld [vmem:[%s4260_s18 + $0x198] sm:$0xff] }
  0x78   : > { %3674 = vmatmul.msk.f32.gmra.mxu2 %vm552_vm0, %v458_v39  ;;  %3683 = vmatmul.msk.f32.gmra.mxu3 %vm552_vm0, %v467_v38 }
  0x7f   : > { %3659 = vmatmul.msk.f32.gmra.mxu1 %vm552_vm0, %v443_v42  ;;  %3643 = vmatmul.msk.f32.gmra.mxu0 %vm552_vm0, %v427_v50 }
  0x80   : > { %3675 = vmatmul.msk.f32.gmra.mxu2 %vm552_vm0, %v459_v41 }
  0x87   : > { %3660 = vmatmul.msk.f32.gmra.mxu1 %vm552_vm0, %v444_v51  ;;  %3644 = vmatmul.msk.f32.gmra.mxu0 %vm552_vm0, %v428_v0 }
  0x88   : > { %3676 = vmatmul.msk.f32.gmra.mxu2 %vm552_vm0, %v460_v1 }
  0x8f   : > { %3661 = vmatmul.msk.f32.gmra.mxu1 %vm552_vm0, %v445_v20  ;;  %3645 = vmatmul.msk.f32.gmra.mxu0 %vm552_vm0, %v429_v36  ;;  %v471_v36 = vld [vmem:[%s4260_s18 + $0x1b8] sm:$0xff] }
  0x90   : > { %3677 = vmatmul.msk.f32.gmra.mxu2 %vm552_vm0, %v461_v21 }
  0x98   : > { %3678 = vmatmul.msk.f32.gmra.mxu2 %vm552_vm0, %v462_v37 }
  0xa4   : > { %v762_v44 = vpop.f32.mrf.mxu0  ;;  %v810_v45 = vpop.f32.mrf.mxu1 }
  0xa5   : > { %v763_v47 = vadd.f32 %v4339_v43, %v762_v44  ;;  %v811_v48 = vadd.f32 %v4339_v43, %v810_v45 }
  0xa7   : > { %v954_v52 = vmax.f32 %v763_v47, 0.0  ;;  %v970_v53 = vmax.f32 %v811_v48, 0.0 }
  0xa9   : > { %v1367_v54 = vmul.f32 %v4344_v46, %v970_v53  ;;  %v1038_v55 = vmul.f32 %v4351_v49, %v970_v53  ;;  %v1022_v56 = vmul.f32 %v4351_v49, %v954_v52  ;;  %v1351_v5 = vmul.f32 %v4344_v46, %v954_v52 }
  0xab   : > { %v858_v57 = vpop.f32.mrf.mxu2  ;;  %v906_v58 = vpop.f32.mrf.mxu3  ;;  %v1463_v59 = vsel %vm1086_vm1, %v1367_v54, 0.0  ;;  %v1135_v60 = vsel %vm1086_vm1, %v1038_v55, 0.0  ;;  %v1087_v61 = vsel %vm1086_vm1, %v1022_v56, 0.0  ;;  %v1415_v14 = vsel %vm1086_vm1, %v1351_v5, 0.0  ;;  %v446_v54 = vld [vmem:[%s4260_s18 + $0xf0] sm:$0xff]  ;;  %v468_v55 = vld [vmem:[%s4260_s18 + $0x1a0] sm:$0xff] }
  0xac   : > { %v859_v62 = vadd.f32 %v4339_v43, %v858_v57  ;;  %1464 = vadd.xlane.f32.xlu2 %v1463_v59  ;;  %1136 = vadd.xlane.f32.xlu1 %v1135_v60  ;;  %v765_v63 = vpop.f32.mrf.mxu0  ;;  %v4372_v4 = vadd.f32 %v4339_v43, %v906_v58  ;;  %v813_v11 = vpop.f32.mrf.mxu1 }
  0xad   : > { %1088 = vadd.xlane.f32.xlu0 %v1087_v61  ;;  %v4367_v3 = vadd.f32 %v4339_v43, %v765_v63  ;;  %v814_v18 = vadd.f32 %v4339_v43, %v813_v11  ;;  %3662 = vmatmul.msk.f32.gmra.mxu1 %vm552_vm0, %v446_v54 }
  0xae   : > { %v986_v2 = vmax.f32 %v859_v62, 0.0  ;;  %7358 = vst [vmem:[#allocation8_spill] sm:$0xff] %v4372_v4  ;;  %v7289_v12 = vmax.f32 %v4372_v4, 0.0  ;;  %3684 = vmatmul.msk.f32.gmra.mxu3 %vm552_vm0, %v468_v55 }
  0xaf   : > { %v955_v9 = vmax.f32 %v4367_v3, 0.0  ;;  %v971_v27 = vmax.f32 %v814_v18, 0.0 }
  0xb0   : > { %v1054_v6 = vmul.f32 %v4351_v49, %v986_v2  ;;  %v1383_v7 = vmul.f32 %v4344_v46, %v986_v2  ;;  %v1070_v25 = vmul.f32 %v4351_v49, %v7289_v12 }
  0xb1   : > { %v1023_v24 = vmul.f32 %v4351_v49, %v955_v9  ;;  %v1039_v34 = vmul.f32 %v4351_v49, %v971_v27  ;;  %v1368_v39 = vmul.f32 %v4344_v46, %v971_v27  ;;  %v1352_v56 = vmul.f32 %v4344_v46, %v955_v9 }
  0xb2   : > { %v1183_v8 = vsel %vm1086_vm1, %v1054_v6, 0.0  ;;  %v1511_v10 = vsel %vm1086_vm1, %v1383_v7, 0.0  ;;  %v1231_v31 = vsel %vm1086_vm1, %v1070_v25, 0.0  ;;  %v430_v6 = vld [vmem:[%s4260_s18 + $0x70] sm:$0xff]  ;;  %v469_v7 = vld [vmem:[%s4260_s18 + $0x1a8] sm:$0xff] }
  0xb3   : > { %v909_v13 = vpop.f32.mrf.mxu3  ;;  %v861_v15 = vpop.f32.mrf.mxu2  ;;  %v1090_v30 = vsel %vm1086_vm1, %v1023_v24, 0.0  ;;  %v1138_v45 = vsel %vm1086_vm1, %v1039_v34, 0.0  ;;  %v1466_v48 = vsel %vm1086_vm1, %v1368_v39, 0.0  ;;  %v1418_v63 = vsel %vm1086_vm1, %v1352_v56, 0.0  ;;  %3646 = vmatmul.msk.f32.gmra.mxu0 %vm552_vm0, %v430_v6  ;;  %v470_v24 = vld [vmem:[%s4260_s18 + $0x1b0] sm:$0xff] }
  0xb4   : > { %v4383_v16 = vadd.f32 %v4339_v43, %v909_v13  ;;  %1184 = vadd.xlane.f32.xlu2 %v1183_v8  ;;  %1416 = vadd.xlane.f32.xlu1 %v1415_v14  ;;  %v768_v17 = vpop.f32.mrf.mxu0  ;;  %v816_v40 = vpop.f32.mrf.mxu1  ;;  %v4422_v41 = vadd.f32 %v4339_v43, %v861_v15 }
  0xb5   : > { %1512 = vadd.xlane.f32.xlu0 %v1511_v10  ;;  %v4387_v19 = vadd.f32 %v4339_v43, %v768_v17  ;;  %v817_v52 = vadd.f32 %v4339_v43, %v816_v40 }
  0xb6   : > { %7359 = vst [vmem:[#allocation9_spill] sm:$0xff] %v4383_v16  ;;  %v7290_v23 = vmax.f32 %v4383_v16, 0.0  ;;  %v987_v50 = vmax.f32 %v4422_v41, 0.0  ;;  %3685 = vmatmul.msk.f32.gmra.mxu3 %vm552_vm0, %v469_v7 }
  0xb7   : > { %v956_v28 = vmax.f32 %v4387_v19, 0.0  ;;  %v972_v60 = vmax.f32 %v817_v52, 0.0 }
  0xb8   : > { %v1071_v26 = vmul.f32 %v4351_v49, %v7290_v23  ;;  %v1055_v57 = vmul.f32 %v4351_v49, %v987_v50 }
  0xb9   : > { %v1024_v35 = vmul.f32 %v4351_v49, %v956_v28  ;;  %v1369_v3 = vmul.f32 %v4344_v46, %v972_v60  ;;  %v1040_v8 = vmul.f32 %v4351_v49, %v972_v60 }
  0xba   : > { %v1234_v29 = vsel %vm1086_vm1, %v1071_v26, 0.0  ;;  %v1186_v0 = vsel %vm1086_vm1, %v1055_v57, 0.0  ;;  %v1353_v26 = vmul.f32 %v4344_v46, %v956_v28 }
  0xbb   : > { %v864_v32 = vpop.f32.mrf.mxu2  ;;  %v1093_v47 = vsel %vm1086_vm1, %v1024_v35, 0.0  ;;  %v1469_v13 = vsel %vm1086_vm1, %v1369_v3, 0.0  ;;  %v1141_v15 = vsel %vm1086_vm1, %v1040_v8, 0.0  ;;  %3647 = vmatmul.msk.f32.gmra.mxu0 %vm552_vm0, %v431_v22  ;;  %v473_v3 = vld [vmem:[%s4260_s18 + $0x1c8] sm:$0xff] }
  0xbc   : > { %1232 = vadd.xlane.f32.xlu2 %v1231_v31  ;;  %1235 = vadd.xlane.f32.xlu1 %v1234_v29  ;;  %v4408_v33 = vadd.f32 %v4339_v43, %v864_v32  ;;  %v771_v42 = vpop.f32.mrf.mxu0  ;;  %v819_v58 = vpop.f32.mrf.mxu1  ;;  %v1421_v34 = vsel %vm1086_vm1, %v1353_v26, 0.0 }
  0xbd   : > { %1091 = vadd.xlane.f32.xlu0 %v1090_v30  ;;  %v772_v51 = vadd.f32 %v4339_v43, %v771_v42  ;;  %v820_v2 = vadd.f32 %v4339_v43, %v819_v58 }
  0xbe   : > { %v988_v44 = vmax.f32 %v4408_v33, 0.0  ;;  %3686 = vmatmul.msk.f32.gmra.mxu3 %vm552_vm0, %v470_v24 }
  0xbf   : > { %v957_v59 = vmax.f32 %v772_v51, 0.0  ;;  %v973_v11 = vmax.f32 %v820_v2, 0.0  ;;  %v447_v2 = vld [vmem:[%s4260_s18 + $0xf8] sm:$0xff] }
  0xc0   : > { %v1056_v53 = vmul.f32 %v4351_v49, %v988_v44  ;;  %3663 = vmatmul.msk.f32.gmra.mxu1 %vm552_vm0, %v447_v2 }
  0xc1   : > { %v1025_v5 = vmul.f32 %v4351_v49, %v957_v59  ;;  %v1041_v21 = vmul.f32 %v4351_v49, %v973_v11  ;;  %v1354_v28 = vmul.f32 %v4344_v46, %v957_v59 }
  0xc2   : > { %v1189_v61 = vsel %vm1086_vm1, %v1056_v53, 0.0  ;;  %v1370_v53 = vmul.f32 %v4344_v46, %v973_v11 }
  0xc3   : > { %v867_v9 = vpop.f32.mrf.mxu2  ;;  %v1096_v14 = vsel %vm1086_vm1, %v1025_v5, 0.0  ;;  %v1144_v31 = vsel %vm1086_vm1, %v1041_v21, 0.0  ;;  %v1424_v42 = vsel %vm1086_vm1, %v1354_v28, 0.0 }
  0xc4   : > { %1139 = vadd.xlane.f32.xlu2 %v1138_v45  ;;  %1094 = vadd.xlane.f32.xlu1 %v1093_v47  ;;  %v774_v62 = vpop.f32.mrf.mxu0  ;;  %v822_v17 = vpop.f32.mrf.mxu1  ;;  %v4463_v25 = vadd.f32 %v4339_v43, %v867_v9  ;;  %v472_v47 = vld [vmem:[%s4260_s18 + $0x1c0] sm:$0xff] }
  0xc5   : > { %1467 = vadd.xlane.f32.xlu0 %v1466_v48  ;;  %v775_v1 = vadd.f32 %v4339_v43, %v774_v62  ;;  %v823_v18 = vadd.f32 %v4339_v43, %v822_v17 }
  0xc6   : > { %v989_v32 = vmax.f32 %v4463_v25, 0.0  ;;  %3687 = vmatmul.msk.f32.gmra.mxu3 %vm552_vm0, %v471_v36  ;;  %v478_v25 = vld [vmem:[%s4260_s18 + $0x1f0] sm:$0xff] }
  0xc7   : > { %v958_v10 = vmax.f32 %v775_v1, 0.0  ;;  %v974_v29 = vmax.f32 %v823_v18, 0.0 }
  0xc8   : > { %v1057_v19 = vmul.f32 %v4351_v49, %v989_v32 }
  0xc9   : > { %v1026_v20 = vmul.f32 %v4351_v49, %v958_v10  ;;  %v1042_v35 = vmul.f32 %v4351_v49, %v974_v29  ;;  %v1355_v52 = vmul.f32 %v4344_v46, %v958_v10  ;;  %v1371_v54 = vmul.f32 %v4344_v46, %v974_v29 }
  0xca   : > { %v1192_v39 = vsel %vm1086_vm1, %v1057_v19, 0.0 }
  0xcb   : > { %v870_v27 = vpop.f32.mrf.mxu2  ;;  %v1099_v30 = vsel %vm1086_vm1, %v1026_v20, 0.0  ;;  %v1147_v38 = vsel %vm1086_vm1, %v1042_v35, 0.0  ;;  %v1427_v60 = vsel %vm1086_vm1, %v1355_v52, 0.0  ;;  %v1475_v62 = vsel %vm1086_vm1, %v1371_v54, 0.0  ;;  %v474_v20 = vld [vmem:[%s4260_s18 + $0x1d0] sm:$0xff] }
  0xcc   : > { %1419 = vadd.xlane.f32.xlu2 %v1418_v63  ;;  %1190 = vadd.xlane.f32.xlu1 %v1189_v61  ;;  %v825_v37 = vpop.f32.mrf.mxu1  ;;  %v4490_v51 = vadd.f32 %v4339_v43, %v870_v27  ;;  %v777_v55 = vpop.f32.mrf.mxu0  ;;  %v1472_v61 = vsel %vm1086_vm1, %v1370_v53, 0.0 }
  0xcd   : > { %1187 = vadd.xlane.f32.xlu0 %v1186_v0  ;;  %v826_v48 = vadd.f32 %v4339_v43, %v825_v37  ;;  %v778_v63 = vadd.f32 %v4339_v43, %v777_v55 }
  0xce   : > { %3688 = vmatmul.msk.f32.gmra.mxu3 %vm552_vm0, %v472_v47  ;;  %v990_v59 = vmax.f32 %v4490_v51, 0.0 }
  0xcf   : > { %v975_v57 = vmax.f32 %v826_v48, 0.0  ;;  %v959_v7 = vmax.f32 %v778_v63, 0.0 }
  0xd0   : > { %v1058_v6 = vmul.f32 %v4351_v49, %v990_v59 }
  0xd1   : > { %v1043_v5 = vmul.f32 %v4351_v49, %v975_v57  ;;  %v1356_v21 = vmul.f32 %v4344_v46, %v959_v7  ;;  %v1372_v36 = vmul.f32 %v4344_v46, %v975_v57 }
  0xd3   : > { %v873_v40 = vpop.f32.mrf.mxu2  ;;  %v1150_v10 = vsel %vm1086_vm1, %v1043_v5, 0.0  ;;  %v1430_v27 = vsel %vm1086_vm1, %v1356_v21, 0.0  ;;  %v1478_v47 = vsel %vm1086_vm1, %v1372_v36, 0.0 }
  0xd4   : > { %1470 = vadd.xlane.f32.xlu2 %v1469_v13  ;;  %1097 = vadd.xlane.f32.xlu1 %v1096_v14  ;;  %v4485_v45 = vadd.f32 %v4339_v43, %v873_v40  ;;  %v828_v58 = vpop.f32.mrf.mxu1  ;;  %v780_v11 = vpop.f32.mrf.mxu0  ;;  %v1195_v13 = vsel %vm1086_vm1, %v1058_v6, 0.0 }
  0xd5   : > { %1142 = vadd.xlane.f32.xlu0 %v1141_v15  ;;  %v829_v0 = vadd.f32 %v4339_v43, %v828_v58  ;;  %v781_v14 = vadd.f32 %v4339_v43, %v780_v11  ;;  %v1027_v15 = vmul.f32 %v4351_v49, %v959_v7 }
  0xd6   : > { %v991_v56 = vmax.f32 %v4485_v45, 0.0  ;;  %3689 = vmatmul.msk.f32.gmra.mxu3 %vm552_vm0, %v473_v3 }
  0xd7   : > { %v976_v8 = vmax.f32 %v829_v0, 0.0  ;;  %v960_v22 = vmax.f32 %v781_v14, 0.0  ;;  %v1102_v24 = vsel %vm1086_vm1, %v1027_v15, 0.0  ;;  %v463_v0 = vld [vmem:[%s4260_s18 + $0x178] sm:$0xff] }
  0xd8   : > { %v1059_v1 = vmul.f32 %v4351_v49, %v991_v56  ;;  %3679 = vmatmul.msk.f32.gmra.mxu2 %vm552_vm0, %v463_v0 }
  0xd9   : > { %v1044_v17 = vmul.f32 %v4351_v49, %v976_v8  ;;  %v1028_v35 = vmul.f32 %v4351_v49, %v960_v22  ;;  %v1373_v55 = vmul.f32 %v4344_v46, %v976_v8 }
  0xda   : > { %v1198_v9 = vsel %vm1086_vm1, %v1059_v1, 0.0  ;;  %v476_v1 = vld [vmem:[%s4260_s18 + $0x1e0] sm:$0xff] }
  0xdb   : > { %v876_v18 = vpop.f32.mrf.mxu2  ;;  %v1153_v26 = vsel %vm1086_vm1, %v1044_v17, 0.0  ;;  %v1105_v40 = vsel %vm1086_vm1, %v1028_v35, 0.0  ;;  %v1481_v63 = vsel %vm1086_vm1, %v1373_v55, 0.0 }
  0xdc   : > { %1100 = vadd.xlane.f32.xlu2 %v1099_v30  ;;  %1145 = vadd.xlane.f32.xlu1 %v1144_v31  ;;  %v831_v29 = vpop.f32.mrf.mxu1  ;;  %v1357_v31 = vmul.f32 %v4344_v46, %v960_v22 }
  0xdd   : > { %1422 = vadd.xlane.f32.xlu0 %v1421_v34  ;;  %v832_v30 = vadd.f32 %v4339_v43, %v831_v29  ;;  %v4529_v34 = vadd.f32 %v4339_v43, %v876_v18 }
  0xde   : > { %3690 = vmatmul.msk.f32.gmra.mxu3 %vm552_vm0, %v474_v20  ;;  %v1433_v37 = vsel %vm1086_vm1, %v1357_v31, 0.0 }
  0xdf   : > { %v977_v28 = vmax.f32 %v832_v30, 0.0 }
  0xe1   : > { %v1045_v53 = vmul.f32 %v4351_v49, %v977_v28 }
  0xe3   : > { %v879_v19 = vpop.f32.mrf.mxu2  ;;  %v1156_v58 = vsel %vm1086_vm1, %v1045_v53, 0.0  ;;  %v4599_v53 = vld [vmem:[#allocation4] ss:$0 sm:$0xff] }
  0xe4   : > { %1148 = vadd.xlane.f32.xlu2 %v1147_v38  ;;  %1425 = vadd.xlane.f32.xlu1 %v1424_v42  ;;  %v475_v38 = vld [vmem:[%s4260_s18 + $0x1d8] sm:$0xff]  ;;  %v783_v42 = vpop.f32.mrf.mxu0  ;;  %v834_v48 = vpop.f32.mrf.mxu1  ;;  %v4559_v8 = vadd.f32 %v4339_v43, %v879_v19  ;;  %v1385_v19 = vmul.f32 %v4344_v46, %v988_v44 }
  0xe5   : > { %1193 = vadd.xlane.f32.xlu0 %v1192_v39  ;;  %v7296_v39 = vmax.f32 %v4529_v34, 0.0  ;;  %v784_v52 = vadd.f32 %v4339_v43, %v783_v42  ;;  %v835_v6 = vadd.f32 %v4339_v43, %v834_v48 }
  0xe6   : > { %3691 = vmatmul.msk.f32.gmra.mxu3 %vm552_vm0, %v475_v38  ;;  %v7295_v18 = vmax.f32 %v4559_v8, 0.0  ;;  %v7288_v38 = vlaneseq  ;;  %v4604_v55 = vsel %vm1086_vm1, %v1385_v19, 0.0  ;;  %v496_v19 = vld [vmem:[%s4641_s7 + $0x80] sm:$0xff] }
  0xe7   : > { %v1060_v54 = vmul.f32 %v4351_v49, %v7296_v39  ;;  %v961_v57 = vmax.f32 %v784_v52, 0.0  ;;  %v978_v15 = vmax.f32 %v835_v6, 0.0 }
  0xe8   : > { %v1061_v31 = vmul.f32 %v4351_v49, %v7295_v18  ;;  %v481_v18 = vld [vmem:[%s4641_s7 + $0x8] sm:$0xff] }
  0xe9   : > { %v1358_v3 = vmul.f32 %v4344_v46, %v961_v57  ;;  %v1029_v5 = vmul.f32 %v4351_v49, %v961_v57  ;;  %v1046_v29 = vmul.f32 %v4351_v49, %v978_v15  ;;  %v1375_v42 = vmul.f32 %v4344_v46, %v978_v15 }
  0xea   : > { %v1204_v41 = vsel %vm1086_vm1, %v1061_v31, 0.0 }
  0xeb   : > { %v1436_v11 = vsel %vm1086_vm1, %v1358_v3, 0.0  ;;  %v1159_v48 = vsel %vm1086_vm1, %v1046_v29, 0.0  ;;  %v4619_v3 = vstv %s3696_s27  ;;  %s371_s27 = sand.u32 1, %s4113_s10  }
  0xec   : > { %1428 = vadd.xlane.f32.xlu2 %v1427_v60  ;;  %1473 = vadd.xlane.f32.xlu1 %v1472_v61  ;;  %v882_v60 = vpop.f32.mrf.mxu2  ;;  %v1201_v61 = vsel %vm1086_vm1, %v1060_v54, 0.0  ;;  %v837_v7 = vpop.f32.mrf.mxu1  ;;  %v4601_v54 = vld [vmem:[#allocation3] ss:$0 sm:$0xff]  ;;  %s3625_s29 = sshll.u32 %s371_s27, 3 }
  0xed   : > { %1476 = vadd.xlane.f32.xlu0 %v1475_v62  ;;  %v786_v62 = vpop.f32.mrf.mxu0  ;;  %v4551_v2 = vadd.f32 %v4339_v43, %v882_v60  ;;  %v838_v17 = vadd.f32 %v4339_v43, %v837_v7  ;;  %v4611_v60 = vshrl.u32 %v7288_v38, 7 }
  0xee   : > { %3692 = vmatmul.msk.f32.gmra.mxu3 %vm552_vm0, %v476_v1  ;;  %v787_v14 = vadd.f32 %v4339_v43, %v786_v62  ;;  %v4615_v62 = vsel %vm1086_vm1, %v1375_v42, 0.0 }
  0xf4   : > { %1196 = vadd.xlane.f32.xlu2 %v1195_v13  ;;  %1199 = vadd.xlane.f32.xlu1 %v1198_v9  ;;  %v7294_v9 = vmax.f32 %v4551_v2, 0.0  ;;  %v1108_v13 = vsel %vm1086_vm1, %v1029_v5, 0.0  ;;  %v885_v20 = vpop.f32.mrf.mxu2  ;;  %v840_v30 = vpop.f32.mrf.mxu1 }
  0xf5   : > { %1151 = vadd.xlane.f32.xlu0 %v1150_v10  ;;  %v1374_v10 = vmul.f32 %v4344_v46, %v977_v28  ;;  %v1384_v28 = vmul.f32 %v4344_v46, %v987_v50  ;;  %v4594_v44 = vadd.f32 %v4339_v43, %v885_v20 }
  0xf6   : > { %v1062_v22 = vmul.f32 %v4351_v49, %v7294_v9 }
  0xf7   : > { %v1484_v21 = vsel %vm1086_vm1, %v1374_v10, 0.0  ;;  %v4607_v57 = vsel %vm1086_vm1, %v1384_v28, 0.0  ;;  %v7293_v5 = vmax.f32 %v4594_v44, 0.0 }
  0xf8   : > { %v1207_v36 = vsel %vm1086_vm1, %v1062_v22, 0.0  ;;  %v1388_v22 = vmul.f32 %v4344_v46, %v991_v56 }
  0xf9   : > { %v1063_v31 = vmul.f32 %v4351_v49, %v7293_v5 }
  0xfc   : > { %1103 = vadd.xlane.f32.xlu2 %v1102_v24  ;;  %1154 = vadd.xlane.f32.xlu1 %v1153_v26  ;;  %v789_v24 = vpop.f32.mrf.mxu0  ;;  %v962_v26 = vmax.f32 %v787_v14, 0.0 }
  0xfd   : > { %1431 = vadd.xlane.f32.xlu0 %v1430_v27  ;;  %v979_v27 = vmax.f32 %v838_v17, 0.0  ;;  %v790_v35 = vadd.f32 %v4339_v43, %v789_v24  ;;  %v1386_v24 = vmul.f32 %v4344_v46, %v989_v32  ;;  %v1387_v32 = vmul.f32 %v4344_v46, %v990_v59 }
  0xfe   : > { %v1359_v33 = vmul.f32 %v4344_v46, %v962_v26 }
  0xff   : > { %v1047_v52 = vmul.f32 %v4351_v49, %v979_v27  ;;  %v963_v50 = vmax.f32 %v790_v35, 0.0  ;;  %v1376_v15 = vmul.f32 %v4344_v46, %v979_v27 }
 0x100   : > { %v1439_v1 = vsel %vm1086_vm1, %v1359_v33, 0.0 }
 0x101   : > { %v1162_v0 = vsel %vm1086_vm1, %v1047_v52, 0.0  ;;  %v1031_v14 = vmul.f32 %v4351_v49, %v963_v50  ;;  %v4673_v42 = vsel %vm1086_vm1, %v1376_v15, 0.0 }
 0x104   : > { %1479 = vadd.xlane.f32.xlu2 %v1478_v47  ;;  %1434 = vadd.xlane.f32.xlu1 %v1433_v37  ;;  %v1030_v37 = vmul.f32 %v4351_v49, %v962_v26  ;;  %v477_v47 = vld [vmem:[%s4260_s18 + $0x1e8] sm:$0xff]  ;;  %v792_v6 = vpop.f32.mrf.mxu0 }
 0x105   : > { %1106 = vadd.xlane.f32.xlu0 %v1105_v40  ;;  %v4586_v40 = vadd.f32 %v4339_v43, %v840_v30  ;;  %3693 = vmatmul.msk.f32.gmra.mxu3 %vm552_vm0, %v477_v47  ;;  %v793_v27 = vadd.f32 %v4339_v43, %v792_v6  ;;  %v4658_v30 = vadd.s32 %v4619_v3, %v4611_v60  ;;  %v4676_v47 = vsel %vm1086_vm1, %v1388_v22, 0.0 }
 0x107   : > { %v964_v33 = vmax.f32 %v793_v27, 0.0  ;;  %vm1807_vm2 = vcmp.lt.s32.totalorder %v4658_v30, 200  ;;  %v1695_v27 = vadd.s32 136, %v4611_v60 }
 0x10c   : > { %1157 = vadd.xlane.f32.xlu2 %v1156_v58  ;;  %1482 = vadd.xlane.f32.xlu1 %v1481_v63  ;;  %v1111_v58 = vsel %vm1086_vm1, %v1030_v37, 0.0  ;;  %v888_v63 = vpop.f32.mrf.mxu2  ;;  %v480_v37 = vld [vmem:[%s4641_s7] sm:$0xff]  ;;  %v795_v38 = vpop.f32.mrf.mxu0 }
 0x10d   : > { %1202 = vadd.xlane.f32.xlu0 %v1201_v61  ;;  %v980_v61 = vmax.f32 %v4586_v40, 0.0  ;;  %3694 = vmatmul.msk.f32.gmra.mxu3 %vm552_vm0, %v478_v25  ;;  %v4689_v6 = vadd.f32 %v4339_v43, %v888_v63  ;;  %v1361_v25 = vmul.f32 %v4344_v46, %v964_v33 }
 0x10f   : > { %v1048_v45 = vmul.f32 %v4351_v49, %v980_v61  ;;  %v4731_v40 = vsel %vm1086_vm1, %v1361_v25, 0.0 }
 0x114   : > { %1437 = vadd.xlane.f32.xlu2 %v1436_v11  ;;  %1109 = vadd.xlane.f32.xlu1 %v1108_v13  ;;  %v1710_v11 = vadd.s32 256, %v4611_v60  ;;  %v1360_v13 = vmul.f32 %v4344_v46, %v963_v50  ;;  %v4685_v50 = vsel %vm1086_vm1, %v1387_v32, 0.0  ;;  %v479_v32 = vld [vmem:[%s4260_s18 + $0x1f8] sm:$0xff] }
 0x115   : > { %1485 = vadd.xlane.f32.xlu0 %v1484_v21  ;;  %3695 = vmatmul.msk.f32.gmra.mxu3 %vm552_vm0, %v479_v32 }
 0x116   : > { %v4666_v51 = vadd.s32 %v4619_v3, %v1710_v11  ;;  %v1442_v59 = vsel %vm1086_vm1, %v1360_v13, 0.0  ;;  %v891_v11 = vpop.f32.mrf.mxu2 }
 0x118   : > { %vm1839_vm3 = vcmp.lt.s32.totalorder %v4666_v51, 200  ;;  %v513_v51 = vld [vmem:[%s4641_s7 + $0x108] sm:$0xff] }
 0x11c   : > { %1205 = vadd.xlane.f32.xlu2 %v1204_v41  ;;  %1208 = vadd.xlane.f32.xlu1 %v1207_v36  ;;  %v1114_v36 = vsel %vm1086_vm1, %v1031_v14, 0.0  ;;  %v4682_v41 = vsel %vm1086_vm1, %v1048_v45, 0.0  ;;  %v4704_v45 = vadd.f32 %v4339_v43, %v891_v11  ;;  %v1377_v11 = vmul.f32 %v4344_v46, %v980_v61 }
 0x11d   : > { %1160 = vadd.xlane.f32.xlu0 %v1159_v48  ;;  %v4679_v48 = vsel %vm1086_vm1, %v1386_v24, 0.0 }
 0x11e   : > { %7361 = vst [vmem:[#allocation10_spill] sm:$0xff] %v4704_v45 }
 0x11f   : > { %v1465_v7 = vpop.xlane.xlu2 %1464  ;;  %v1137_v10 = vpop.xlane.xlu1 %1136 }
 0x120   : > { %v1627_v17 = vadd.f32 %v4599_v53, %v1465_v7  ;;  %v4628_v20 = vadd.f32 %v4601_v54, %v1137_v10  ;;  %v1089_v21 = vpop.xlane.xlu0 %1088  ;;  %v4692_v7 = vsel %vm1086_vm1, %v1063_v31, 0.0  ;;  %v843_v10 = vpop.f32.mrf.mxu1 }
 0x121   : > { %v4644_v26 = vadd.f32 %v4601_v54, %v1089_v21 }
 0x122   : > { %v2079_v56 = vand.u32 2147483647, %v4628_v20  ;;  %v2975_v29 = vsub.f32 %v4628_v20, %v1627_v17 }
 0x123   : > { %v2063_v35 = vand.u32 2147483647, %v4644_v26  ;;  %v1871_v13 = vmax.f32 %v4644_v26, 0.0  ;;  %v1935_v14 = vmul.f32 %v4644_v26, %v480_v37 }
 0x124   : > { %v2143_v28 = vsub.f32 0.0, %v2079_v56  ;;  %1112 = vadd.xlane.f32.xlu2 %v1111_v58  ;;  %1163 = vadd.xlane.f32.xlu1 %v1162_v0  ;;  %v1887_v58 = vmax.f32 %v4628_v20, 0.0  ;;  %v512_v56 = vld [vmem:[%s4641_s7 + $0x100] sm:$0xff] }
 0x125   : > { %v2127_v52 = vsub.f32 0.0, %v2063_v35  ;;  %1440 = vadd.xlane.f32.xlu0 %v1439_v1  ;;  %v1951_v1 = vmul.f32 %v4628_v20, %v496_v19  ;;  %v4711_v19 = vadd.f32 %v4339_v43, %v843_v10 }
 0x126   : > { %v2223_v0 = vmul.f32 1.442695, %v2143_v28  ;;  %v1032_v28 = vmul.f32 %v4351_v49, %v964_v33  ;;  %v4727_v33 = vadd.s32 %v4619_v3, %v1695_v27 }
 0x127   : > { %v2191_v15 = vmul.f32 1.442695, %v2127_v52  ;;  %v1185_v17 = vpop.xlane.xlu2 %1184  ;;  %v1417_v21 = vpop.xlane.xlu1 %1416  ;;  %v4715_v37 = vsub.f32 %v1887_v58, %v1951_v1  ;;  %v7291_v1 = vmax.f32 %v4704_v45, 0.0 }
 0x128   : > { %3780 = vpow2.f32 %v2223_v0  ;;  %v1315_v63 = vadd.f32 %v4601_v54, %v1185_v17  ;;  %v1611_v22 = vadd.f32 %v4599_v53, %v1417_v21  ;;  %v1513_v24 = vpop.xlane.xlu0 %1512  ;;  %v7292_v0 = vmax.f32 %v4689_v6, 0.0 }
 0x129   : > { %3782 = vpow2.f32 %v2191_v15  ;;  %v1643_v20 = vadd.f32 %v4599_v53, %v1513_v24  ;;  %v4721_v15 = vmul.f32 %v2975_v29, %v2975_v29  ;;  %v4723_v17 = vsub.f32 %v1871_v13, %v1935_v14 }
 0x12a   : > { %v2095_v31 = vand.u32 2147483647, %v1315_v63  ;;  %v2959_v35 = vsub.f32 %v4644_v26, %v1611_v22  ;;  %v1903_v58 = vmax.f32 %v1315_v63, 0.0  ;;  %v1967_v10 = vmul.f32 %v1315_v63, %v512_v56 }
 0x12b   : > { %v2991_v52 = vsub.f32 %v1315_v63, %v1643_v20  ;;  %7362 = vst [vmem:[#allocation11_spill] sm:$0xff] %v4721_v15  ;;  %v7297_v13 = vmax.f32 %v4711_v19, 0.0  ;;  %v4735_v14 = vsel %vm1086_vm1, %v1032_v28, 0.0  ;;  %v1064_v63 = vmul.f32 %v4351_v49, %v7292_v0 }
 0x12c   : > { %v2159_v26 = vsub.f32 0.0, %v2095_v31  ;;  %1488 = vadd.xlane.f32.xlu2 %v4615_v62  ;;  %1443 = vadd.xlane.f32.xlu1 %v1442_v59  ;;  %v3023_v29 = vmul.f32 %v2959_v35, %v2959_v35  ;;  %v4741_v56 = vsub.f32 %v1903_v58, %v1967_v10  ;;  %v4744_v31 = vsel %vm1086_vm1, %v1377_v11, 0.0 }
 0x12d   : > { %1115 = vadd.xlane.f32.xlu0 %v1114_v36  ;;  %v1679_v36 = vadd.s32 8, %v4611_v60  ;;  %v3055_v25 = vmul.f32 %v2991_v52, %v2991_v52  ;;  %v1065_v35 = vmul.f32 %v4351_v49, %v7291_v1  ;;  %v846_v52 = vpop.f32.mrf.mxu1  ;;  %v4760_v10 = vmul.f32 %v4351_v49, %v7297_v13  ;;  %v528_v49 = vld [vmem:[%s4641_s7 + $0x180] sm:$0xff] }
 0x12e   : > { %v3781_v46 = vpop.eup %3780  ;;  %v2255_v61 = vmul.f32 1.442695, %v2159_v26  ;;  %vm1824_vm9 = vcmp.lt.s32.totalorder %v4727_v33, 200 }
 0x12f   : > { %v3783_v62 = vpop.eup %3782  ;;  %v2463_v59 = vadd.f32 1.0, %v3781_v46  ;;  %v2466_v21 = vmul.f32 -0.5, %v3781_v46  ;;  %v1233_v22 = vpop.xlane.xlu2 %1232  ;;  %v2469_v28 = vand.u32 2147483647, %v3781_v46 }
 0x130   : > { %v1236_v24 = vpop.xlane.xlu1 %1235  ;;  %3784 = vpow2.f32 %v2255_v61  ;;  %v2319_v27 = vadd.f32 1.0, %v3783_v62  ;;  %v2322_v20 = vmul.f32 -0.5, %v3783_v62  ;;  %v1092_v32 = vpop.xlane.xlu0 %1091  ;;  %v2325_v26 = vand.u32 2147483647, %v3783_v62 }
 0x131   : > { %3786 = vlog2.f32 %v2463_v59  ;;  %v3295_v61 = vsel %vm1807_vm2, %v3023_v29, 0.0  ;;  %v2467_v12 = vadd.f32 1.0, %v2466_v21  ;;  %v4752_v58 = vadd.f32 %v4601_v54, %v1233_v22 }
 0x132   : > { %3788 = vlog2.f32 %v2319_v27  ;;  %v4755_v11 = vadd.f32 %v4601_v54, %v1236_v24  ;;  %v2323_v59 = vadd.f32 1.0, %v2322_v20  ;;  %v3327_v27 = vsel %vm1839_vm3, %v3055_v25, 0.0 }
 0x133   : > { %7363 = vst [vmem:[#allocation12_spill] sm:$0xff] %v4752_v58  ;;  %v4767_v29 = vadd.s32 %v4619_v3, %v1679_v36  ;;  %v4770_v21 = vsel %vm1086_vm1, %v1064_v63, 0.0  ;;  %v4773_v22 = vsel %vm3153_vm4, %v3295_v61, 0.0  ;;  %v4778_v24 = vadd.f32 %v4339_v43, %v795_v38 }
 0x134   : > { %7364 = vst [vmem:[#allocation13_spill] sm:$0xff] %v4755_v11  ;;  %1166 = vadd.xlane.f32.xlu2 %v4682_v41  ;;  %1491 = vadd.xlane.f32.xlu1 %v4673_v42  ;;  %v4781_v41 = vadd.f32 %v4339_v43, %v846_v52  ;;  %v4784_v42 = vsel %vm1086_vm1, %v1065_v35, 0.0  ;;  %vm4786_vm5 = vcmp.lt.f32.partialorder %v2469_v28, 0.0004427343  ;;  %vm4790_vm6 = vcmp.lt.f32.partialorder %v2325_v26, 0.0004427343 }
 0x135   : > { %1211 = vadd.xlane.f32.xlu0 %v4692_v7  ;;  %v2111_v7 = vand.u32 2147483647, %v4752_v58  ;;  %v4796_v38 = vadd.f32 %v4601_v54, %v1092_v32  ;;  %v4798_v25 = vmul.f32 %v3781_v46, %v2467_v12  ;;  %v4801_v61 = vsel %vm3153_vm4, %v3327_v27, 0.0  ;;  %v529_v28 = vld [vmem:[%s4641_s7 + $0x188] sm:$0xff] }
 0x136   : > { %v3785_v36 = vpop.eup %3784  ;;  %7369 = vst [vmem:[#allocation14_spill] sm:$0xff] %v4801_v61  ;;  %v2112_v52 = vand.u32 2147483647, %v4755_v11  ;;  %v2324_v0 = vmul.f32 %v3783_v62, %v2323_v59  ;;  %v1919_v9 = vmax.f32 %v4752_v58, 0.0  ;;  %v1983_v32 = vmul.f32 %v4752_v58, %v528_v49 }
 0x137   : > { %v3787_v43 = vpop.eup %3786  ;;  %v2607_v35 = vadd.f32 1.0, %v3785_v36  ;;  %v1140_v26 = vpop.xlane.xlu2 %1139  ;;  %v2610_v5 = vmul.f32 -0.5, %v3785_v36  ;;  %v1920_v46 = vmax.f32 %v4755_v11, 0.0  ;;  %v965_v27 = vmax.f32 %v4778_v24, 0.0 }
 0x138   : > { %v1095_v23 = vpop.xlane.xlu1 %1094  ;;  %v3789_v1 = vpop.eup %3788  ;;  %v2613_v13 = vand.u32 2147483647, %v3785_v36  ;;  %v2175_v61 = vsub.f32 0.0, %v2111_v7  ;;  %v1984_v15 = vmul.f32 %v4755_v11, %v529_v28  ;;  %v1872_v4 = vmax.f32 %v4796_v38, 0.0 }
 0x139   : > { %v1468_v39 = vpop.xlane.xlu0 %1467  ;;  %v2321_v12 = vmul.f32 0.6931472, %v3789_v1  ;;  %3790 = vlog2.f32 %v2607_v35  ;;  %v2465_v62 = vmul.f32 0.6931472, %v3787_v43  ;;  %v2176_v59 = vsub.f32 0.0, %v2112_v52 }
 0x13a   : > { %v1936_v16 = vmul.f32 %v4796_v38, %v481_v18  ;;  %v2064_v49 = vand.u32 2147483647, %v4796_v38  ;;  %v2611_v58 = vadd.f32 1.0, %v2610_v5  ;;  %v4814_v45 = vsub.f32 %v1919_v9, %v1983_v32  ;;  %v497_v32 = vld [vmem:[%s4641_s7 + $0x88] sm:$0xff] }
 0x13b   : > { %v1300_v1 = vadd.f32 %v4601_v54, %v1140_v26  ;;  %vm1808_vm7 = vcmp.lt.s32.totalorder %v4767_v29, 200  ;;  %v7302_v7 = vmax.f32 %v4781_v41, 0.0  ;;  %v2327_v43 = vsel %vm4790_vm6, %v2324_v0, %v2321_v12  ;;  %v4974_v29 = vld [vmem:[%s7282_s3] ss:$0 sm:$0xff] }
 0x13c   : > { %7370 = vst [vmem:[#allocation15_spill] sm:$0xff] %v4814_v45  ;;  %1446 = vadd.xlane.f32.xlu2 %v4731_v40  ;;  %1118 = vadd.xlane.f32.xlu1 %v4735_v14  ;;  %v2128_v35 = vsub.f32 0.0, %v2064_v49  ;;  %v4824_v18 = vadd.f32 %v4601_v54, %v1095_v23  ;;  %v1628_v9 = vadd.f32 %v4599_v53, %v1468_v39  ;;  %vm4828_vm8 = vcmp.lt.f32.partialorder %v2613_v13, 0.0004427343  ;;  %v482_v49 = vld [vmem:[%s4641_s7 + $0x10] sm:$0xff] }
 0x13d   : > { %1494 = vadd.xlane.f32.xlu0 %v4744_v31  ;;  %v2287_v40 = vmul.f32 1.442695, %v2175_v61  ;;  %v4832_v14 = vsub.f32 %v1920_v46, %v1984_v15  ;;  %v2080_v28 = vand.u32 2147483647, %v1300_v1  ;;  %v2471_v23 = vsel %vm4786_vm5, %v4798_v25, %v2465_v62 }
 0x13e   : > { %v2289_v0 = vmul.f32 1.442695, %v2176_v59  ;;  %v4837_v52 = vsub.f32 %v1872_v4, %v1936_v16  ;;  %v2193_v39 = vmul.f32 1.442695, %v2128_v35  ;;  %v2895_v26 = vadd.f32 %v2327_v43, %v4723_v17 }
 0x13f   : > { %7373 = vst [vmem:[#allocation16_spill] sm:$0xff] %v4832_v14  ;;  %v3791_v20 = vpop.eup %3790  ;;  %v1420_v13 = vpop.xlane.xlu2 %1419  ;;  %v2612_v15 = vmul.f32 %v3785_v36, %v2611_v58  ;;  %v2144_v12 = vsub.f32 0.0, %v2080_v28  ;;  %v2065_v63 = vand.u32 2147483647, %v4824_v18  ;;  %v2976_v25 = vsub.f32 %v1300_v1, %v1628_v9 }
 0x140   : > { %v1191_v31 = vpop.xlane.xlu1 %1190  ;;  %v2609_v61 = vmul.f32 0.6931472, %v3791_v20  ;;  %3792 = vpow2.f32 %v2193_v39  ;;  %v1612_v4 = vadd.f32 %v4599_v53, %v1420_v13  ;;  %v1168_v17 = vsel %vm1086_vm1, %v4760_v10, 0.0  ;;  %v798_v14 = vpop.f32.mrf.mxu0 }
 0x141   : > { %v1188_v46 = vpop.xlane.xlu0 %1187  ;;  %3794 = vpow2.f32 %v2287_v40  ;;  %v2225_v16 = vmul.f32 1.442695, %v2144_v12  ;;  %v4846_v62 = vadd.f32 %v4601_v54, %v1191_v31  ;;  %v1888_v36 = vmax.f32 %v1300_v1, 0.0  ;;  %v514_v31 = vld [vmem:[%s4641_s7 + $0x110] sm:$0xff] }
 0x142   : > { %v2615_v58 = vsel %vm4828_vm8, %v2612_v15, %v2609_v61  ;;  %v1952_v59 = vmul.f32 %v1300_v1, %v497_v32  ;;  %v2960_v43 = vsub.f32 %v4796_v38, %v1612_v4  ;;  %v3089_v35 = vsel %vm1807_vm2, %v2895_v26, 0.0  ;;  %v498_v12 = vld [vmem:[%s4641_s7 + $0x90] sm:$0xff] }
 0x143   : > { %3796 = vpow2.f32 %v2225_v16  ;;  %v1873_v9 = vmax.f32 %v4824_v18, 0.0  ;;  %v1937_v40 = vmul.f32 %v4824_v18, %v482_v49  ;;  %v2129_v10 = vsub.f32 0.0, %v2065_v63 }
 0x144   : > { %1214 = vadd.xlane.f32.xlu2 %v4770_v21  ;;  %1217 = vadd.xlane.f32.xlu1 %v4784_v42  ;;  %v3024_v5 = vmul.f32 %v2960_v43, %v2960_v43  ;;  %v2097_v28 = vand.u32 2147483647, %v4846_v62  ;;  %v4861_v1 = vadd.f32 %v4601_v54, %v1188_v46  ;;  %v4864_v30 = vadd.f32 %v2471_v23, %v4715_v37 }
 0x145   : > { %1169 = vadd.xlane.f32.xlu0 %v1168_v17  ;;  %v2927_v38 = vadd.f32 %v2615_v58, %v4741_v56  ;;  %3798 = vpow2.f32 %v2289_v0  ;;  %v3040_v20 = vmul.f32 %v2976_v25, %v2976_v25  ;;  %v4868_v21 = vsel %vm3153_vm4, %v3089_v35, 0.0 }
 0x146   : > { %7374 = vst [vmem:[#allocation17_spill] sm:$0xff] %v4861_v1  ;;  %v3793_v39 = vpop.eup %3792  ;;  %v4870_v42 = vsub.f32 %v1888_v36, %v1952_v59  ;;  %v3296_v13 = vsel %vm1808_vm7, %v3024_v5, 0.0  ;;  %v2161_v26 = vsub.f32 0.0, %v2097_v28  ;;  %v4877_v15 = vsub.f32 %v1873_v9, %v1937_v40 }
 0x147   : > { %7375 = vst [vmem:[#allocation18_spill] sm:$0xff] %v4864_v30  ;;  %v4875_v61 = vpop.eup %3794  ;;  %v2328_v37 = vadd.f32 1.0, %v3793_v39  ;;  %v2331_v23 = vmul.f32 -0.5, %v3793_v39  ;;  %v3360_v56 = vsel %vm3153_vm4, %v3296_v13, 0.0  ;;  %v2195_v0 = vmul.f32 1.442695, %v2129_v10 }
 0x148   : > { %7376 = vst [vmem:[#allocation19_spill] sm:$0xff] %v4875_v61  ;;  %v4881_v32 = vadd.f32 %v3360_v56, %v4773_v22  ;;  %v2096_v46 = vand.u32 2147483647, %v4861_v1  ;;  %v1098_v49 = vpop.xlane.xlu1 %1097  ;;  %v3121_v25 = vsel %vm1839_vm3, %v2927_v38, 0.0  ;;  %v4889_v4 = vsel %vm1824_vm9, %v3040_v20, 0.0  ;;  %v1471_v22 = vpop.xlane.xlu2 %1470 }
 0x149   : > { %v3797_v63 = vpop.eup %3796  ;;  %3800 = vlog2.f32 %v2328_v37  ;;  %v4892_v16 = vmul.f32 %v4846_v62, %v514_v31  ;;  %v1143_v17 = vpop.xlane.xlu0 %1142  ;;  %v2334_v59 = vand.u32 2147483647, %v3793_v39  ;;  %v2259_v43 = vmul.f32 1.442695, %v2161_v26 }
 0x14a   : > { %v2472_v58 = vadd.f32 1.0, %v3797_v63  ;;  %v2475_v36 = vmul.f32 -0.5, %v3797_v63  ;;  %v2478_v9 = vand.u32 2147483647, %v3797_v63  ;;  %v2332_v40 = vadd.f32 1.0, %v2331_v23 }
 0x14b   : > { %v4894_v35 = vpop.eup %3798  ;;  %v2160_v10 = vsub.f32 0.0, %v2096_v46  ;;  %v4898_v5 = vadd.f32 %v4601_v54, %v1098_v49  ;;  %v1629_v28 = vadd.f32 %v4599_v53, %v1471_v22  ;;  %v1696_v38 = vadd.s32 144, %v4611_v60  ;;  %v483_v46 = vld [vmem:[%s4641_s7 + $0x18] sm:$0xff] }
 0x14c   : > { %7377 = vst [vmem:[#allocation20_spill] sm:$0xff] %v4894_v35  ;;  %3802 = vlog2.f32 %v2472_v58  ;;  %v4903_v20 = vadd.f32 %v4601_v54, %v1143_v17  ;;  %v4906_v13 = vsel %vm3153_vm4, %v3121_v25, 0.0  ;;  %v2476_v37 = vadd.f32 1.0, %v2475_v36 }
 0x14d   : > { %7378 = vst [vmem:[#allocation21_spill] sm:$0xff] %v4906_v13  ;;  %3804 = vpow2.f32 %v2195_v0  ;;  %v2066_v26 = vand.u32 2147483647, %v4898_v5  ;;  %vm4910_vm10 = vcmp.lt.f32.partialorder %v2334_v59, 0.0004427343  ;;  %v1968_v56 = vmul.f32 %v4861_v1, %v513_v51 }
 0x14e   : > { %3806 = vpow2.f32 %v2259_v43  ;;  %vm4916_vm11 = vcmp.lt.f32.partialorder %v2478_v9, 0.0004427343  ;;  %v2333_v0 = vmul.f32 %v3793_v39, %v2332_v40  ;;  %v2257_v25 = vmul.f32 1.442695, %v2160_v10  ;;  %v4931_v39 = vld [vmem:[%s7283_s4] ss:$0 sm:$0xff] }
 0x14f   : > { %v3801_v49 = vpop.eup %3800  ;;  %v2081_v17 = vand.u32 2147483647, %v4903_v20  ;;  %v1874_v36 = vmax.f32 %v4898_v5, 0.0  ;;  %v4923_v59 = vadd.s32 %v4619_v3, %v1696_v38  ;;  %v2977_v43 = vsub.f32 %v4903_v20, %v1629_v28 }
 0x150   : > { %v2330_v58 = vmul.f32 0.6931472, %v3801_v49  ;;  %v1938_v51 = vmul.f32 %v4898_v5, %v483_v46  ;;  %v2130_v31 = vsub.f32 0.0, %v2066_v26  ;;  %v1033_v40 = vmul.f32 %v4931_v39, %v965_v27  ;;  %v4944_v26 = vld [vmem:[%s7284_s5] ss:$0 sm:$0xff]  ;;  %v1146_v61 = vpop.xlane.xlu1 %1145 }
 0x151   : > { %v2145_v9 = vsub.f32 0.0, %v2081_v17  ;;  %v2477_v49 = vmul.f32 %v3797_v63, %v2476_v37  ;;  %v1050_v28 = vmul.f32 %v4931_v39, %v7302_v7  ;;  %v1362_v46 = vmul.f32 %v4944_v26, %v965_v27 }
 0x152   : > { %v3803_v10 = vpop.eup %3802  ;;  %v2336_v38 = vsel %vm4910_vm10, %v2333_v0, %v2330_v58  ;;  %v1889_v37 = vmax.f32 %v4903_v20, 0.0  ;;  %v1101_v0 = vpop.xlane.xlu2 %1100  ;;  %vm1825_vm12 = vcmp.lt.s32.totalorder %v4923_v59, 200  ;;  %v1953_v7 = vmul.f32 %v4903_v20, %v498_v12 }
 0x153   : > { %v4949_v17 = vpop.eup %3804  ;;  %v2474_v45 = vmul.f32 0.6931472, %v3803_v10  ;;  %v2896_v63 = vadd.f32 %v2336_v38, %v4837_v52  ;;  %v2227_v23 = vmul.f32 1.442695, %v2145_v9  ;;  %v1120_v24 = vsel %vm1086_vm1, %v1033_v40, 0.0 }
 0x154   : > { %v4953_v58 = vpop.eup %3806  ;;  %v1171_v27 = vsel %vm1086_vm1, %v1050_v28, 0.0  ;;  %v2197_v52 = vmul.f32 1.442695, %v2130_v31  ;;  %v3041_v38 = vmul.f32 %v2977_v43, %v2977_v43  ;;  %1121 = vadd.xlane.f32.xlu2 %v1120_v24  ;;  %v1448_v12 = vsel %vm1086_vm1, %v1362_v46, 0.0 }
 0x155   : > { %v3090_v10 = vsel %vm1808_vm7, %v2896_v63, 0.0  ;;  %3808 = vpow2.f32 %v2227_v23  ;;  %1172 = vadd.xlane.f32.xlu1 %v1171_v27  ;;  %v2480_v9 = vsel %vm4916_vm11, %v2477_v49, %v2474_v45  ;;  %v4966_v20 = vadd.f32 %v4601_v54, %v1101_v0  ;;  %1449 = vadd.xlane.f32.xlu0 %v1448_v12  ;;  %v484_v0 = vld [vmem:[%s4641_s7 + $0x20] sm:$0xff] }
 0x156   : > { %v3155_v11 = vsel %vm3153_vm4, %v3090_v10, 0.0  ;;  %v799_v31 = vadd.f32 %v4974_v29, %v798_v14  ;;  %v4978_v45 = vadd.f32 %v4601_v54, %v1146_v61  ;;  %v2337_v22 = vadd.f32 1.0, %v4949_v17  ;;  %v1423_v10 = vpop.xlane.xlu0 %1422 }
 0x157   : > { %v4969_v40 = vadd.f32 %v3155_v11, %v4868_v21  ;;  %v4983_v43 = vsel %vm3153_vm4, %v4889_v4, 0.0  ;;  %3810 = vpow2.f32 %v2257_v25  ;;  %v2067_v11 = vand.u32 2147483647, %v4966_v20 }
 0x158   : > { %7383 = vst [vmem:[#allocation22_spill] sm:$0xff] %v4983_v43  ;;  %v1680_v21 = vadd.s32 16, %v4611_v60  ;;  %v2912_v49 = vadd.f32 %v2480_v9, %v4870_v42  ;;  %v7384_v14 = vmax.f32 %v4846_v62, 0.0  ;;  %3812 = vpow2.f32 %v2197_v52 }
 0x159   : > { %v3313_v61 = vsel %vm1825_vm12, %v3041_v38, 0.0  ;;  %v7385_v4 = vmax.f32 %v4861_v1, 0.0  ;;  %v4999_v25 = vsub.f32 %v1874_v36, %v1938_v51  ;;  %v5001_v63 = vsub.f32 %v1889_v37, %v1953_v7 }
 0x15a   : > { %v4991_v28 = vsub.f32 %v7384_v14, %v4892_v16  ;;  %3814 = vlog2.f32 %v2337_v22  ;;  %v966_v23 = vmax.f32 %v799_v31, 0.0  ;;  %v2131_v24 = vsub.f32 0.0, %v2067_v11  ;;  %v1149_v35 = vpop.xlane.xlu2 %1148 }
 0x15b   : > { %v4997_v46 = vsub.f32 %v7385_v4, %v1968_v56  ;;  %v3809_v42 = vpop.eup %3808  ;;  %v2082_v16 = vand.u32 2147483647, %v4978_v45  ;;  %v2340_v27 = vmul.f32 -0.5, %v4949_v17  ;;  %v5007_v38 = vsel %vm3153_vm4, %v3313_v61, 0.0  ;;  %v499_v56 = vld [vmem:[%s4641_s7 + $0x98] sm:$0xff] }
 0x15c   : > { %v2481_v52 = vadd.f32 1.0, %v3809_v42  ;;  %7387 = vst [vmem:[#allocation24_spill] sm:$0xff] %v5007_v38  ;;  %v1745_v36 = vadd.s32 %v4619_v3, %v1680_v21  ;;  %v2343_v7 = vand.u32 2147483647, %v4949_v17  ;;  %v5014_v51 = vsel %vm1824_vm9, %v2912_v49, 0.0 }
 0x15d   : > { %7386 = vst [vmem:[#allocation23_spill] sm:$0xff] %v4997_v46  ;;  %v2484_v37 = vmul.f32 -0.5, %v3809_v42  ;;  %v2341_v12 = vadd.f32 1.0, %v2340_v27  ;;  %v5017_v31 = vpop.eup %3810  ;;  %v5020_v22 = vmul.f32 %v4966_v20, %v484_v0  ;;  %v1613_v21 = vadd.f32 %v4599_v53, %v1423_v10 }
 0x15e   : > { %3816 = vlog2.f32 %v2481_v52  ;;  %v5024_v14 = vpop.eup %3812  ;;  %v2487_v61 = vand.u32 2147483647, %v3809_v42  ;;  %v2199_v33 = vmul.f32 1.442695, %v2131_v24  ;;  %v1954_v49 = vmul.f32 %v4978_v45, %v499_v56 }
 0x15f   : > { %v2146_v4 = vsub.f32 0.0, %v2082_v16  ;;  %vm1809_vm13 = vcmp.lt.s32.totalorder %v1745_v36, 200  ;;  %vm5027_vm14 = vcmp.lt.f32.partialorder %v2343_v7, 0.0004427343  ;;  %v2961_v0 = vsub.f32 %v4824_v18, %v1613_v21  ;;  %v894_v21 = vpop.f32.mrf.mxu2 }
 0x160   : > { %v3815_v9 = vpop.eup %3814  ;;  %v7390_v52 = vmax.f32 %v4711_v19, 0.0  ;;  %v2485_v11 = vadd.f32 1.0, %v2484_v37  ;;  %v2342_v24 = vmul.f32 %v4949_v17, %v2341_v12  ;;  %v1363_v56 = vmul.f32 %v4944_v26, %v966_v23  ;;  %v849_v37 = vpop.f32.mrf.mxu1 }
 0x161   : > { %v2339_v13 = vmul.f32 0.6931472, %v3815_v9  ;;  %v3025_v16 = vmul.f32 %v2961_v0, %v2961_v0  ;;  %v1034_v7 = vmul.f32 %v4931_v39, %v966_v23  ;;  %v5040_v43 = vadd.f32 %v4601_v54, %v1149_v35 }
 0x162   : > { %v1378_v10 = vmul.f32 %v4944_v26, %v7390_v52  ;;  %vm5042_vm15 = vcmp.lt.f32.partialorder %v2487_v61, 0.0004427343  ;;  %v1451_v17 = vsel %vm1086_vm1, %v1363_v56, 0.0  ;;  %v2346_v9 = vadd.f32 1.0, %v5024_v14  ;;  %v500_v56 = vld [vmem:[%s4641_s7 + $0xa0] sm:$0xff] }
 0x163   : > { %v2345_v19 = vsel %vm5027_vm14, %v2342_v24, %v2339_v13  ;;  %v3297_v35 = vsel %vm1809_vm13, %v3025_v16, 0.0  ;;  %1452 = vadd.xlane.f32.xlu1 %v1451_v17  ;;  %v1123_v61 = vsel %vm1086_vm1, %v1034_v7, 0.0  ;;  %v1681_v0 = vadd.s32 24, %v4611_v60  ;;  %v1426_v16 = vpop.xlane.xlu1 %1425 }
 0x164   : > { %v1496_v38 = vsel %vm1086_vm1, %v1378_v10, 0.0  ;;  %v3817_v12 = vpop.eup %3816  ;;  %v2897_v23 = vadd.f32 %v2345_v19, %v4877_v15  ;;  %v2486_v13 = vmul.f32 %v3809_v42, %v2485_v11  ;;  %1124 = vadd.xlane.f32.xlu0 %v1123_v61  ;;  %v2083_v52 = vand.u32 2147483647, %v5040_v43 }
 0x165   : > { %1497 = vadd.xlane.f32.xlu2 %v1496_v38  ;;  %v2483_v27 = vmul.f32 0.6931472, %v3817_v12  ;;  %v3362_v38 = vsel %vm3153_vm4, %v3297_v35, 0.0  ;;  %v5059_v15 = vadd.f32 %v4974_v29, %v849_v37  ;;  %3818 = vlog2.f32 %v2346_v9 }
 0x166   : > { %v3091_v10 = vsel %vm1809_vm13, %v2897_v23, 0.0  ;;  %v3363_v24 = vadd.f32 %v3362_v38, %v4881_v32  ;;  %v2229_v19 = vmul.f32 1.442695, %v2146_v4  ;;  %v5066_v11 = vadd.f32 %v4974_v29, %v894_v21 }
 0x167   : > { %v2489_v7 = vsel %vm5042_vm15, %v2486_v13, %v2483_v27  ;;  %v3157_v42 = vsel %vm3153_vm4, %v3091_v10, 0.0  ;;  %v2147_v17 = vsub.f32 0.0, %v2083_v52  ;;  %v1746_v32 = vadd.s32 %v4619_v3, %v1681_v0  ;;  %v1194_v13 = vpop.xlane.xlu0 %1193 }
 0x168   : > { %v3158_v36 = vadd.f32 %v3157_v42, %v4969_v40  ;;  %v2349_v37 = vmul.f32 -0.5, %v5024_v14  ;;  %3820 = vpow2.f32 %v2199_v33  ;;  %v1891_v9 = vmax.f32 %v5040_v43, 0.0 }
 0x169   : > { %v1955_v12 = vmul.f32 %v5040_v43, %v500_v56  ;;  %v1614_v18 = vadd.f32 %v4599_v53, %v1426_v16  ;;  %v2913_v4 = vadd.f32 %v2489_v7, %v5001_v63  ;;  %v7307_v23 = vmax.f32 %v5059_v15, 0.0  ;;  %v801_v7 = vpop.f32.mrf.mxu0 }
 0x16a   : > { %v2350_v35 = vadd.f32 1.0, %v2349_v37  ;;  %v2352_v21 = vand.u32 2147483647, %v5024_v14  ;;  %v5079_v40 = vsel %vm3153_vm4, %v5014_v51, 0.0  ;;  %v7394_v33 = vmax.f32 %v4966_v20, 0.0 }
 0x16b   : > { %7393 = vst [vmem:[#allocation25_spill] sm:$0xff] %v5079_v40  ;;  %v7306_v0 = vmax.f32 %v5066_v11, 0.0  ;;  %v2962_v27 = vsub.f32 %v4898_v5, %v1614_v18  ;;  %v3819_v63 = vpop.eup %3818  ;;  %v7395_v38 = vmax.f32 %v4978_v45, 0.0  ;;  %3822 = vpow2.f32 %v2229_v19 }
 0x16c   : > { %v5084_v61 = vsub.f32 %v7394_v33, %v5020_v22  ;;  %v2231_v10 = vmul.f32 1.442695, %v2147_v17  ;;  %vm1810_vm0 = vcmp.lt.s32.totalorder %v1746_v32, 200  ;;  %v5092_v51 = vsub.f32 %v1891_v9, %v1955_v12 }
 0x16d   : > { %v5090_v52 = vsub.f32 %v7395_v38, %v1954_v49  ;;  %v2348_v56 = vmul.f32 0.6931472, %v3819_v63  ;;  %v2351_v16 = vmul.f32 %v5024_v14, %v2350_v35  ;;  %v3026_v22 = vmul.f32 %v2962_v27, %v2962_v27 }
 0x16e   : > { %v3107_v42 = vsel %vm1825_vm12, %v2913_v4, 0.0  ;;  %vm2353_vm2 = vcmp.lt.f32.partialorder %v2352_v21, 0.0004427343  ;;  %v5098_v5 = vadd.f32 %v4601_v54, %v1194_v13  ;;  %v1051_v49 = vmul.f32 %v4931_v39, %v7307_v23  ;;  %v5103_v19 = vpop.eup %3820  ;;  %v1429_v4 = vpop.xlane.xlu2 %1428 }
 0x16f   : > { %v2354_v17 = vsel %vm2353_vm2, %v2351_v16, %v2348_v56  ;;  %v3298_v37 = vsel %vm1810_vm0, %v3026_v22, 0.0  ;;  %v7397_v14 = vmax.f32 %v4781_v41, 0.0  ;;  %v1066_v59 = vmul.f32 %v4931_v39, %v7306_v0  ;;  %v897_v21 = vpop.f32.mrf.mxu2  ;;  %v515_v56 = vld [vmem:[%s4641_s7 + $0x118] sm:$0xff] }
 0x170   : > { %7396 = vst [vmem:[#allocation26_spill] sm:$0xff] %v5098_v5  ;;  %3824 = vpow2.f32 %v2231_v10  ;;  %v2898_v54 = vadd.f32 %v2354_v17, %v4999_v25  ;;  %v3364_v12 = vsel %vm3153_vm4, %v3298_v37, 0.0  ;;  %v5115_v18 = vadd.f32 %v4974_v29, %v801_v7  ;;  %v1474_v37 = vpop.xlane.xlu1 %1473 }
 0x171   : > { %v1379_v9 = vmul.f32 %v4944_v26, %v7397_v14  ;;  %v3365_v35 = vadd.f32 %v3364_v12, %v3363_v24  ;;  %v1174_v41 = vsel %vm1086_vm1, %v1051_v49, 0.0  ;;  %v1219_v27 = vsel %vm1086_vm1, %v1066_v59, 0.0  ;;  %v3823_v13 = vpop.eup %3822 }
 0x172   : > { %v3092_v63 = vsel %vm1810_vm0, %v2898_v54, 0.0  ;;  %v5122_v25 = vadd.f32 %v4974_v29, %v897_v21  ;;  %1175 = vadd.xlane.f32.xlu2 %v1174_v41  ;;  %v1682_v38 = vadd.s32 32, %v4611_v60  ;;  %v2355_v10 = vadd.f32 1.0, %v5103_v19  ;;  %1220 = vadd.xlane.f32.xlu0 %v1219_v27 }
 0x173   : > { %v1499_v33 = vsel %vm1086_vm1, %v1379_v9, 0.0  ;;  %v3159_v24 = vsel %vm3153_vm4, %v3092_v63, 0.0  ;;  %v2098_v16 = vand.u32 2147483647, %v5098_v5  ;;  %v2358_v22 = vmul.f32 -0.5, %v5103_v19  ;;  %v912_v63 = vpop.f32.mrf.mxu3 }
 0x174   : > { %1500 = vadd.xlane.f32.xlu1 %v1499_v33  ;;  %v1615_v32 = vadd.f32 %v4599_v53, %v1429_v4  ;;  %v5131_v7 = vadd.f32 %v3159_v24, %v3158_v36  ;;  %v1747_v49 = vadd.s32 %v4619_v3, %v1682_v38  ;;  %3826 = vlog2.f32 %v2355_v10  ;;  %v1477_v24 = vpop.xlane.xlu0 %1476 }
 0x175   : > { %v1697_v17 = vadd.s32 152, %v4611_v60  ;;  %v5136_v14 = vsel %vm3153_vm4, %v3107_v42, 0.0  ;;  %v2490_v54 = vadd.f32 1.0, %v3823_v13  ;;  %v5143_v4 = vmul.f32 %v5098_v5, %v515_v56 }
 0x176   : > { %7398 = vst [vmem:[#allocation27_spill] sm:$0xff] %v5136_v14  ;;  %v2963_v59 = vsub.f32 %v4966_v20, %v1615_v32  ;;  %v5140_v12 = vpop.eup %3824  ;;  %vm1811_vm3 = vcmp.lt.s32.totalorder %v1747_v49, 200  ;;  %v2359_v36 = vadd.f32 1.0, %v2358_v22  ;;  %v2493_v21 = vmul.f32 -0.5, %v3823_v13 }
 0x177   : > { %v967_v41 = vmax.f32 %v5115_v18, 0.0  ;;  %3828 = vlog2.f32 %v2490_v54  ;;  %v1630_v42 = vadd.f32 %v4599_v53, %v1474_v37  ;;  %v2162_v27 = vsub.f32 0.0, %v2098_v16  ;;  %v852_v54 = vpop.f32.mrf.mxu1 }
 0x178   : > { %v3027_v33 = vmul.f32 %v2963_v59, %v2963_v59  ;;  %v2361_v38 = vand.u32 2147483647, %v5103_v19  ;;  %v5149_v20 = vadd.s32 %v4619_v3, %v1697_v17  ;;  %v2496_v10 = vand.u32 2147483647, %v3823_v13 }
 0x179   : > { %v2494_v32 = vadd.f32 1.0, %v2493_v21  ;;  %v2978_v22 = vsub.f32 %v4978_v45, %v1630_v42  ;;  %v2499_v18 = vadd.f32 1.0, %v5140_v12  ;;  %v2360_v16 = vmul.f32 %v5103_v19, %v2359_v36 }
 0x17a   : > { %v3299_v56 = vsel %vm1811_vm3, %v3027_v33, 0.0  ;;  %v3827_v59 = vpop.eup %3826  ;;  %v1698_v0 = vadd.s32 160, %v4611_v60  ;;  %v2502_v33 = vmul.f32 -0.5, %v5140_v12  ;;  %v2261_v21 = vmul.f32 1.442695, %v2162_v27 }
 0x17b   : > { %v3366_v37 = vsel %vm3153_vm4, %v3299_v56, 0.0  ;;  %v2357_v17 = vmul.f32 0.6931472, %v3827_v59  ;;  %3830 = vlog2.f32 %v2499_v18  ;;  %v5162_v45 = vadd.f32 %v4974_v29, %v912_v63 }
 0x17c   : > { %v5158_v9 = vadd.f32 %v3366_v37, %v3365_v35  ;;  %vm2362_vm5 = vcmp.lt.f32.partialorder %v2361_v38, 0.0004427343  ;;  %v1631_v42 = vadd.f32 %v4599_v53, %v1477_v24  ;;  %vm1826_vm6 = vcmp.lt.s32.totalorder %v5149_v20, 200  ;;  %v900_v38 = vpop.f32.mrf.mxu2  ;;  %v1197_v53 = vpop.xlane.xlu2 %1196 }
 0x17d   : > { %v3829_v23 = vpop.eup %3828  ;;  %v2363_v19 = vsel %vm2362_vm5, %v2360_v16, %v2357_v17  ;;  %v2495_v36 = vmul.f32 %v3823_v13, %v2494_v32  ;;  %vm5166_vm7 = vcmp.lt.f32.partialorder %v2496_v10, 0.0004427343  ;;  %v5172_v27 = vadd.s32 %v4619_v3, %v1698_v0 }
 0x17e   : > { %v2899_v35 = vadd.f32 %v2363_v19, %v5084_v61  ;;  %v2492_v18 = vmul.f32 0.6931472, %v3829_v23  ;;  %v2505_v63 = vand.u32 2147483647, %v5140_v12  ;;  %v3042_v24 = vmul.f32 %v2978_v22, %v2978_v22 }
 0x17f   : > { %v2503_v59 = vadd.f32 1.0, %v2502_v33  ;;  %v2979_v16 = vsub.f32 %v5040_v43, %v1631_v42  ;;  %v5177_v13 = vadd.f32 %v4974_v29, %v852_v54  ;;  %v1364_v23 = vmul.f32 %v4944_v26, %v967_v41  ;;  %v1200_v54 = vpop.xlane.xlu1 %1199  ;;  %v915_v42 = vpop.f32.mrf.mxu3 }
 0x180   : > { %v3093_v10 = vsel %vm1811_vm3, %v2899_v35, 0.0  ;;  %v2498_v61 = vsel %vm5166_vm7, %v2495_v36, %v2492_v18  ;;  %v1035_v0 = vmul.f32 %v4931_v39, %v967_v41  ;;  %v5187_v43 = vadd.f32 %v4974_v29, %v900_v38  ;;  %v1152_v41 = vpop.xlane.xlu0 %1151  ;;  %v5199_v18 = vld [vmem:[#allocation3] ss:$0 sm:$0xff] }
 0x181   : > { %v3831_v32 = vpop.eup %3830  ;;  %v3161_v37 = vsel %vm3153_vm4, %v3093_v10, 0.0  ;;  %v2914_v22 = vadd.f32 %v2498_v61, %v5090_v52  ;;  %v3043_v17 = vmul.f32 %v2979_v16, %v2979_v16  ;;  %v1454_v19 = vsel %vm1086_vm1, %v1364_v23, 0.0 }
 0x182   : > { %v5190_v49 = vadd.f32 %v3161_v37, %v5131_v7  ;;  %v2501_v33 = vmul.f32 0.6931472, %v3831_v32  ;;  %v1126_v36 = vsel %vm1086_vm1, %v1035_v0, 0.0  ;;  %vm1827_vm8 = vcmp.lt.s32.totalorder %v5172_v27, 200  ;;  %1455 = vadd.xlane.f32.xlu2 %v1454_v19 }
 0x183   : > { %v2504_v56 = vmul.f32 %v5140_v12, %v2503_v59  ;;  %1127 = vadd.xlane.f32.xlu1 %v1126_v36  ;;  %v7401_v52 = vmax.f32 %v5059_v15, 0.0  ;;  %v5202_v7 = vadd.f32 %v5199_v18, %v1197_v53  ;;  %v3314_v38 = vsel %vm1826_vm6, %v3042_v24, 0.0 }
 0x184   : > { %vm5206_vm9 = vcmp.lt.f32.partialorder %v2505_v63, 0.0004427343  ;;  %v5211_v12 = vadd.f32 %v4974_v29, %v915_v42  ;;  %v5214_v15 = vadd.f32 %v5199_v18, %v1200_v54  ;;  %v7406_v59 = vmax.f32 %v5098_v5, 0.0  ;;  %v517_v42 = vld [vmem:[%s4641_s7 + $0x128] sm:$0xff]  ;;  %v1104_v36 = vpop.xlane.xlu2 %1103 }
 0x185   : > { %v1380_v35 = vmul.f32 %v4944_v26, %v7401_v52  ;;  %7402 = vst [vmem:[#allocation28_spill] sm:$0xff] %v5202_v7  ;;  %v3108_v53 = vsel %vm1826_vm6, %v2914_v22, 0.0  ;;  %v2507_v63 = vsel %vm5206_vm9, %v2504_v56, %v2501_v33  ;;  %3832 = vpow2.f32 %v2261_v21  ;;  %v516_v22 = vld [vmem:[%s4641_s7 + $0x120] sm:$0xff] }
 0x186   : > { %7405 = vst [vmem:[#allocation29_spill] sm:$0xff] %v5214_v15  ;;  %v5219_v10 = vsub.f32 %v7406_v59, %v5143_v4  ;;  %v3315_v23 = vsel %vm1827_vm8, %v3043_v17, 0.0  ;;  %v2099_v0 = vand.u32 2147483647, %v5202_v7  ;;  %v804_v4 = vpop.f32.mrf.mxu0  ;;  %v5231_v32 = vsel %vm3153_vm4, %v3314_v38, 0.0 }
 0x187   : > { %v1502_v24 = vsel %vm1086_vm1, %v1380_v35, 0.0  ;;  %7408 = vst [vmem:[#allocation31_spill] sm:$0xff] %v5231_v32  ;;  %v7309_v20 = vmax.f32 %v5177_v13, 0.0  ;;  %v7308_v37 = vmax.f32 %v5187_v43, 0.0  ;;  %v5237_v54 = vadd.f32 %v5199_v18, %v1152_v41  ;;  %v502_v32 = vld [vmem:[%s4641_s7 + $0xb0] sm:$0xff] }
 0x188   : > { %7407 = vst [vmem:[#allocation30_spill] sm:$0xff] %v5219_v10  ;;  %1503 = vadd.xlane.f32.xlu0 %v1502_v24  ;;  %v5240_v21 = vsel %vm3153_vm4, %v3108_v53, 0.0  ;;  %v2915_v17 = vadd.f32 %v2507_v63, %v5092_v51  ;;  %v2100_v19 = vand.u32 2147483647, %v5214_v15  ;;  %v5247_v56 = vsel %vm3153_vm4, %v3315_v23, 0.0  ;;  %v1432_v51 = vpop.xlane.xlu0 %1431 }
 0x189   : > { %7409 = vst [vmem:[#allocation32_spill] sm:$0xff] %v5240_v21  ;;  %v1907_v52 = vmax.f32 %v5202_v7, 0.0  ;;  %v2084_v35 = vand.u32 2147483647, %v5237_v54  ;;  %v805_v41 = vadd.f32 %v4974_v29, %v804_v4  ;;  %v1971_v38 = vmul.f32 %v5202_v7, %v516_v22  ;;  %v1155_v22 = vpop.xlane.xlu1 %1154  ;;  %v501_v21 = vld [vmem:[%s4641_s7 + $0xa8] sm:$0xff] }
 0x18a   : > { %7410 = vst [vmem:[#allocation33_spill] sm:$0xff] %v5247_v56  ;;  %v2163_v16 = vsub.f32 0.0, %v2099_v0  ;;  %v7411_v59 = vmax.f32 %v5122_v25, 0.0  ;;  %v5258_v63 = vmul.f32 %v5214_v15, %v517_v42  ;;  %v1068_v23 = vmul.f32 %v4931_v39, %v7308_v37 }
 0x18b   : > { %v2148_v24 = vsub.f32 0.0, %v2084_v35  ;;  %v1052_v4 = vmul.f32 %v4931_v39, %v7309_v20  ;;  %v5266_v0 = vpop.eup %3832  ;;  %v3109_v33 = vsel %vm1827_vm8, %v2915_v17, 0.0  ;;  %v2164_v61 = vsub.f32 0.0, %v2100_v19 }
 0x18c   : > { %v1067_v53 = vmul.f32 %v4931_v39, %v7411_v59  ;;  %7412 = vst [vmem:[#allocation34_spill] sm:$0xff] %v5266_v0  ;;  %v918_v59 = vpop.f32.mrf.mxu3  ;;  %v5272_v35 = vadd.f32 %v5199_v18, %v1104_v36  ;;  %v968_v14 = vmax.f32 %v805_v41, 0.0  ;;  %v1225_v20 = vsel %vm1086_vm1, %v1068_v23, 0.0 }
 0x18d   : > { %v2233_v37 = vmul.f32 1.442695, %v2148_v24  ;;  %v1177_v56 = vsel %vm1086_vm1, %v1052_v4, 0.0  ;;  %v2263_v40 = vmul.f32 1.442695, %v2163_v16  ;;  %v5278_v27 = vadd.f32 %v4974_v29, %v918_v59  ;;  %1226 = vadd.xlane.f32.xlu1 %v1225_v20 }
 0x18e   : > { %v1222_v42 = vsel %vm1086_vm1, %v1067_v53, 0.0  ;;  %v2068_v17 = vand.u32 2147483647, %v5272_v35  ;;  %v5282_v19 = vadd.f32 %v5199_v18, %v1155_v22  ;;  %v5284_v36 = vsub.f32 %v1907_v52, %v1971_v38  ;;  %v5287_v53 = vld [vmem:[#allocation4] ss:$0 sm:$0xff]  ;;  %v807_v22 = vpop.f32.mrf.mxu0 }
 0x18f   : > { %1223 = vadd.xlane.f32.xlu2 %v1222_v42  ;;  %3834 = vpow2.f32 %v2233_v37  ;;  %v1683_v41 = vadd.s32 40, %v4611_v60  ;;  %v1616_v24 = vadd.f32 %v5287_v53, %v1432_v51  ;;  %v5291_v16 = vsel %vm3153_vm4, %v3109_v33, 0.0  ;;  %v1480_v42 = vpop.xlane.xlu2 %1479 }
 0x190   : > { %1178 = vadd.xlane.f32.xlu0 %v1177_v56  ;;  %7413 = vst [vmem:[#allocation35_spill] sm:$0xff] %v5284_v36  ;;  %v1892_v20 = vmax.f32 %v5237_v54, 0.0  ;;  %v1956_v56 = vmul.f32 %v5237_v54, %v501_v21  ;;  %v2132_v23 = vsub.f32 0.0, %v2068_v17  ;;  %v2265_v4 = vmul.f32 1.442695, %v2164_v61  ;;  %v485_v17 = vld [vmem:[%s4641_s7 + $0x28] sm:$0xff]  ;;  %v1107_v36 = vpop.xlane.xlu0 %1106 }
 0x191   : > { %7414 = vst [vmem:[#allocation36_spill] sm:$0xff] %v5291_v16  ;;  %v2085_v52 = vand.u32 2147483647, %v5282_v19  ;;  %v5297_v37 = vadd.s32 %v4619_v3, %v1683_v41  ;;  %v2964_v38 = vsub.f32 %v5272_v35, %v1616_v24  ;;  %3836 = vpow2.f32 %v2263_v40 }
 0x192   : > { %v2201_v33 = vmul.f32 1.442695, %v2132_v23  ;;  %v1036_v59 = vmul.f32 %v4931_v39, %v968_v14  ;;  %v1365_v21 = vmul.f32 %v4944_v26, %v968_v14  ;;  %v5306_v41 = vadd.f32 %v4974_v29, %v807_v22 }
 0x193   : > { %v2149_v16 = vsub.f32 0.0, %v2085_v52  ;;  %vm1812_vm10 = vcmp.lt.s32.totalorder %v5297_v37, 200  ;;  %v3028_v61 = vmul.f32 %v2964_v38, %v2964_v38  ;;  %v1699_v24 = vadd.s32 168, %v4611_v60 }
 0x194   : > { %3838 = vpow2.f32 %v2201_v33  ;;  %v1129_v40 = vsel %vm1086_vm1, %v1036_v59, 0.0  ;;  %v1457_v38 = vsel %vm1086_vm1, %v1365_v21, 0.0  ;;  %v1632_v14 = vadd.f32 %v5287_v53, %v1480_v42  ;;  %v921_v30 = vpop.f32.mrf.mxu3 }
 0x195   : > { %v5310_v23 = vpop.eup %3834  ;;  %v2235_v51 = vmul.f32 1.442695, %v2149_v16  ;;  %v3300_v52 = vsel %vm1812_vm10, %v3028_v61, 0.0  ;;  %v1876_v33 = vmax.f32 %v5272_v35, 0.0  ;;  %1518 = vadd.xlane.f32.xlu1 %v4604_v55  ;;  %v1940_v61 = vmul.f32 %v5272_v35, %v485_v17 }
 0x196   : > { %v3368_v22 = vsel %vm3153_vm4, %v3300_v52, 0.0  ;;  %v2508_v59 = vadd.f32 1.0, %v5310_v23  ;;  %v2511_v16 = vmul.f32 -0.5, %v5310_v23  ;;  %v2980_v42 = vsub.f32 %v5237_v54, %v1632_v14 }
 0x197   : > { %1130 = vadd.xlane.f32.xlu2 %v1129_v40  ;;  %3840 = vpow2.f32 %v2235_v51  ;;  %v5324_v21 = vadd.f32 %v3368_v22, %v5158_v9  ;;  %v1435_v40 = vpop.xlane.xlu1 %1434  ;;  %v5327_v10 = vpop.eup %3836  ;;  %v7416_v55 = vmax.f32 %v5214_v15, 0.0  ;;  %v5336_v7 = vadd.s32 %v4619_v3, %v1699_v24 }
 0x198   : > { %1458 = vadd.xlane.f32.xlu0 %v1457_v38  ;;  %7415 = vst [vmem:[#allocation37_spill] sm:$0xff] %v5327_v10  ;;  %3842 = vlog2.f32 %v2508_v59  ;;  %v1893_v35 = vmax.f32 %v5282_v19, 0.0  ;;  %v1957_v9 = vmul.f32 %v5282_v19, %v502_v32  ;;  %v5341_v54 = vadd.f32 %v4974_v29, %v921_v30 }
 0x199   : > { %v5332_v52 = vsub.f32 %v7416_v55, %v5258_v63  ;;  %v1289_v51 = vadd.f32 %v5199_v18, %v1107_v36  ;;  %3844 = vpow2.f32 %v2265_v4  ;;  %v2020_v14 = vsub.f32 %v1892_v20, %v1956_v56 }
 0x19a   : > { %v3839_v17 = vpop.eup %3838  ;;  %v2512_v63 = vadd.f32 1.0, %v2511_v16  ;;  %v1617_v22 = vadd.f32 %v5287_v53, %v1435_v40  ;;  %v2004_v55 = vsub.f32 %v1876_v33, %v1940_v61  ;;  %v3044_v24 = vmul.f32 %v2980_v42, %v2980_v42  ;;  %v1158_v61 = vpop.xlane.xlu2 %1157 }
 0x19b   : > { %7417 = vst [vmem:[#allocation38_spill] sm:$0xff] %v5332_v52  ;;  %v2364_v38 = vadd.f32 1.0, %v3839_v17  ;;  %v7418_v59 = vmax.f32 %v5278_v27, 0.0  ;;  %v2367_v32 = vmul.f32 -0.5, %v3839_v17  ;;  %vm1828_vm11 = vcmp.lt.s32.totalorder %v5336_v7, 200  ;;  %v486_v52 = vld [vmem:[%s4641_s7 + $0x30] sm:$0xff] }
 0x19c   : > { %v1684_v30 = vadd.s32 48, %v4611_v60  ;;  %v7419_v36 = vmax.f32 %v5306_v41, 0.0  ;;  %v5355_v4 = vsub.f32 %v1893_v35, %v1957_v9  ;;  %v2069_v16 = vand.u32 2147483647, %v1289_v51  ;;  %v924_v46 = vpop.f32.mrf.mxu3 }
 0x19d   : > { %v1074_v5 = vmul.f32 %v4931_v39, %v7418_v59  ;;  %v5353_v56 = vpop.eup %3840  ;;  %3846 = vlog2.f32 %v2364_v38  ;;  %v2370_v40 = vand.u32 2147483647, %v3839_v17  ;;  %v2513_v59 = vmul.f32 %v5310_v23, %v2512_v63 }
 0x19e   : > { %v1037_v20 = vmul.f32 %v4931_v39, %v7419_v36  ;;  %v3843_v42 = vpop.eup %3842  ;;  %v2514_v10 = vand.u32 2147483647, %v5310_v23  ;;  %v2965_v0 = vsub.f32 %v1289_v51, %v1617_v22  ;;  %v3316_v35 = vsel %vm1828_vm11, %v3044_v24, 0.0 }
 0x19f   : > { %1515 = vadd.xlane.f32.xlu2 %v4607_v57  ;;  %v2510_v36 = vmul.f32 0.6931472, %v3843_v42  ;;  %v2133_v9 = vsub.f32 0.0, %v2069_v16  ;;  %v1243_v38 = vsel %vm1086_vm1, %v1074_v5, 0.0  ;;  %v5365_v33 = vpop.eup %3844  ;;  %v2368_v15 = vadd.f32 1.0, %v2367_v32 }
 0x1a0   : > { %7420 = vst [vmem:[#allocation39_spill] sm:$0xff] %v5365_v33  ;;  %v5368_v57 = vadd.s32 %v4619_v3, %v1684_v30  ;;  %1244 = vadd.xlane.f32.xlu1 %v1243_v38  ;;  %v1132_v63 = vsel %vm1086_vm1, %v1037_v20, 0.0  ;;  %v5372_v23 = vadd.f32 %v5199_v18, %v1158_v61  ;;  %v1877_v22 = vmax.f32 %v1289_v51, 0.0 }
 0x1a1   : > { %v1941_v42 = vmul.f32 %v1289_v51, %v486_v52  ;;  %v2203_v1 = vmul.f32 1.442695, %v2133_v9  ;;  %1133 = vadd.xlane.f32.xlu0 %v1132_v63  ;;  %v2517_v5 = vadd.f32 1.0, %v5353_v56  ;;  %vm5375_vm12 = vcmp.lt.f32.partialorder %v2370_v40, 0.0004427343  ;;  %v1483_v52 = vpop.xlane.xlu1 %1482  ;;  %v503_v63 = vld [vmem:[%s4641_s7 + $0xb8] sm:$0xff] }
 0x1a2   : > { %vm5379_vm13 = vcmp.lt.f32.partialorder %v2514_v10, 0.0004427343  ;;  %v5384_v30 = vsel %vm3153_vm4, %v3316_v35, 0.0  ;;  %v5387_v20 = vadd.f32 %v4974_v29, %v924_v46  ;;  %v2086_v61 = vand.u32 2147483647, %v5372_v23  ;;  %v1203_v10 = vpop.xlane.xlu0 %1202 }
 0x1a3   : > { %7425 = vst [vmem:[#allocation40_spill] sm:$0xff] %v5384_v30  ;;  %v3847_v51 = vpop.eup %3846  ;;  %v2516_v16 = vsel %vm5379_vm13, %v2513_v59, %v2510_v36  ;;  %3848 = vpow2.f32 %v2203_v1  ;;  %v1700_v40 = vadd.s32 176, %v4611_v60  ;;  %v2369_v38 = vmul.f32 %v3839_v17, %v2368_v15 }
 0x1a4   : > { %v2366_v9 = vmul.f32 0.6931472, %v3847_v51  ;;  %3850 = vlog2.f32 %v2517_v5  ;;  %v2520_v35 = vmul.f32 -0.5, %v5353_v56  ;;  %vm1813_vm14 = vcmp.lt.s32.totalorder %v5368_v57, 200  ;;  %v927_v37 = vpop.f32.mrf.mxu3 }
 0x1a5   : > { %v5396_v46 = vsub.f32 %v1877_v22, %v1941_v42  ;;  %v3029_v30 = vmul.f32 %v2965_v0, %v2965_v0  ;;  %v2150_v33 = vsub.f32 0.0, %v2086_v61  ;;  %v2916_v59 = vadd.f32 %v2516_v16, %v2020_v14 }
 0x1a6   : > { %v2372_v1 = vsel %vm5375_vm12, %v2369_v38, %v2366_v9  ;;  %v1894_v36 = vmax.f32 %v5372_v23, 0.0  ;;  %v1633_v32 = vadd.f32 %v5287_v53, %v1483_v52  ;;  %v1958_v15 = vmul.f32 %v5372_v23, %v503_v63  ;;  %v1438_v9 = vpop.xlane.xlu2 %1437 }
 0x1a7   : > { %v2900_v51 = vadd.f32 %v2372_v1, %v2004_v55  ;;  %v2237_v17 = vmul.f32 1.442695, %v2150_v33  ;;  %v5404_v5 = vadd.s32 %v4619_v3, %v1700_v40  ;;  %v2521_v42 = vadd.f32 1.0, %v2520_v35 }
 0x1a8   : > { %v2981_v0 = vsub.f32 %v5282_v19, %v1633_v32  ;;  %v5409_v24 = vadd.f32 %v5199_v18, %v1203_v10  ;;  %1527 = vadd.xlane.f32.xlu1 %v4676_v47  ;;  %v2523_v33 = vand.u32 2147483647, %v5353_v56  ;;  %v7427_v52 = vmax.f32 %v5177_v13, 0.0  ;;  %v518_v13 = vld [vmem:[%s4641_s7 + $0x130] sm:$0xff] }
 0x1a9   : > { %v3849_v14 = vpop.eup %3848  ;;  %v3094_v55 = vsel %vm1812_vm10, %v2900_v51, 0.0  ;;  %3852 = vpow2.f32 %v2237_v17  ;;  %v3110_v40 = vsel %vm1828_vm11, %v2916_v59, 0.0  ;;  %v5423_v47 = vsel %vm1813_vm14, %v3029_v30, 0.0  ;;  %v1110_v59 = vpop.xlane.xlu1 %1109 }
 0x1aa   : > { %7426 = vst [vmem:[#allocation41_spill] sm:$0xff] %v5409_v24  ;;  %v1381_v16 = vmul.f32 %v4944_v26, %v7427_v52  ;;  %v3851_v61 = vpop.eup %3850  ;;  %v3163_v19 = vsel %vm3153_vm4, %v3094_v55, 0.0  ;;  %v2373_v10 = vadd.f32 1.0, %v3849_v14  ;;  %v5428_v63 = vsub.f32 %v1894_v36, %v1958_v15  ;;  %v1486_v15 = vpop.xlane.xlu0 %1485 }
 0x1ab   : > { %v5426_v38 = vadd.f32 %v3163_v19, %v5190_v49  ;;  %vm1829_vm15 = vcmp.lt.s32.totalorder %v5404_v5, 200  ;;  %v2519_v26 = vmul.f32 0.6931472, %v3851_v61  ;;  %v2376_v35 = vmul.f32 -0.5, %v3849_v14  ;;  %v5490_v5 = vld [vmem:[%s7283_s4] ss:$0 sm:$0xff] }
 0x1ac   : > { %3854 = vlog2.f32 %v2373_v10  ;;  %v2522_v7 = vmul.f32 %v5353_v56, %v2521_v42  ;;  %v2101_v1 = vand.u32 2147483647, %v5409_v24  ;;  %vm5434_vm0 = vcmp.lt.f32.partialorder %v2523_v33, 0.0004427343 }
 0x1ad   : > { %v5439_v49 = vadd.f32 %v4974_v29, %v927_v37  ;;  %v1505_v36 = vsel %vm1086_vm1, %v1381_v16, 0.0  ;;  %v7430_v32 = vmax.f32 %v5162_v45, 0.0  ;;  %v2379_v17 = vand.u32 2147483647, %v3849_v14 }
 0x1ae   : > { %v3045_v55 = vmul.f32 %v2981_v0, %v2981_v0  ;;  %v1909_v56 = vmax.f32 %v5409_v24, 0.0  ;;  %v1973_v42 = vmul.f32 %v5409_v24, %v518_v13  ;;  %1506 = vadd.xlane.f32.xlu2 %v1505_v36  ;;  %v2525_v52 = vsel %vm5434_vm0, %v2522_v7, %v2519_v26 }
 0x1af   : > { %v1072_v51 = vmul.f32 %v4931_v39, %v7430_v32  ;;  %v3853_v33 = vpop.eup %3852  ;;  %v1618_v16 = vadd.f32 %v5287_v53, %v1438_v9  ;;  %v5452_v19 = vadd.f32 %v5199_v18, %v1110_v59  ;;  %v2377_v10 = vadd.f32 1.0, %v2376_v35 }
 0x1b0   : > { %v2165_v37 = vsub.f32 0.0, %v2101_v1  ;;  %v1701_v0 = vadd.s32 184, %v4611_v60  ;;  %v2526_v32 = vadd.f32 1.0, %v3853_v33  ;;  %v5456_v13 = vsel %vm3153_vm4, %v3110_v40, 0.0 }
 0x1b1   : > { %v1237_v61 = vsel %vm1086_vm1, %v1072_v51, 0.0  ;;  %7431 = vst [vmem:[#allocation42_spill] sm:$0xff] %v5456_v13  ;;  %v2070_v26 = vand.u32 2147483647, %v5452_v19  ;;  %v2529_v7 = vmul.f32 -0.5, %v3853_v33  ;;  %v2917_v9 = vadd.f32 %v2525_v52, %v5355_v4  ;;  %v487_v13 = vld [vmem:[%s4641_s7 + $0x38] sm:$0xff]  ;;  %v1206_v52 = vpop.xlane.xlu2 %1205 }
 0x1b2   : > { %1238 = vadd.xlane.f32.xlu0 %v1237_v61  ;;  %v3855_v36 = vpop.eup %3854  ;;  %v3317_v35 = vsel %vm1829_vm15, %v3045_v55, 0.0  ;;  %v2966_v1 = vsub.f32 %v5452_v19, %v1618_v16  ;;  %3856 = vlog2.f32 %v2526_v32  ;;  %vm5464_vm2 = vcmp.lt.f32.partialorder %v2379_v17, 0.0004427343  ;;  %v930_v55 = vpop.f32.mrf.mxu3  ;;  %v519_v51 = vld [vmem:[%s4641_s7 + $0x138] sm:$0xff] }
 0x1b3   : > { %v2375_v59 = vmul.f32 0.6931472, %v3855_v36  ;;  %v5468_v40 = vsub.f32 %v1909_v56, %v1973_v42  ;;  %v2134_v61 = vsub.f32 0.0, %v2070_v26  ;;  %v2378_v22 = vmul.f32 %v3849_v14, %v2377_v10  ;;  %v855_v26 = vpop.f32.mrf.mxu1 }
 0x1b4   : > { %v2267_v30 = vmul.f32 1.442695, %v2165_v37  ;;  %v5472_v24 = vadd.s32 %v4619_v3, %v1701_v0  ;;  %v1634_v4 = vadd.f32 %v5287_v53, %v1486_v15  ;;  %v5476_v16 = vsel %vm3153_vm4, %v3317_v35, 0.0  ;;  %v1209_v37 = vpop.xlane.xlu1 %1208  ;;  %v1161_v35 = vpop.xlane.xlu0 %1160 }
 0x1b5   : > { %7434 = vst [vmem:[#allocation43_spill] sm:$0xff] %v5468_v40  ;;  %v2205_v17 = vmul.f32 1.442695, %v2134_v61  ;;  %v2530_v32 = vadd.f32 1.0, %v2529_v7  ;;  %v2532_v36 = vand.u32 2147483647, %v3853_v33  ;;  %v2381_v0 = vsel %vm5464_vm2, %v2378_v22, %v2375_v59 }
 0x1b6   : > { %7435 = vst [vmem:[#allocation44_spill] sm:$0xff] %v5476_v16  ;;  %v3111_v56 = vsel %vm1829_vm15, %v2917_v9, 0.0  ;;  %v1878_v14 = vmax.f32 %v5452_v19, 0.0  ;;  %v2982_v42 = vsub.f32 %v5372_v23, %v1634_v4  ;;  %v7436_v10 = vmax.f32 %v5211_v12, 0.0 }
 0x1b7   : > { %3858 = vpow2.f32 %v2205_v17  ;;  %v7437_v7 = vmax.f32 %v5439_v49, 0.0  ;;  %v5496_v9 = vadd.f32 %v5199_v18, %v1206_v52  ;;  %v1942_v61 = vmul.f32 %v5452_v19, %v487_v13 }
 0x1b8   : > { %v1073_v15 = vmul.f32 %v4931_v39, %v7436_v10  ;;  %v3857_v39 = vpop.eup %3856  ;;  %vm1830_vm3 = vcmp.lt.s32.totalorder %v5472_v24, 200  ;;  %v3046_v22 = vmul.f32 %v2982_v42, %v2982_v42  ;;  %v2531_v17 = vmul.f32 %v3853_v33, %v2530_v32 }
 0x1b9   : > { %v1077_v23 = vmul.f32 %v5490_v5, %v7437_v7  ;;  %7438 = vst [vmem:[#allocation45_spill] sm:$0xff] %v5496_v9  ;;  %v2528_v4 = vmul.f32 0.6931472, %v3857_v39  ;;  %vm5503_vm5 = vcmp.lt.f32.partialorder %v2532_v36, 0.0004427343  ;;  %v2901_v7 = vadd.f32 %v2381_v0, %v5396_v46 }
 0x1ba   : > { %v1240_v59 = vsel %vm1086_vm1, %v1073_v15, 0.0  ;;  %1521 = vadd.xlane.f32.xlu0 %v4679_v48  ;;  %v5510_v19 = vadd.f32 %v4974_v29, %v855_v26  ;;  %v5513_v13 = vadd.f32 %v4974_v29, %v930_v55  ;;  %v5516_v48 = vadd.f32 %v5199_v18, %v1161_v35  ;;  %v520_v26 = vld [vmem:[%s4641_s7 + $0x140] sm:$0xff] }
 0x1bb   : > { %1241 = vadd.xlane.f32.xlu2 %v1240_v59  ;;  %v1252_v52 = vsel %vm1086_vm1, %v1077_v23, 0.0  ;;  %3860 = vpow2.f32 %v2267_v30  ;;  %v2534_v33 = vsel %vm5503_vm5, %v2531_v17, %v2528_v4  ;;  %v1910_v32 = vmax.f32 %v5496_v9, 0.0 }
 0x1bc   : > { %1253 = vadd.xlane.f32.xlu1 %v1252_v52  ;;  %v1974_v36 = vmul.f32 %v5496_v9, %v519_v51  ;;  %v5523_v46 = vsel %vm3153_vm4, %v3111_v56, 0.0  ;;  %v5525_v42 = vsub.f32 %v1878_v14, %v1942_v61  ;;  %v3318_v29 = vsel %vm1830_vm3, %v3046_v22, 0.0  ;;  %v933_v22 = vpop.f32.mrf.mxu3  ;;  %v1113_v51 = vpop.xlane.xlu2 %1112  ;;  %v504_v52 = vld [vmem:[%s4641_s7 + $0xc0] sm:$0xff] }
 0x1bd   : > { %7441 = vst [vmem:[#allocation46_spill] sm:$0xff] %v5523_v46  ;;  %v2102_v55 = vand.u32 2147483647, %v5496_v9  ;;  %v3859_v15 = vpop.eup %3858  ;;  %v3030_v0 = vmul.f32 %v2966_v1, %v2966_v1  ;;  %v2918_v30 = vadd.f32 %v2534_v33, %v5428_v63  ;;  %v5533_v23 = vadd.f32 %v5199_v18, %v1209_v37  ;;  %v5548_v37 = vld [vmem:[%s7282_s3] ss:$0 sm:$0xff] }
 0x1be   : > { %v2087_v35 = vand.u32 2147483647, %v5516_v48  ;;  %v3095_v56 = vsel %vm1813_vm14, %v2901_v7, 0.0  ;;  %v2382_v14 = vadd.f32 1.0, %v3859_v15  ;;  %v7318_v39 = vmax.f32 %v5510_v19, 0.0  ;;  %v1164_v7 = vpop.xlane.xlu1 %1163 }
 0x1bf   : > { %7442 = vst [vmem:[#allocation47_spill] sm:$0xff] %v5533_v23  ;;  %v2385_v59 = vmul.f32 -0.5, %v3859_v15  ;;  %v5541_v1 = vsel %vm3153_vm4, %v3318_v29, 0.0  ;;  %v5543_v63 = vsub.f32 %v1910_v32, %v1974_v36  ;;  %v5551_v57 = vadd.f32 %v5548_v37, %v933_v22 }
 0x1c0   : > { %7443 = vst [vmem:[#allocation48_spill] sm:$0xff] %v5541_v1  ;;  %3862 = vlog2.f32 %v2382_v14  ;;  %v2166_v4 = vsub.f32 0.0, %v2102_v55  ;;  %v1911_v17 = vmax.f32 %v5533_v23, 0.0  ;;  %v1975_v10 = vmul.f32 %v5533_v23, %v520_v26 }
 0x1c1   : > { %7444 = vst [vmem:[#allocation49_spill] sm:$0xff] %v5543_v63  ;;  %v5556_v33 = vpop.eup %3860  ;;  %v2388_v32 = vand.u32 2147483647, %v3859_v15  ;;  %v3112_v36 = vsel %vm1830_vm3, %v2918_v30, 0.0  ;;  %v2103_v29 = vand.u32 2147483647, %v5533_v23  ;;  %v1053_v55 = vmul.f32 %v5490_v5, %v7318_v39 }
 0x1c2   : > { %7445 = vst [vmem:[#allocation50_spill] sm:$0xff] %v5556_v33  ;;  %v2151_v61 = vsub.f32 0.0, %v2087_v35  ;;  %v1895_v14 = vmax.f32 %v5516_v48, 0.0  ;;  %v7446_v26 = vmax.f32 %v5341_v54, 0.0  ;;  %v5570_v1 = vadd.f32 %v5199_v18, %v1113_v51 }
 0x1c3   : > { %1524 = vadd.xlane.f32.xlu2 %v4685_v50  ;;  %v2386_v24 = vadd.f32 1.0, %v2385_v59  ;;  %v5573_v46 = vadd.f32 %v5199_v18, %v1164_v7  ;;  %v1685_v50 = vadd.s32 56, %v4611_v60  ;;  %v5577_v35 = vsel %vm3153_vm4, %v3112_v36, 0.0 }
 0x1c4   : > { %v1075_v22 = vmul.f32 %v5490_v5, %v7446_v26  ;;  %v2239_v30 = vmul.f32 1.442695, %v2151_v61  ;;  %7447 = vst [vmem:[#allocation51_spill] sm:$0xff] %v5577_v35  ;;  %v1959_v16 = vmul.f32 %v5516_v48, %v504_v52  ;;  %v1180_v39 = vsel %vm1086_vm1, %v1053_v55, 0.0 }
 0x1c5   : > { %vm5582_vm6 = vcmp.lt.f32.partialorder %v2388_v32, 0.0004427343  ;;  %v2269_v59 = vmul.f32 1.442695, %v2166_v4  ;;  %v5586_v61 = vsub.f32 %v1911_v17, %v1975_v10  ;;  %1181 = vadd.xlane.f32.xlu1 %v1180_v39  ;;  %v2071_v51 = vand.u32 2147483647, %v5570_v1 }
 0x1c6   : > { %v1246_v63 = vsel %vm1086_vm1, %v1075_v22, 0.0  ;;  %v3863_v7 = vpop.eup %3862  ;;  %3864 = vpow2.f32 %v2239_v30  ;;  %v2088_v36 = vand.u32 2147483647, %v5573_v46  ;;  %v1686_v52 = vadd.s32 64, %v4611_v60 }
 0x1c7   : > { %7450 = vst [vmem:[#allocation52_spill] sm:$0xff] %v5586_v61  ;;  %1247 = vadd.xlane.f32.xlu0 %v1246_v63  ;;  %v1750_v55 = vadd.s32 %v4619_v3, %v1685_v50  ;;  %v2384_v22 = vmul.f32 0.6931472, %v3863_v7  ;;  %v2387_v32 = vmul.f32 %v3859_v15, %v2386_v24  ;;  %v2135_v35 = vsub.f32 0.0, %v2071_v51  ;;  %v1441_v63 = vpop.xlane.xlu0 %1440 }
 0x1c8   : > { %v3165_v23 = vsel %vm3153_vm4, %v3095_v56, 0.0  ;;  %v2152_v4 = vsub.f32 0.0, %v2088_v36  ;;  %v5594_v17 = vadd.s32 %v4619_v3, %v1686_v52  ;;  %v3370_v15 = vsel %vm3153_vm4, %v5423_v47, 0.0  ;;  %v488_v36 = vld [vmem:[%s4641_s7 + $0x40] sm:$0xff] }
 0x1c9   : > { %vm1814_vm7 = vcmp.lt.s32.totalorder %v1750_v55, 200  ;;  %v3166_v39 = vadd.f32 %v3165_v23, %v5426_v38  ;;  %v2390_v10 = vsel %vm5582_vm6, %v2387_v32, %v2384_v22  ;;  %v2207_v30 = vmul.f32 1.442695, %v2135_v35  ;;  %v936_v55 = vpop.f32.mrf.mxu3 }
 0x1ca   : > { %v3302_v61 = vsel %vm1814_vm7, %v3030_v0, 0.0  ;;  %v2902_v24 = vadd.f32 %v2390_v10, %v5525_v42  ;;  %3866 = vpow2.f32 %v2269_v59  ;;  %v2167_v56 = vsub.f32 0.0, %v2103_v29  ;;  %v1489_v59 = vpop.xlane.xlu2 %1488 }
 0x1cb   : > { %v3371_v50 = vadd.f32 %v3370_v15, %v5324_v21  ;;  %v5604_v51 = vsub.f32 %v1895_v14, %v1959_v16  ;;  %3868 = vpow2.f32 %v2207_v30  ;;  %v3372_v38 = vsel %vm3153_vm4, %v3302_v61, 0.0  ;;  %v5620_v14 = vld [vmem:[%s7284_s5] ss:$0 sm:$0xff] }
 0x1cc   : > { %v1619_v23 = vadd.f32 %v5287_v53, %v1441_v63  ;;  %v5608_v35 = vpop.eup %3864  ;;  %v2241_v0 = vmul.f32 1.442695, %v2152_v4  ;;  %v3096_v26 = vsel %vm1814_vm7, %v2902_v24, 0.0  ;;  %v7451_v42 = vmax.f32 %v5387_v20, 0.0 }
 0x1cd   : > { %v3373_v47 = vadd.f32 %v3372_v38, %v3371_v50  ;;  %vm1815_vm8 = vcmp.lt.s32.totalorder %v5594_v17, 200  ;;  %v3167_v21 = vsel %vm3153_vm4, %v3096_v26, 0.0  ;;  %v7452_v61 = vmax.f32 %v5306_v41, 0.0 }
 0x1ce   : > { %v1076_v29 = vmul.f32 %v5490_v5, %v7451_v42  ;;  %v2967_v16 = vsub.f32 %v5570_v1, %v1619_v23  ;;  %v5626_v52 = vadd.f32 %v3167_v21, %v3166_v39  ;;  %v7453_v32 = vmax.f32 %v4529_v34, 0.0 }
 0x1cf   : > { %v1366_v7 = vmul.f32 %v5620_v14, %v7452_v61  ;;  %v1702_v63 = vadd.s32 192, %v4611_v60  ;;  %v1635_v41 = vadd.f32 %v5287_v53, %v1489_v59  ;;  %v2535_v15 = vadd.f32 1.0, %v5608_v35  ;;  %v1444_v59 = vpop.xlane.xlu1 %1443 }
 0x1d0   : > { %v1249_v22 = vsel %vm1086_vm1, %v1076_v29, 0.0  ;;  %v1389_v4 = vmul.f32 %v5620_v14, %v7453_v32  ;;  %v3031_v10 = vmul.f32 %v2967_v16, %v2967_v16  ;;  %v5636_v39 = vpop.eup %3866  ;;  %v5638_v24 = vmul.f32 1.442695, %v2167_v56  ;;  %v505_v56 = vld [vmem:[%s4641_s7 + $0xc8] sm:$0xff] }
 0x1d1   : > { %1250 = vadd.xlane.f32.xlu2 %v1249_v22  ;;  %v1460_v30 = vsel %vm1086_vm1, %v1366_v7, 0.0  ;;  %7454 = vst [vmem:[#allocation53_spill] sm:$0xff] %v5636_v39  ;;  %v1879_v50 = vmax.f32 %v5570_v1, 0.0  ;;  %v2538_v38 = vmul.f32 -0.5, %v5608_v35  ;;  %v3869_v23 = vpop.eup %3868  ;;  %v1943_v26 = vmul.f32 %v5570_v1, %v488_v36  ;;  %v1116_v7 = vpop.xlane.xlu0 %1115 }
 0x1d2   : > { %1461 = vadd.xlane.f32.xlu1 %v1460_v30  ;;  %v1529_v34 = vsel %vm1086_vm1, %v1389_v4, 0.0  ;;  %v3303_v42 = vsel %vm1815_vm8, %v3031_v10, 0.0  ;;  %3870 = vlog2.f32 %v2535_v15  ;;  %v2983_v29 = vsub.f32 %v5516_v48, %v1635_v41 }
 0x1d3   : > { %1530 = vadd.xlane.f32.xlu0 %v1529_v34  ;;  %3872 = vpow2.f32 %v2241_v0  ;;  %v2391_v21 = vadd.f32 1.0, %v3869_v23  ;;  %v2394_v16 = vmul.f32 -0.5, %v3869_v23  ;;  %v3374_v61 = vsel %vm3153_vm4, %v3303_v42, 0.0 }
 0x1d4   : > { %v2397_v22 = vand.u32 2147483647, %v3869_v23  ;;  %v5649_v32 = vadd.f32 %v3374_v61, %v3373_v47  ;;  %v1767_v1 = vadd.s32 %v4619_v3, %v1702_v63  ;;  %v2541_v36 = vand.u32 2147483647, %v5608_v35 }
 0x1d5   : > { %3874 = vlog2.f32 %v2391_v21  ;;  %v2539_v10 = vadd.f32 1.0, %v2538_v38  ;;  %v1620_v48 = vadd.f32 %v5287_v53, %v1444_v59  ;;  %v2007_v30 = vsub.f32 %v1879_v50, %v1943_v26 }
 0x1d6   : > { %v5656_v0 = vmul.f32 %v5573_v46, %v505_v56  ;;  %v1687_v41 = vadd.s32 72, %v4611_v60  ;;  %v5660_v15 = vadd.f32 %v5199_v18, %v1116_v7  ;;  %v2395_v47 = vadd.f32 1.0, %v2394_v16  ;;  %v939_v7 = vpop.f32.mrf.mxu3 }
 0x1d7   : > { %v5663_v63 = vadd.f32 %v5548_v37, %v936_v55  ;;  %v7455_v34 = vmax.f32 %v4559_v8, 0.0  ;;  %v7456_v38 = vmax.f32 %v4551_v2, 0.0  ;;  %vm5671_vm9 = vcmp.lt.f32.partialorder %v2397_v22, 0.0004427343  ;;  %v1167_v22 = vpop.xlane.xlu2 %1166 }
 0x1d8   : > { %v3871_v26 = vpop.eup %3870  ;;  %vm1831_vm10 = vcmp.lt.s32.totalorder %v1767_v1, 200  ;;  %vm5675_vm11 = vcmp.lt.f32.partialorder %v2541_v36, 0.0004427343  ;;  %v3047_v55 = vmul.f32 %v2983_v29, %v2983_v29  ;;  %v2540_v16 = vmul.f32 %v5608_v35, %v2539_v10  ;;  %v489_v10 = vld [vmem:[%s4641_s7 + $0x48] sm:$0xff] }
 0x1d9   : > { %v1390_v42 = vmul.f32 %v5620_v14, %v7455_v34  ;;  %v1391_v50 = vmul.f32 %v5620_v14, %v7456_v38  ;;  %v5679_v21 = vpop.eup %3872  ;;  %v2537_v8 = vmul.f32 0.6931472, %v3871_v26  ;;  %v2072_v2 = vand.u32 2147483647, %v5660_v15 }
 0x1da   : > { %v2968_v61 = vsub.f32 %v5660_v15, %v1620_v48  ;;  %v5685_v34 = vadd.s32 %v4619_v3, %v1687_v41  ;;  %v5688_v36 = vadd.f32 %v5548_v37, %v939_v7  ;;  %v2396_v26 = vmul.f32 %v3869_v23, %v2395_v47 }
 0x1db   : > { %v1532_v38 = vsel %vm1086_vm1, %v1390_v42, 0.0  ;;  %v1535_v29 = vsel %vm1086_vm1, %v1391_v50, 0.0  ;;  %v3875_v4 = vpop.eup %3874  ;;  %v2543_v35 = vsel %vm5675_vm11, %v2540_v16, %v2537_v8  ;;  %v2136_v40 = vsub.f32 0.0, %v2072_v2  ;;  %v1492_v2 = vpop.xlane.xlu1 %1491 }
 0x1dc   : > { %1533 = vadd.xlane.f32.xlu2 %v1532_v38  ;;  %1536 = vadd.xlane.f32.xlu1 %v1535_v29  ;;  %v7461_v48 = vmax.f32 %v5513_v13, 0.0  ;;  %v2393_v7 = vmul.f32 0.6931472, %v3875_v4  ;;  %v2919_v9 = vadd.f32 %v2543_v35, %v5604_v51  ;;  %v3319_v42 = vsel %vm1831_vm10, %v3047_v55, 0.0  ;;  %v506_v51 = vld [vmem:[%s4641_s7 + $0xd0] sm:$0xff] }
 0x1dd   : > { %v5701_v50 = vadd.f32 %v5199_v18, %v1167_v22  ;;  %v1880_v23 = vmax.f32 %v5660_v15, 0.0  ;;  %v2209_v47 = vmul.f32 1.442695, %v2136_v40  ;;  %v2544_v8 = vadd.f32 1.0, %v5679_v21 }
 0x1de   : > { %v1078_v41 = vmul.f32 %v5490_v5, %v7461_v48  ;;  %v2399_v16 = vsel %vm5671_vm9, %v2396_v26, %v2393_v7  ;;  %vm1816_vm12 = vcmp.lt.s32.totalorder %v5685_v34, 200  ;;  %v1944_v4 = vmul.f32 %v5660_v15, %v489_v10  ;;  %v1212_v26 = vpop.xlane.xlu0 %1211 }
 0x1df   : > { %v1703_v55 = vadd.s32 200, %v4611_v60  ;;  %v2903_v22 = vadd.f32 %v2399_v16, %v2007_v30  ;;  %3876 = vpow2.f32 %v2209_v47  ;;  %v3032_v38 = vmul.f32 %v2968_v61, %v2968_v61 }
 0x1e0   : > { %v1255_v56 = vsel %vm1086_vm1, %v1078_v41, 0.0  ;;  %v2089_v40 = vand.u32 2147483647, %v5701_v50  ;;  %v3113_v29 = vsel %vm1831_vm10, %v2919_v9, 0.0  ;;  %v1897_v35 = vmax.f32 %v5701_v50, 0.0 }
 0x1e1   : > { %1256 = vadd.xlane.f32.xlu0 %v1255_v56  ;;  %3878 = vlog2.f32 %v2544_v8  ;;  %v2547_v59 = vmul.f32 -0.5, %v5679_v21  ;;  %v3097_v15 = vsel %vm1815_vm8, %v2903_v22, 0.0  ;;  %v1961_v10 = vmul.f32 %v5701_v50, %v506_v51 }
 0x1e2   : > { %v2153_v48 = vsub.f32 0.0, %v2089_v40  ;;  %v1636_v30 = vadd.f32 %v5287_v53, %v1492_v2  ;;  %v3169_v61 = vsel %vm3153_vm4, %v3097_v15, 0.0  ;;  %v5722_v41 = vadd.s32 %v4619_v3, %v1703_v55  ;;  %v903_v15 = vpop.f32.mrf.mxu2 }
 0x1e3   : > { %v2548_v9 = vadd.f32 1.0, %v2547_v59  ;;  %v2550_v1 = vand.u32 2147483647, %v5679_v21  ;;  %v5726_v7 = vadd.f32 %v3169_v61, %v5626_v52  ;;  %v5730_v56 = vadd.f32 %v5199_v18, %v1212_v26  ;;  %v521_v26 = vld [vmem:[%s4641_s7 + $0x148] sm:$0xff] }
 0x1e4   : > { %v2243_v47 = vmul.f32 1.442695, %v2153_v48  ;;  %v2984_v17 = vsub.f32 %v5573_v46, %v1636_v30  ;;  %3880 = vpow2.f32 %v5638_v24  ;;  %v7321_v8 = vmax.f32 %v5551_v57, 0.0 }
 0x1e5   : > { %7462 = vst [vmem:[#allocation54_spill] sm:$0xff] %v5730_v56  ;;  %v7463_v16 = vmax.f32 %v5573_v46, 0.0  ;;  %v7324_v55 = vmax.f32 %v5663_v63, 0.0  ;;  %v3877_v52 = vpop.eup %3876  ;;  %v5741_v2 = vsel %vm3153_vm4, %v3319_v42, 0.0  ;;  %v5743_v22 = vsub.f32 %v1880_v23, %v1944_v4 }
 0x1e6   : > { %7464 = vst [vmem:[#allocation55_spill] sm:$0xff] %v5741_v2  ;;  %3882 = vpow2.f32 %v2243_v47  ;;  %v5747_v24 = vsel %vm3153_vm4, %v3113_v29, 0.0  ;;  %v2400_v59 = vadd.f32 1.0, %v3877_v52  ;;  %v5751_v46 = vsel %vm1816_vm12, %v3032_v38, 0.0  ;;  %v1447_v29 = vpop.xlane.xlu2 %1446 }
 0x1e7   : > { %v5737_v51 = vsub.f32 %v7463_v16, %v5656_v0  ;;  %v3879_v40 = vpop.eup %3878  ;;  %7465 = vst [vmem:[#allocation56_spill] sm:$0xff] %v5747_v24  ;;  %v5753_v0 = vsub.f32 %v1897_v35, %v1961_v10  ;;  %vm1832_vm13 = vcmp.lt.s32.totalorder %v5722_v41, 200  ;;  %v2549_v42 = vmul.f32 %v5679_v21, %v2548_v9  ;;  %v1119_v35 = vpop.xlane.xlu1 %1118 }
 0x1e8   : > { %vm5758_vm14 = vcmp.lt.f32.partialorder %v2550_v1, 0.0004427343  ;;  %v2104_v4 = vand.u32 2147483647, %v5730_v56  ;;  %3884 = vlog2.f32 %v2400_v59  ;;  %v2403_v48 = vmul.f32 -0.5, %v3877_v52  ;;  %v942_v21 = vpop.f32.mrf.mxu3 }
 0x1e9   : > { %v3048_v30 = vmul.f32 %v2984_v17, %v2984_v17  ;;  %v1912_v38 = vmax.f32 %v5730_v56, 0.0  ;;  %v2546_v10 = vmul.f32 0.6931472, %v3879_v40  ;;  %v1976_v61 = vmul.f32 %v5730_v56, %v521_v26  ;;  %v5786_v56 = vld [vmem:[#allocation3] ss:$0 sm:$0xff] }
 0x1ea   : > { %v5766_v47 = vadd.f32 %v5548_v37, %v903_v15  ;;  %v1079_v9 = vmul.f32 %v5490_v5, %v7321_v8  ;;  %v5771_v1 = vpop.eup %3880  ;;  %v2406_v16 = vand.u32 2147483647, %v3877_v52  ;;  %v5774_v59 = vadd.f32 %v5548_v37, %v942_v21  ;;  %v1495_v15 = vpop.xlane.xlu0 %1494 }
 0x1eb   : > { %7468 = vst [vmem:[#allocation57_spill] sm:$0xff] %v5771_v1  ;;  %v1080_v17 = vmul.f32 %v5490_v5, %v7324_v55  ;;  %v7469_v40 = vmax.f32 %v4594_v44, 0.0  ;;  %v2168_v2 = vsub.f32 0.0, %v2104_v4  ;;  %v1621_v24 = vadd.f32 %v5287_v53, %v1447_v29 }
 0x1ec   : > { %v5782_v18 = vpop.eup %3882  ;;  %v1258_v8 = vsel %vm1086_vm1, %v1079_v9, 0.0  ;;  %v1293_v21 = vadd.f32 %v5786_v56, %v1119_v35  ;;  %v2404_v1 = vadd.f32 1.0, %v2403_v48  ;;  %v3320_v55 = vsel %vm1832_vm13, %v3048_v30, 0.0 }
 0x1ed   : > { %v1392_v26 = vmul.f32 %v5620_v14, %v7469_v40  ;;  %1259 = vadd.xlane.f32.xlu2 %v1258_v8  ;;  %v1261_v44 = vsel %vm1086_vm1, %v1080_v17, 0.0  ;;  %v2552_v4 = vsel %vm5758_vm14, %v2549_v42, %v2546_v10  ;;  %v5795_v9 = vsub.f32 %v1912_v38, %v1976_v61  ;;  %v490_v8 = vld [vmem:[%s4641_s7 + $0x50] sm:$0xff] }
 0x1ee   : > { %1262 = vadd.xlane.f32.xlu1 %v1261_v44  ;;  %v2073_v39 = vand.u32 2147483647, %v1293_v21  ;;  %v3885_v35 = vpop.eup %3884  ;;  %vm5798_vm15 = vcmp.lt.f32.partialorder %v2406_v16, 0.0004427343  ;;  %v2969_v30 = vsub.f32 %v1293_v21, %v1621_v24  ;;  %v1704_v17 = vadd.s32 208, %v4611_v60  ;;  %v1215_v33 = vpop.xlane.xlu2 %1214 }
 0x1ef   : > { %v1538_v40 = vsel %vm1086_vm1, %v1392_v26, 0.0  ;;  %7470 = vst [vmem:[#allocation58_spill] sm:$0xff] %v5795_v9  ;;  %v2553_v26 = vadd.f32 1.0, %v5782_v18  ;;  %v2402_v23 = vmul.f32 0.6931472, %v3885_v35  ;;  %v5806_v42 = vsel %vm3153_vm4, %v3320_v55, 0.0  ;;  %v1218_v48 = vpop.xlane.xlu1 %1217 }
 0x1f0   : > { %1539 = vadd.xlane.f32.xlu0 %v1538_v40  ;;  %7473 = vst [vmem:[#allocation59_spill] sm:$0xff] %v5806_v42  ;;  %v2273_v38 = vmul.f32 1.442695, %v2168_v2  ;;  %v2137_v10 = vsub.f32 0.0, %v2073_v39  ;;  %v2405_v61 = vmul.f32 %v3877_v52, %v2404_v1  ;;  %v2920_v44 = vadd.f32 %v2552_v4, %v5737_v51  ;;  %v945_v1 = vpop.f32.mrf.mxu3 }
 0x1f1   : > { %3886 = vlog2.f32 %v2553_v26  ;;  %v1881_v40 = vmax.f32 %v1293_v21, 0.0  ;;  %v2556_v24 = vmul.f32 -0.5, %v5782_v18  ;;  %v1637_v9 = vadd.f32 %v5287_v53, %v1495_v15 }
 0x1f2   : > { %v2211_v29 = vmul.f32 1.442695, %v2137_v10  ;;  %v2408_v35 = vsel %vm5798_vm15, %v2405_v61, %v2402_v23  ;;  %v1945_v55 = vmul.f32 %v1293_v21, %v490_v8  ;;  %v5815_v2 = vadd.s32 %v4619_v3, %v1704_v17  ;;  %v522_v10 = vld [vmem:[%s4641_s7 + $0x150] sm:$0xff] }
 0x1f3   : > { %v7474_v39 = vmax.f32 %v4689_v6, 0.0  ;;  %v2985_v52 = vsub.f32 %v5701_v50, %v1637_v9  ;;  %v7475_v4 = vmax.f32 %v5510_v19, 0.0  ;;  %v7476_v15 = vmax.f32 %v5766_v47, 0.0  ;;  %v1170_v50 = vpop.xlane.xlu0 %1169 }
 0x1f4   : > { %3888 = vpow2.f32 %v2211_v29  ;;  %v3114_v8 = vsel %vm1832_vm13, %v2920_v44, 0.0  ;;  %v2559_v6 = vand.u32 2147483647, %v5782_v18  ;;  %v5832_v17 = vadd.f32 %v5786_v56, %v1215_v33 }
 0x1f5   : > { %v1393_v51 = vmul.f32 %v5620_v14, %v7474_v39  ;;  %v1382_v53 = vmul.f32 %v5620_v14, %v7475_v4  ;;  %v1069_v21 = vmul.f32 %v5490_v5, %v7476_v15  ;;  %v2557_v9 = vadd.f32 1.0, %v2556_v24  ;;  %v523_v4 = vld [vmem:[%s4641_s7 + $0x158] sm:$0xff] }
 0x1f6   : > { %7477 = vst [vmem:[#allocation60_spill] sm:$0xff] %v5832_v17  ;;  %v3049_v19 = vmul.f32 %v2985_v52, %v2985_v52  ;;  %v2904_v41 = vadd.f32 %v2408_v35, %v5743_v22  ;;  %3890 = vpow2.f32 %v2273_v38  ;;  %vm1833_vm0 = vcmp.lt.s32.totalorder %v5815_v2, 200 }
 0x1f7   : > { %v1541_v29 = vsel %vm1086_vm1, %v1393_v51, 0.0  ;;  %v1508_v26 = vsel %vm1086_vm1, %v1382_v53, 0.0  ;;  %v1228_v23 = vsel %vm1086_vm1, %v1069_v21, 0.0  ;;  %v3887_v61 = vpop.eup %3886  ;;  %v5840_v33 = vadd.f32 %v5786_v56, %v1218_v48 }
 0x1f8   : > { %1542 = vadd.xlane.f32.xlu2 %v1541_v29  ;;  %1509 = vadd.xlane.f32.xlu1 %v1508_v26  ;;  %v5843_v44 = vsel %vm3153_vm4, %v3114_v8, 0.0  ;;  %v5845_v24 = vsub.f32 %v1881_v40, %v1945_v55  ;;  %v5848_v39 = vadd.f32 %v5548_v37, %v945_v1  ;;  %v5851_v51 = vadd.f32 %v5786_v56, %v1170_v50  ;;  %v507_v29 = vld [vmem:[%s4641_s7 + $0xd8] sm:$0xff]  ;;  %v948_v16 = vpop.f32.mrf.mxu3 }
 0x1f9   : > { %1229 = vadd.xlane.f32.xlu0 %v1228_v23  ;;  %7478 = vst [vmem:[#allocation61_spill] sm:$0xff] %v5840_v33  ;;  %v5853_v22 = vmul.f32 %v2969_v30, %v2969_v30  ;;  %v1913_v38 = vmax.f32 %v5832_v17, 0.0  ;;  %v1977_v35 = vmul.f32 %v5832_v17, %v522_v10  ;;  %v2105_v52 = vand.u32 2147483647, %v5832_v17  ;;  %v1122_v10 = vpop.xlane.xlu2 %1121 }
 0x1fa   : > { %7479 = vst [vmem:[#allocation62_spill] sm:$0xff] %v5843_v44  ;;  %v3889_v53 = vpop.eup %3888  ;;  %v2555_v15 = vmul.f32 0.6931472, %v3887_v61  ;;  %v2558_v40 = vmul.f32 %v5782_v18, %v2557_v9  ;;  %vm5860_vm2 = vcmp.lt.f32.partialorder %v2559_v6, 0.0004427343  ;;  %v3321_v1 = vsel %vm1833_vm0, %v3049_v19, 0.0 }
 0x1fb   : > { %v3098_v30 = vsel %vm1816_vm12, %v2904_v41, 0.0  ;;  %v2409_v21 = vadd.f32 1.0, %v3889_v53  ;;  %v2412_v48 = vmul.f32 -0.5, %v3889_v53  ;;  %v2106_v8 = vand.u32 2147483647, %v5840_v33 }
 0x1fc   : > { %v1914_v26 = vmax.f32 %v5840_v33, 0.0  ;;  %v1978_v18 = vmul.f32 %v5840_v33, %v523_v4  ;;  %v2090_v6 = vand.u32 2147483647, %v5851_v51  ;;  %v5874_v9 = vpop.eup %3890  ;;  %v5877_v19 = vsel %vm3153_vm4, %v3321_v1, 0.0  ;;  %v1173_v33 = vpop.xlane.xlu1 %1172 }
 0x1fd   : > { %3892 = vlog2.f32 %v2409_v21  ;;  %7482 = vst [vmem:[#allocation63_spill] sm:$0xff] %v5877_v19  ;;  %v5879_v34 = vsub.f32 %v1913_v38, %v1977_v35  ;;  %v2169_v23 = vsub.f32 0.0, %v2105_v52  ;;  %v2561_v61 = vsel %vm5860_vm2, %v2558_v40, %v2555_v15  ;;  %v7485_v38 = vld [vmem:[#allocation10_spill] sm:$0xff] }
 0x1fe   : > { %v1898_v41 = vmax.f32 %v5851_v51, 0.0  ;;  %v1962_v50 = vmul.f32 %v5851_v51, %v507_v29  ;;  %v2154_v4 = vsub.f32 0.0, %v2090_v6  ;;  %v2413_v42 = vadd.f32 1.0, %v2412_v48 }
 0x1ff   : > { %7483 = vst [vmem:[#allocation64_spill] sm:$0xff] %v5879_v34  ;;  %v2170_v44 = vsub.f32 0.0, %v2106_v8  ;;  %v7484_v21 = vmax.f32 %v5774_v59, 0.0  ;;  %v7486_v35 = vmax.f32 %v7485_v38, 0.0  ;;  %v2415_v34 = vand.u32 2147483647, %v3889_v53 }
 0x200   : > { %v2245_v55 = vmul.f32 1.442695, %v2154_v4  ;;  %v7487_v15 = vmax.f32 %v5688_v36, 0.0  ;;  %v5895_v29 = vadd.f32 %v5786_v56, %v1122_v10  ;;  %v2275_v6 = vmul.f32 1.442695, %v2169_v23 }
 0x201   : > { %v1082_v1 = vmul.f32 %v5490_v5, %v7484_v21  ;;  %v1394_v52 = vmul.f32 %v5620_v14, %v7486_v35  ;;  %v5900_v21 = vadd.f32 %v5786_v56, %v1173_v33  ;;  %v5903_v38 = vadd.f32 %v2561_v61, %v5753_v0  ;;  %v1450_v61 = vpop.xlane.xlu0 %1449 }
 0x202   : > { %v1081_v40 = vmul.f32 %v5490_v5, %v7487_v15  ;;  %v5905_v35 = vsub.f32 %v1914_v26, %v1978_v18  ;;  %v5907_v4 = vsub.f32 %v1898_v41, %v1962_v50  ;;  %v2414_v23 = vmul.f32 %v3889_v53, %v2413_v42 }
 0x203   : > { %v1267_v48 = vsel %vm1086_vm1, %v1082_v1, 0.0  ;;  %v1544_v8 = vsel %vm1086_vm1, %v1394_v52, 0.0  ;;  %v3893_v15 = vpop.eup %3892  ;;  %v2277_v19 = vmul.f32 1.442695, %v2170_v44  ;;  %3894 = vpow2.f32 %v2245_v55 }
 0x204   : > { %7488 = vst [vmem:[#allocation10_spill] sm:$0xff] %v5905_v35  ;;  %1268 = vadd.xlane.f32.xlu2 %v1267_v48  ;;  %1545 = vadd.xlane.f32.xlu1 %v1544_v8  ;;  %v1264_v10 = vsel %vm1086_vm1, %v1081_v40, 0.0  ;;  %v2074_v1 = vand.u32 2147483647, %v5895_v29  ;;  %v2411_v33 = vmul.f32 0.6931472, %v3893_v15  ;;  %3896 = vpow2.f32 %v2275_v6 }
 0x205   : > { %1265 = vadd.xlane.f32.xlu0 %v1264_v10  ;;  %v2091_v52 = vand.u32 2147483647, %v5900_v21  ;;  %v1688_v0 = vadd.s32 80, %v4611_v60  ;;  %v1689_v26 = vadd.s32 88, %v4611_v60  ;;  %vm2416_vm3 = vcmp.lt.f32.partialorder %v2415_v34, 0.0004427343  ;;  %v951_v10 = vpop.f32.mrf.mxu3 }
 0x206   : > { %v2138_v50 = vsub.f32 0.0, %v2074_v1  ;;  %v3171_v18 = vsel %vm3153_vm4, %v3098_v30, 0.0  ;;  %v2417_v41 = vsel %vm2416_vm3, %v2414_v23, %v2411_v33  ;;  %3898 = vpow2.f32 %v2277_v19  ;;  %v5924_v48 = vld [vmem:[#allocation4] ss:$0 sm:$0xff]  ;;  %v1498_v23 = vpop.xlane.xlu2 %1497 }
 0x207   : > { %v1753_v42 = vadd.s32 %v4619_v3, %v1688_v0  ;;  %v5917_v44 = vadd.s32 %v4619_v3, %v1689_v26  ;;  %v3172_v53 = vadd.f32 %v3171_v18, %v5726_v7  ;;  %v2905_v55 = vadd.f32 %v2417_v41, %v5845_v24 }
 0x208   : > { %v2213_v40 = vmul.f32 1.442695, %v2138_v50  ;;  %v3376_v34 = vsel %vm3153_vm4, %v5751_v46, 0.0  ;;  %v2155_v6 = vsub.f32 0.0, %v2091_v52  ;;  %v1622_v8 = vadd.f32 %v5924_v48, %v1450_v61 }
 0x209   : > { %vm1817_vm5 = vcmp.lt.s32.totalorder %v1753_v42, 200  ;;  %v3377_v30 = vadd.f32 %v3376_v34, %v5649_v32  ;;  %v5927_v15 = vpop.eup %3894  ;;  %v5930_v7 = vadd.f32 %v5548_v37, %v948_v16  ;;  %vm1818_vm6 = vcmp.lt.s32.totalorder %v5917_v44, 200 }
 0x20a   : > { %3900 = vpow2.f32 %v2213_v40  ;;  %v3099_v24 = vsel %vm1817_vm5, %v2905_v55, 0.0  ;;  %v3305_v19 = vsel %vm1817_vm5, %v5853_v22, 0.0  ;;  %v2970_v1 = vsub.f32 %v5895_v29, %v1622_v8  ;;  %v5937_v33 = vpop.eup %3896 }
 0x20b   : > { %v3173_v46 = vsel %vm3153_vm4, %v3099_v24, 0.0  ;;  %v3378_v32 = vsel %vm3153_vm4, %v3305_v19, 0.0  ;;  %v5942_v0 = vadd.f32 %v5548_v37, %v951_v10  ;;  %v7489_v22 = vmax.f32 %v5122_v25, 0.0 }
 0x20c   : > { %v5939_v52 = vadd.f32 %v3173_v46, %v3172_v53  ;;  %v3379_v16 = vadd.f32 %v3378_v32, %v3377_v30  ;;  %v2247_v50 = vmul.f32 1.442695, %v2155_v6  ;;  %v3034_v18 = vmul.f32 %v2970_v1, %v2970_v1  ;;  %v5953_v53 = vpop.eup %3898  ;;  %v491_v6 = vld [vmem:[%s4641_s7 + $0x58] sm:$0xff]  ;;  %v508_v1 = vld [vmem:[%s4641_s7 + $0xe0] sm:$0xff] }
 0x20d   : > { %v1396_v26 = vmul.f32 %v5620_v14, %v7489_v22  ;;  %v7490_v61 = vmax.f32 %v5848_v39, 0.0  ;;  %v7491_v42 = vmax.f32 %v5066_v11, 0.0  ;;  %7492 = vst [vmem:[#allocation65_spill] sm:$0xff] %v5953_v53  ;;  %v1705_v37 = vadd.s32 216, %v4611_v60 }
 0x20e   : > { %v1638_v25 = vadd.f32 %v5924_v48, %v1498_v23  ;;  %v2562_v34 = vadd.f32 1.0, %v5927_v15  ;;  %v3306_v30 = vsel %vm1818_vm6, %v3034_v18, 0.0  ;;  %v2565_v10 = vmul.f32 -0.5, %v5927_v15 }
 0x20f   : > { %v1083_v41 = vmul.f32 %v5490_v5, %v7490_v61  ;;  %v1395_v55 = vmul.f32 %v5620_v14, %v7491_v42  ;;  %v1550_v40 = vsel %vm1086_vm1, %v1396_v26, 0.0  ;;  %v7330_v19 = vmax.f32 %v5930_v7, 0.0  ;;  %v1453_v61 = vpop.xlane.xlu1 %1452 }
 0x210   : > { %1551 = vadd.xlane.f32.xlu2 %v1550_v40  ;;  %v3901_v24 = vpop.eup %3900  ;;  %v3380_v46 = vsel %vm3153_vm4, %v3306_v30, 0.0  ;;  %v7328_v23 = vmax.f32 %v5942_v0, 0.0  ;;  %3902 = vlog2.f32 %v2562_v34  ;;  %v1882_v32 = vmax.f32 %v5895_v29, 0.0 }
 0x211   : > { %v1270_v11 = vsel %vm1086_vm1, %v1083_v41, 0.0  ;;  %v1547_v8 = vsel %vm1086_vm1, %v1395_v55, 0.0  ;;  %v2418_v22 = vadd.f32 1.0, %v3901_v24  ;;  %v2421_v26 = vmul.f32 -0.5, %v3901_v24  ;;  %v1125_v41 = vpop.xlane.xlu0 %1124 }
 0x212   : > { %1271 = vadd.xlane.f32.xlu1 %v1270_v11  ;;  %1548 = vadd.xlane.f32.xlu0 %v1547_v8  ;;  %v5970_v18 = vadd.f32 %v3380_v46, %v3379_v16  ;;  %v1946_v42 = vmul.f32 %v5895_v29, %v491_v6  ;;  %3904 = vpow2.f32 %v2247_v50  ;;  %v5974_v55 = vadd.s32 %v4619_v3, %v1705_v37 }
 0x213   : > { %v2986_v40 = vsub.f32 %v5851_v51, %v1638_v25  ;;  %v3115_v34 = vsel %vm1833_vm0, %v5903_v38, 0.0  ;;  %v1899_v30 = vmax.f32 %v5900_v21, 0.0  ;;  %3906 = vlog2.f32 %v2418_v22  ;;  %v1176_v51 = vpop.xlane.xlu2 %1175 }
 0x214   : > { %v2566_v11 = vadd.f32 1.0, %v2565_v10  ;;  %v1963_v16 = vmul.f32 %v5900_v21, %v508_v1  ;;  %v2568_v8 = vand.u32 2147483647, %v5927_v15  ;;  %v1295_v29 = vadd.f32 %v5786_v56, %v1125_v41 }
 0x215   : > { %v1085_v50 = vmul.f32 %v5490_v5, %v7328_v23  ;;  %v2422_v37 = vadd.f32 1.0, %v2421_v26  ;;  %v2424_v25 = vand.u32 2147483647, %v3901_v24  ;;  %v7493_v2 = vmax.f32 %v5187_v43, 0.0  ;;  %v492_v23 = vld [vmem:[%s4641_s7 + $0x60] sm:$0xff] }
 0x216   : > { %v1084_v6 = vmul.f32 %v5490_v5, %v7330_v19  ;;  %v3903_v10 = vpop.eup %3902  ;;  %v2010_v46 = vsub.f32 %v1882_v32, %v1946_v42  ;;  %vm1834_vm7 = vcmp.lt.s32.totalorder %v5974_v55, 200  ;;  %v3050_v1 = vmul.f32 %v2986_v40, %v2986_v40  ;;  %v509_v5 = vld [vmem:[%s4641_s7 + $0xe8] sm:$0xff] }
 0x217   : > { %v1397_v38 = vmul.f32 %v5620_v14, %v7493_v2  ;;  %v1690_v22 = vadd.s32 96, %v4611_v60  ;;  %v2567_v41 = vmul.f32 %v5927_v15, %v2566_v11  ;;  %v1623_v26 = vadd.f32 %v5924_v48, %v1453_v61  ;;  %v1501_v17 = vpop.xlane.xlu1 %1500 }
 0x218   : > { %v2075_v35 = vand.u32 2147483647, %v1295_v29  ;;  %v5999_v43 = vadd.f32 %v5786_v56, %v1176_v51  ;;  %v6001_v2 = vpop.eup %3904  ;;  %v2564_v53 = vmul.f32 0.6931472, %v3903_v10  ;;  %vm6003_vm8 = vcmp.lt.f32.partialorder %v2568_v8, 0.0004427343 }
 0x219   : > { %v1276_v32 = vsel %vm1086_vm1, %v1085_v50, 0.0  ;;  %v1553_v42 = vsel %vm1086_vm1, %v1397_v38, 0.0  ;;  %v3907_v40 = vpop.eup %3906  ;;  %v2423_v15 = vmul.f32 %v3901_v24, %v2422_v37  ;;  %vm6009_vm9 = vcmp.lt.f32.partialorder %v2424_v25, 0.0004427343 }
 0x21a   : > { %v2139_v11 = vsub.f32 0.0, %v2075_v35  ;;  %1277 = vadd.xlane.f32.xlu2 %v1276_v32  ;;  %1554 = vadd.xlane.f32.xlu1 %v1553_v42  ;;  %v1273_v51 = vsel %vm1086_vm1, %v1084_v6, 0.0  ;;  %v2420_v10 = vmul.f32 0.6931472, %v3907_v40  ;;  %v3322_v8 = vsel %vm1834_vm7, %v3050_v1, 0.0 }
 0x21b   : > { %v6017_v19 = vadd.s32 %v4619_v3, %v1690_v22  ;;  %v1883_v50 = vmax.f32 %v1295_v29, 0.0  ;;  %1274 = vadd.xlane.f32.xlu0 %v1273_v51  ;;  %v1947_v38 = vmul.f32 %v1295_v29, %v492_v23  ;;  %v2971_v37 = vsub.f32 %v1295_v29, %v1623_v26  ;;  %v1221_v26 = vpop.xlane.xlu0 %1220 }
 0x21c   : > { %v2215_v24 = vmul.f32 1.442695, %v2139_v11  ;;  %v2092_v25 = vand.u32 2147483647, %v5999_v43  ;;  %v2426_v35 = vsel %vm6009_vm9, %v2423_v15, %v2420_v10  ;;  %v2570_v6 = vsel %vm6003_vm8, %v2567_v41, %v2564_v53 }
 0x21d   : > { %v1706_v1 = vadd.s32 224, %v4611_v60  ;;  %v2571_v22 = vadd.f32 1.0, %v6001_v2  ;;  %v6027_v32 = vsel %vm3153_vm4, %v3115_v34, 0.0  ;;  %v2906_v23 = vadd.f32 %v2426_v35, %v2010_v46 }
 0x21e   : > { %3908 = vpow2.f32 %v2215_v24  ;;  %v2156_v29 = vsub.f32 0.0, %v2092_v25  ;;  %v2027_v42 = vsub.f32 %v1899_v30, %v1963_v16  ;;  %v6030_v40 = vsel %vm3153_vm4, %v3322_v8, 0.0 }
 0x21f   : > { %7498 = vst [vmem:[#allocation66_spill] sm:$0xff] %v6030_v40  ;;  %3910 = vlog2.f32 %v2571_v22  ;;  %v2574_v15 = vmul.f32 -0.5, %v6001_v2  ;;  %v2922_v53 = vadd.f32 %v2570_v6, %v5907_v4  ;;  %v3035_v41 = vmul.f32 %v2971_v37, %v2971_v37  ;;  %v1456_v37 = vpop.xlane.xlu2 %1455  ;;  %v7502_v6 = vld [vmem:[#allocation8_spill] sm:$0xff] }
 0x220   : > { %v2249_v61 = vmul.f32 1.442695, %v2156_v29  ;;  %v1639_v11 = vadd.f32 %v5924_v48, %v1501_v17  ;;  %vm1819_vm10 = vcmp.lt.s32.totalorder %v6017_v19, 200  ;;  %v6037_v34 = vsub.f32 %v1883_v50, %v1947_v38  ;;  %v7500_v50 = vld [vmem:[#allocation9_spill] sm:$0xff] }
 0x221   : > { %v6040_v30 = vadd.s32 %v4619_v3, %v1706_v1  ;;  %v6043_v16 = vadd.f32 %v5786_v56, %v1221_v26  ;;  %v3100_v46 = vsel %vm1818_vm6, %v2906_v23, 0.0  ;;  %v2575_v4 = vadd.f32 1.0, %v2574_v15 }
 0x222   : > { %3912 = vpow2.f32 %v2249_v61  ;;  %v2987_v51 = vsub.f32 %v5900_v21, %v1639_v11  ;;  %v1900_v17 = vmax.f32 %v5999_v43, 0.0  ;;  %v1964_v10 = vmul.f32 %v5999_v43, %v509_v5  ;;  %v524_v21 = vld [vmem:[%s4641_s7 + $0x160] sm:$0xff] }
 0x223   : > { %7499 = vst [vmem:[#allocation67_spill] sm:$0xff] %v6043_v16  ;;  %v2577_v8 = vand.u32 2147483647, %v6001_v2  ;;  %v7501_v38 = vmax.f32 %v7500_v50, 0.0  ;;  %v3116_v44 = vsel %vm1834_vm7, %v2922_v53, 0.0  ;;  %v6058_v35 = vsel %vm1819_vm10, %v3035_v41, 0.0  ;;  %v1128_v50 = vpop.xlane.xlu1 %1127  ;;  %v1504_v40 = vpop.xlane.xlu0 %1503 }
 0x224   : > { %v3909_v25 = vpop.eup %3908  ;;  %v7503_v1 = vmax.f32 %v7502_v6, 0.0  ;;  %v7504_v23 = vmax.f32 %v5766_v47, 0.0  ;;  %v3175_v15 = vsel %vm3153_vm4, %v3100_v46, 0.0  ;;  %v2107_v55 = vand.u32 2147483647, %v6043_v16 }
 0x225   : > { %v1400_v24 = vmul.f32 %v5620_v14, %v7501_v38  ;;  %v3911_v26 = vpop.eup %3910  ;;  %v2427_v5 = vadd.f32 1.0, %v3909_v25  ;;  %v2430_v61 = vmul.f32 -0.5, %v3909_v25  ;;  %vm1835_vm11 = vcmp.lt.s32.totalorder %v6040_v30, 200 }
 0x226   : > { %v1399_v22 = vmul.f32 %v5620_v14, %v7503_v1  ;;  %v1398_v29 = vmul.f32 %v5620_v14, %v7504_v23  ;;  %v2573_v53 = vmul.f32 0.6931472, %v3911_v26  ;;  %v2576_v41 = vmul.f32 %v6001_v2, %v2575_v4 }
 0x227   : > { %v1562_v11 = vsel %vm1086_vm1, %v1400_v24, 0.0  ;;  %3914 = vlog2.f32 %v2427_v5  ;;  %vm6072_vm12 = vcmp.lt.f32.partialorder %v2577_v8, 0.0004427343  ;;  %v1915_v38 = vmax.f32 %v6043_v16, 0.0 }
 0x228   : > { %v1979_v46 = vmul.f32 %v6043_v16, %v524_v21  ;;  %1563 = vadd.xlane.f32.xlu2 %v1562_v11  ;;  %v3913_v6 = vpop.eup %3912  ;;  %v2579_v1 = vsel %vm6072_vm12, %v2576_v41, %v2573_v53  ;;  %v3051_v23 = vmul.f32 %v2987_v51, %v2987_v51  ;;  %v1559_v2 = vsel %vm1086_vm1, %v1399_v22, 0.0 }
 0x229   : > { %v1556_v4 = vsel %vm1086_vm1, %v1398_v29, 0.0  ;;  %v2431_v24 = vadd.f32 1.0, %v2430_v61  ;;  %v2433_v26 = vand.u32 2147483647, %v3909_v25  ;;  %v2171_v8 = vsub.f32 0.0, %v2107_v55  ;;  %1560 = vadd.xlane.f32.xlu1 %v1559_v2 }
 0x22a   : > { %1557 = vadd.xlane.f32.xlu0 %v1556_v4  ;;  %v6083_v5 = vadd.f32 %v5786_v56, %v1128_v50  ;;  %v6086_v21 = vsel %vm3153_vm4, %v3116_v44, 0.0  ;;  %v6088_v11 = vsub.f32 %v1900_v17, %v1964_v10  ;;  %v2923_v53 = vadd.f32 %v2579_v1, %v2027_v42 }
 0x22b   : > { %v2580_v51 = vadd.f32 1.0, %v3913_v6  ;;  %v6091_v22 = vadd.f32 %v3175_v15, %v5939_v52  ;;  %v1624_v29 = vadd.f32 %v5924_v48, %v1456_v37  ;;  %v2583_v55 = vmul.f32 -0.5, %v3913_v6  ;;  %v1224_v15 = vpop.xlane.xlu2 %1223 }
 0x22c   : > { %v2076_v61 = vand.u32 2147483647, %v6083_v5  ;;  %v3323_v41 = vsel %vm1835_vm11, %v3051_v23, 0.0  ;;  %v6097_v50 = vsub.f32 %v1915_v38, %v1979_v46  ;;  %v1707_v44 = vadd.s32 232, %v4611_v60  ;;  %v493_v46 = vld [vmem:[%s4641_s7 + $0x68] sm:$0xff] }
 0x22d   : > { %3916 = vlog2.f32 %v2580_v51  ;;  %v3915_v17 = vpop.eup %3914  ;;  %v2432_v42 = vmul.f32 %v3909_v25, %v2431_v24  ;;  %vm6100_vm13 = vcmp.lt.f32.partialorder %v2433_v26, 0.0004427343  ;;  %v2279_v52 = vmul.f32 1.442695, %v2171_v8 }
 0x22e   : > { %7507 = vst [vmem:[#allocation9_spill] sm:$0xff] %v6097_v50  ;;  %v2140_v37 = vsub.f32 0.0, %v2076_v61  ;;  %v2429_v47 = vmul.f32 0.6931472, %v3915_v17  ;;  %v3117_v1 = vsel %vm1835_vm11, %v2923_v53, 0.0  ;;  %v1640_v38 = vadd.f32 %v5924_v48, %v1504_v40  ;;  %v525_v17 = vld [vmem:[%s4641_s7 + $0x168] sm:$0xff] }
 0x22f   : > { %v2586_v23 = vand.u32 2147483647, %v3913_v6  ;;  %v2584_v4 = vadd.f32 1.0, %v2583_v55  ;;  %v7510_v25 = vmax.f32 %v5278_v27, 0.0  ;;  %v7511_v26 = vmax.f32 %v5211_v12, 0.0 }
 0x230   : > { %v2217_v2 = vmul.f32 1.442695, %v2140_v37  ;;  %v1772_v51 = vadd.s32 %v4619_v3, %v1707_v44  ;;  %v2988_v30 = vsub.f32 %v5999_v43, %v1640_v38  ;;  %v7512_v53 = vmax.f32 %v5162_v45, 0.0  ;;  %v1227_v38 = vpop.xlane.xlu1 %1226 }
 0x231   : > { %v1403_v24 = vmul.f32 %v5620_v14, %v7510_v25  ;;  %v1402_v8 = vmul.f32 %v5620_v14, %v7511_v26  ;;  %v6120_v40 = vadd.f32 %v5786_v56, %v1224_v15  ;;  %v2435_v27 = vsel %vm6100_vm13, %v2432_v42, %v2429_v47  ;;  %v1179_v25 = vpop.xlane.xlu0 %1178  ;;  %v6180_v47 = vld [vmem:[%s7284_s5] ss:$0 sm:$0xff] }
 0x232   : > { %v1401_v61 = vmul.f32 %v5620_v14, %v7512_v53  ;;  %3918 = vpow2.f32 %v2217_v2  ;;  %v1884_v44 = vmax.f32 %v6083_v5, 0.0  ;;  %v1948_v43 = vmul.f32 %v6083_v5, %v493_v46 }
 0x233   : > { %v1571_v55 = vsel %vm1086_vm1, %v1403_v24, 0.0  ;;  %v1568_v12 = vsel %vm1086_vm1, %v1402_v8, 0.0  ;;  %v3917_v37 = vpop.eup %3916  ;;  %v2972_v45 = vsub.f32 %v6083_v5, %v1624_v29  ;;  %v2585_v42 = vmul.f32 %v3913_v6, %v2584_v4 }
 0x234   : > { %1572 = vadd.xlane.f32.xlu2 %v1571_v55  ;;  %1569 = vadd.xlane.f32.xlu1 %v1568_v12  ;;  %v1565_v15 = vsel %vm1086_vm1, %v1401_v61, 0.0  ;;  %v2582_v10 = vmul.f32 0.6931472, %v3917_v37  ;;  %vm6131_vm14 = vcmp.lt.f32.partialorder %v2586_v23, 0.0004427343  ;;  %v2907_v46 = vadd.f32 %v2435_v27, %v6037_v34  ;;  %v526_v34 = vld [vmem:[%s4641_s7 + $0x170] sm:$0xff] }
 0x235   : > { %1566 = vadd.xlane.f32.xlu0 %v1565_v15  ;;  %v2108_v2 = vand.u32 2147483647, %v6120_v40  ;;  %v3052_v24 = vmul.f32 %v2988_v30, %v2988_v30  ;;  %v1916_v5 = vmax.f32 %v6120_v40, 0.0  ;;  %v1980_v29 = vmul.f32 %v6120_v40, %v525_v17 }
 0x236   : > { %v6140_v26 = vsel %vm3153_vm4, %v3323_v41, 0.0  ;;  %vm1836_vm15 = vcmp.lt.s32.totalorder %v1772_v51, 200  ;;  %v2588_v6 = vsel %vm6131_vm14, %v2585_v42, %v2582_v10  ;;  %v7515_v23 = vmax.f32 %v5439_v49, 0.0 }
 0x237   : > { %3920 = vpow2.f32 %v2279_v52  ;;  %v2172_v8 = vsub.f32 0.0, %v2108_v2  ;;  %v6149_v30 = vadd.f32 %v5786_v56, %v1227_v38  ;;  %v6152_v53 = vadd.f32 %v5786_v56, %v1179_v25 }
 0x238   : > { %v1406_v4 = vmul.f32 %v5620_v14, %v7515_v23  ;;  %v3919_v41 = vpop.eup %3918  ;;  %v6155_v61 = vsel %vm3153_vm4, %v3117_v1, 0.0  ;;  %v6157_v27 = vsub.f32 %v1884_v44, %v1948_v43  ;;  %v6159_v55 = vmul.f32 %v2972_v45, %v2972_v45  ;;  %v510_v44 = vld [vmem:[%s4641_s7 + $0xf0] sm:$0xff]  ;;  %v1131_v45 = vpop.xlane.xlu2 %1130 }
 0x239   : > { %7516 = vst [vmem:[#allocation8_spill] sm:$0xff] %v6149_v30  ;;  %v2924_v49 = vadd.f32 %v2588_v6, %v6088_v11  ;;  %v6164_v14 = vsel %vm1819_vm10, %v2907_v46, 0.0  ;;  %v2436_v52 = vadd.f32 1.0, %v3919_v41  ;;  %v3324_v12 = vsel %vm1836_vm15, %v3052_v24, 0.0 }
 0x23a   : > { %v6167_v17 = vsub.f32 %v1916_v5, %v1980_v29  ;;  %v2439_v37 = vmul.f32 -0.5, %v3919_v41  ;;  %v1917_v15 = vmax.f32 %v6149_v30, 0.0  ;;  %v1981_v1 = vmul.f32 %v6149_v30, %v526_v34 }
 0x23b   : > { %v1580_v43 = vsel %vm1086_vm1, %v1406_v4, 0.0  ;;  %3922 = vlog2.f32 %v2436_v52  ;;  %v2281_v11 = vmul.f32 1.442695, %v2172_v8  ;;  %v2109_v19 = vand.u32 2147483647, %v6149_v30  ;;  %v1519_v4 = vpop.xlane.xlu1 %1518 }
 0x23c   : > { %v1901_v38 = vmax.f32 %v6152_v53, 0.0  ;;  %1581 = vadd.xlane.f32.xlu2 %v1580_v43  ;;  %v3118_v10 = vsel %vm1836_vm15, %v2924_v49, 0.0  ;;  %v2093_v42 = vand.u32 2147483647, %v6152_v53  ;;  %v7517_v2 = vmax.f32 %v5387_v20, 0.0 }
 0x23d   : > { %v7518_v46 = vmax.f32 %v5341_v54, 0.0  ;;  %v6188_v5 = vpop.eup %3920  ;;  %v2442_v29 = vand.u32 2147483647, %v3919_v41  ;;  %v1965_v51 = vmul.f32 %v6152_v53, %v510_v44  ;;  %v6192_v6 = vadd.f32 %v5786_v56, %v1131_v45 }
 0x23e   : > { %v1405_v25 = vmul.f32 %v6180_v47, %v7517_v2  ;;  %v2625_v23 = vadd.f32 1.0, %v4953_v58  ;;  %v2440_v8 = vadd.f32 1.0, %v2439_v37  ;;  %v6196_v20 = vsel %vm3153_vm4, %v3324_v12, 0.0 }
 0x23f   : > { %v1404_v24 = vmul.f32 %v6180_v47, %v7518_v46  ;;  %v6201_v49 = vsel %vm3153_vm4, %v3118_v10, 0.0  ;;  %3924 = vpow2.f32 %v2281_v11  ;;  %v6203_v52 = vsub.f32 %v1917_v15, %v1981_v1 }
 0x240   : > { %v1577_v34 = vsel %vm1086_vm1, %v1405_v25, 0.0  ;;  %v2077_v44 = vand.u32 2147483647, %v6192_v6  ;;  %v2173_v43 = vsub.f32 0.0, %v2109_v19  ;;  %v2157_v45 = vsub.f32 0.0, %v2093_v42 }
 0x241   : > { %v1574_v54 = vsel %vm1086_vm1, %v1404_v24, 0.0  ;;  %7519 = vst [vmem:[#allocation68_spill] sm:$0xff] %v6203_v52  ;;  %1578 = vadd.xlane.f32.xlu1 %v1577_v34  ;;  %v2628_v37 = vmul.f32 -0.5, %v4953_v58  ;;  %v1645_v12 = vadd.f32 %v5924_v48, %v1519_v4  ;;  %v3923_v2 = vpop.eup %3922  ;;  %vm6208_vm0 = vcmp.lt.f32.partialorder %v2442_v29, 0.0004427343  ;;  %v1459_v34 = vpop.xlane.xlu0 %1458 }
 0x242   : > { %1575 = vadd.xlane.f32.xlu0 %v1574_v54  ;;  %v6212_v10 = vsub.f32 %v1901_v38, %v1965_v51  ;;  %v2141_v15 = vsub.f32 0.0, %v2077_v44  ;;  %3926 = vlog2.f32 %v2625_v23  ;;  %v2438_v1 = vmul.f32 0.6931472, %v3923_v2  ;;  %v494_v54 = vld [vmem:[%s4641_s7 + $0x70] sm:$0xff] }
 0x243   : > { %v2441_v11 = vmul.f32 %v3919_v41, %v2440_v8  ;;  %v1712_v46 = vadd.s32 272, %v4611_v60  ;;  %v2993_v19 = vsub.f32 %v4846_v62, %v1645_v12  ;;  %v2631_v24 = vand.u32 2147483647, %v4953_v58 }
 0x244   : > { %v2219_v42 = vmul.f32 1.442695, %v2141_v15  ;;  %v1691_v4 = vadd.s32 104, %v4611_v60  ;;  %v1692_v29 = vadd.s32 112, %v4611_v60  ;;  %v6221_v51 = vmul.f32 1.442695, %v2173_v43 }
 0x245   : > { %v2444_v38 = vsel %vm6208_vm0, %v2441_v11, %v2438_v1  ;;  %v2251_v23 = vmul.f32 1.442695, %v2157_v45  ;;  %v2629_v41 = vadd.f32 1.0, %v2628_v37  ;;  %v6224_v8 = vpop.eup %3924  ;;  %v1885_v44 = vmax.f32 %v6192_v6, 0.0 }
 0x246   : > { %v2908_v62 = vadd.f32 %v2444_v38, %v6157_v27  ;;  %3928 = vpow2.f32 %v2219_v42  ;;  %v1756_v12 = vadd.s32 %v4619_v3, %v1691_v4  ;;  %v6230_v2 = vadd.s32 %v4619_v3, %v1692_v29 }
 0x247   : > { %v3382_v25 = vsel %vm3153_vm4, %v6058_v35, 0.0  ;;  %v1625_v43 = vadd.f32 %v5924_v48, %v1459_v34  ;;  %v7522_v45 = vmax.f32 %v5663_v63, 0.0  ;;  %v1949_v27 = vmul.f32 %v6192_v6, %v494_v54 }
 0x248   : > { %v3927_v15 = vpop.eup %3926  ;;  %v1777_v1 = vadd.s32 %v4619_v3, %v1712_v46  ;;  %vm6240_vm2 = vcmp.lt.f32.partialorder %v2631_v24, 0.0004427343  ;;  %v3383_v42 = vadd.f32 %v3382_v25, %v5970_v18  ;;  %v2630_v35 = vmul.f32 %v4953_v58, %v2629_v41  ;;  %v1516_v41 = vpop.xlane.xlu2 %1515 }
 0x249   : > { %v1409_v37 = vmul.f32 %v6180_v47, %v7522_v45  ;;  %v2627_v4 = vmul.f32 0.6931472, %v3927_v15  ;;  %vm1820_vm3 = vcmp.lt.s32.totalorder %v1756_v12, 200  ;;  %v2973_v29 = vsub.f32 %v6192_v6, %v1625_v43  ;;  %v1245_v15 = vpop.xlane.xlu1 %1244 }
 0x24a   : > { %v3057_v63 = vmul.f32 %v2993_v19, %v2993_v19  ;;  %v3177_v34 = vsel %vm3153_vm4, %v6164_v14, 0.0  ;;  %v7525_v46 = vmax.f32 %v5551_v57, 0.0  ;;  %vm1821_vm5 = vcmp.lt.s32.totalorder %v6230_v2, 200 }
 0x24b   : > { %v1589_v38 = vsel %vm1086_vm1, %v1409_v37, 0.0  ;;  %v2633_v54 = vsel %vm6240_vm2, %v2630_v35, %v2627_v4  ;;  %v3102_v18 = vsel %vm1820_vm3, %v2908_v62, 0.0  ;;  %v3037_v58 = vmul.f32 %v2973_v29, %v2973_v29 }
 0x24c   : > { %v1408_v24 = vmul.f32 %v6180_v47, %v7525_v46  ;;  %1590 = vadd.xlane.f32.xlu2 %v1589_v38  ;;  %v3929_v6 = vpop.eup %3928  ;;  %v2929_v19 = vadd.f32 %v2633_v54, %v4991_v28  ;;  %v3308_v14 = vsel %vm1820_vm3, %v6159_v55, 0.0  ;;  %v7526_v57 = vmax.f32 %v5513_v13, 0.0  ;;  %v1134_v46 = vpop.xlane.xlu0 %1133  ;;  %v7528_v54 = vld [vmem:[#allocation17_spill] sm:$0xff] }
 0x24d   : > { %vm1841_vm6 = vcmp.lt.s32.totalorder %v1777_v1, 200  ;;  %v2445_v43 = vadd.f32 1.0, %v3929_v6  ;;  %v2448_v45 = vmul.f32 -0.5, %v3929_v6  ;;  %v1711_v62 = vadd.s32 264, %v4611_v60 }
 0x24e   : > { %v1586_v12 = vsel %vm1086_vm1, %v1408_v24, 0.0  ;;  %v1407_v25 = vmul.f32 %v6180_v47, %v7526_v57  ;;  %3930 = vpow2.f32 %v2251_v23  ;;  %v3178_v37 = vadd.f32 %v3177_v34, %v6091_v22 }
 0x24f   : > { %1587 = vadd.xlane.f32.xlu1 %v1586_v12  ;;  %v3309_v28 = vsel %vm1821_vm5, %v3037_v58, 0.0  ;;  %v3329_v11 = vsel %vm1841_vm6, %v3057_v63, 0.0  ;;  %3932 = vlog2.f32 %v2445_v43  ;;  %v3179_v13 = vsel %vm3153_vm4, %v3102_v18, 0.0 }
 0x250   : > { %v1583_v55 = vsel %vm1086_vm1, %v1407_v25, 0.0  ;;  %v3384_v1 = vsel %vm3153_vm4, %v3308_v14, 0.0  ;;  %v3123_v4 = vsel %vm1841_vm6, %v2929_v19, 0.0  ;;  %v2451_v35 = vand.u32 2147483647, %v3929_v6 }
 0x251   : > { %1584 = vadd.xlane.f32.xlu0 %v1583_v55  ;;  %v1644_v29 = vadd.f32 %v5924_v48, %v1516_v41  ;;  %v2616_v23 = vadd.f32 1.0, %v5017_v31  ;;  %v2449_v22 = vadd.f32 1.0, %v2448_v45  ;;  %v3386_v34 = vsel %vm3153_vm4, %v3309_v28, 0.0 }
 0x252   : > { %v6273_v38 = vadd.s32 %v4619_v3, %v1711_v62  ;;  %v6276_v63 = vadd.f32 %v5786_v56, %v1245_v15  ;;  %v2619_v24 = vmul.f32 -0.5, %v5017_v31  ;;  %v7529_v58 = vmax.f32 %v5848_v39, 0.0 }
 0x253   : > { %3934 = vlog2.f32 %v2616_v23  ;;  %v2992_v18 = vsub.f32 %v7528_v54, %v1644_v29  ;;  %v2013_v19 = vsub.f32 %v1885_v44, %v1949_v27  ;;  %v3385_v14 = vadd.f32 %v3384_v1, %v3383_v42  ;;  %v532_v27 = vld [vmem:[%s4641_s7 + $0x1a0] sm:$0xff] }
 0x254   : > { %7527 = vst [vmem:[#allocation69_spill] sm:$0xff] %v6276_v63  ;;  %v1412_v41 = vmul.f32 %v6180_v47, %v7529_v58  ;;  %3936 = vpow2.f32 %v6221_v51  ;;  %v2622_v12 = vand.u32 2147483647, %v5017_v31  ;;  %v6285_v57 = vpop.eup %3930  ;;  %v6288_v25 = vsel %vm3153_vm4, %v3329_v11, 0.0 }
 0x255   : > { %v6290_v43 = vadd.f32 %v3179_v13, %v3178_v37  ;;  %v2115_v45 = vand.u32 2147483647, %v6276_v63  ;;  %v6294_v62 = vadd.f32 %v5786_v56, %v1134_v46  ;;  %v3933_v39 = vpop.eup %3932  ;;  %v6297_v28 = vsel %vm3153_vm4, %v3123_v4, 0.0  ;;  %v1507_v37 = vpop.xlane.xlu2 %1506  ;;  %v495_v46 = vld [vmem:[%s4641_s7 + $0x78] sm:$0xff] }
 0x256   : > { %vm6299_vm7 = vcmp.lt.f32.partialorder %v2451_v35, 0.0004427343  ;;  %v6303_v44 = vadd.f32 %v3386_v34, %v3385_v14  ;;  %v1598_v42 = vsel %vm1086_vm1, %v1412_v41, 0.0  ;;  %v2447_v55 = vmul.f32 0.6931472, %v3933_v39  ;;  %v1528_v14 = vpop.xlane.xlu1 %1527 }
 0x257   : > { %v2450_v15 = vmul.f32 %v3929_v6, %v2449_v22  ;;  %vm1840_vm8 = vcmp.lt.s32.totalorder %v6273_v38, 200  ;;  %v2620_v56 = vadd.f32 1.0, %v2619_v24  ;;  %1599 = vadd.xlane.f32.xlu2 %v1598_v42  ;;  %vm6308_vm9 = vcmp.lt.f32.partialorder %v2622_v12, 0.0004427343 }
 0x258   : > { %v2179_v13 = vsub.f32 0.0, %v2115_v45  ;;  %v7534_v1 = vmax.f32 %v5774_v59, 0.0  ;;  %v7535_v35 = vmax.f32 %v5688_v36, 0.0  ;;  %v3056_v34 = vmul.f32 %v2992_v18, %v2992_v18 }
 0x259   : > { %v3935_v23 = vpop.eup %3934  ;;  %v1923_v6 = vmax.f32 %v6276_v63, 0.0  ;;  %v1987_v22 = vmul.f32 %v6276_v63, %v532_v27  ;;  %v2078_v24 = vand.u32 2147483647, %v6294_v62  ;;  %v2453_v59 = vsel %vm6299_vm7, %v2450_v15, %v2447_v55  ;;  %v1239_v15 = vpop.xlane.xlu0 %1238 }
 0x25a   : > { %v1411_v4 = vmul.f32 %v6180_v47, %v7534_v1  ;;  %v1410_v29 = vmul.f32 %v6180_v47, %v7535_v35  ;;  %v6322_v54 = vpop.eup %3936  ;;  %v2618_v58 = vmul.f32 0.6931472, %v3935_v23  ;;  %v1708_v36 = vadd.s32 240, %v4611_v60 }
 0x25b   : > { %7536 = vst [vmem:[#allocation17_spill] sm:$0xff] %v6322_v54  ;;  %v1886_v18 = vmax.f32 %v6294_v62, 0.0  ;;  %v1641_v45 = vadd.f32 %v5924_v48, %v1507_v37  ;;  %v2589_v39 = vadd.f32 1.0, %v6285_v57  ;;  %v2621_v27 = vmul.f32 %v5017_v31, %v2620_v56 }
 0x25c   : > { %v1595_v41 = vsel %vm1086_vm1, %v1411_v4, 0.0  ;;  %v1592_v12 = vsel %vm1086_vm1, %v1410_v29, 0.0  ;;  %v2295_v42 = vmul.f32 1.442695, %v2179_v13  ;;  %v1950_v51 = vmul.f32 %v6294_v62, %v495_v46  ;;  %v7538_v46 = vld [vmem:[#allocation39_spill] sm:$0xff] }
 0x25d   : > { %1596 = vadd.xlane.f32.xlu1 %v1595_v41  ;;  %1593 = vadd.xlane.f32.xlu0 %v1592_v12  ;;  %v2592_v55 = vmul.f32 -0.5, %v6285_v57  ;;  %v2909_v1 = vadd.f32 %v2453_v59, %v2013_v19  ;;  %v3328_v4 = vsel %vm1840_vm8, %v3056_v34, 0.0  ;;  %v2142_v35 = vsub.f32 0.0, %v2078_v24  ;;  %v6359_v12 = vld [vmem:[#allocation3] ss:$0 sm:$0xff] }
 0x25e   : > { %3938 = vlog2.f32 %v2589_v39  ;;  %v2624_v37 = vsel %vm6308_vm9, %v2621_v27, %v2618_v58  ;;  %v6339_v29 = vsub.f32 %v1923_v6, %v1987_v22  ;;  %v6342_v31 = vadd.s32 %v4619_v3, %v1708_v36  ;;  %v1242_v22 = vpop.xlane.xlu2 %1241  ;;  %v7539_v58 = vld [vmem:[#allocation23_spill] sm:$0xff] }
 0x25f   : > { %v2593_v56 = vadd.f32 1.0, %v2592_v55  ;;  %v2595_v13 = vand.u32 2147483647, %v6285_v57  ;;  %v2989_v23 = vsub.f32 %v6152_v53, %v1641_v45  ;;  %v1715_v19 = vadd.s32 296, %v4611_v60 }
 0x260   : > { %7537 = vst [vmem:[#allocation70_spill] sm:$0xff] %v6339_v29  ;;  %v2652_v59 = vadd.f32 1.0, %v7538_v46  ;;  %v6349_v34 = vsel %vm3153_vm4, %v3328_v4, 0.0  ;;  %3940 = vpow2.f32 %v2295_v42  ;;  %v6351_v11 = vsub.f32 %v1886_v18, %v1950_v51  ;;  %v7544_v4 = vld [vmem:[#allocation29_spill] sm:$0xff] }
 0x261   : > { %v2655_v6 = vmul.f32 -0.5, %v7538_v46  ;;  %v3103_v24 = vsel %vm1821_vm5, %v2909_v1, 0.0  ;;  %v2928_v41 = vadd.f32 %v2624_v37, %v7539_v58  ;;  %v2221_v36 = vmul.f32 1.442695, %v2142_v35  ;;  %v1254_v35 = vpop.xlane.xlu1 %1253 }
 0x262   : > { %3942 = vlog2.f32 %v2652_v59  ;;  %vm1837_vm10 = vcmp.lt.s32.totalorder %v6342_v31, 200  ;;  %v1648_v53 = vadd.f32 %v5924_v48, %v1528_v14  ;;  %v6362_v45 = vadd.f32 %v6359_v12, %v1239_v15  ;;  %v535_v31 = vld [vmem:[%s4641_s7 + $0x1b8] sm:$0xff] }
 0x263   : > { %v7541_v18 = vmax.f32 %v5942_v0, 0.0  ;;  %v2594_v2 = vmul.f32 %v6285_v57, %v2593_v56  ;;  %vm6368_vm11 = vcmp.lt.f32.partialorder %v2595_v13, 0.0004427343  ;;  %v3053_v51 = vmul.f32 %v2989_v23, %v2989_v23 }
 0x264   : > { %7540 = vst [vmem:[#allocation39_spill] sm:$0xff] %v6362_v45  ;;  %v3939_v27 = vpop.eup %3938  ;;  %v6373_v14 = vadd.s32 %v4619_v3, %v1715_v19  ;;  %v2656_v1 = vadd.f32 1.0, %v2655_v6  ;;  %v2658_v15 = vand.u32 2147483647, %v7538_v46  ;;  %v2996_v0 = vsub.f32 %v7544_v4, %v1648_v53  ;;  %v531_v4 = vld [vmem:[%s4641_s7 + $0x198] sm:$0xff] }
 0x265   : > { %v1414_v39 = vmul.f32 %v6180_v47, %v7541_v18  ;;  %v2591_v55 = vmul.f32 0.6931472, %v3939_v27  ;;  %v2113_v37 = vand.u32 2147483647, %v6362_v45  ;;  %v7545_v56 = vmax.f32 %v5930_v7, 0.0  ;;  %v530_v18 = vld [vmem:[%s4641_s7 + $0x190] sm:$0xff] }
 0x266   : > { %v6383_v23 = vadd.f32 %v6359_v12, %v1242_v22  ;;  %v6385_v19 = vpop.eup %3940  ;;  %v3181_v59 = vsel %vm3153_vm4, %v3103_v24, 0.0  ;;  %v3122_v6 = vsel %vm1840_vm8, %v2928_v41, 0.0  ;;  %v3060_v53 = vmul.f32 %v2996_v0, %v2996_v0 }
 0x267   : > { %v1604_v57 = vsel %vm1086_vm1, %v1414_v39, 0.0  ;;  %v1413_v13 = vmul.f32 %v6180_v47, %v7545_v56  ;;  %7547 = vst [vmem:[#allocation29_spill] sm:$0xff] %v6385_v19  ;;  %v2597_v58 = vsel %vm6368_vm11, %v2594_v2, %v2591_v55  ;;  %v1522_v39 = vpop.xlane.xlu0 %1521  ;;  %v3325_v22 = vsel %vm1837_vm10, %v3053_v51, 0.0 }
 0x268   : > { %7546 = vst [vmem:[#allocation23_spill] sm:$0xff] %v6383_v23  ;;  %1605 = vadd.xlane.f32.xlu1 %v1604_v57  ;;  %v3943_v7 = vpop.eup %3942  ;;  %v2925_v47 = vadd.f32 %v2597_v58, %v6212_v10  ;;  %v6399_v24 = vadd.f32 %v6359_v12, %v1254_v35  ;;  %vm1844_vm12 = vcmp.lt.s32.totalorder %v6373_v14, 200  ;;  %v2657_v41 = vmul.f32 %v7538_v46, %v2656_v1 }
 0x269   : > { %v1601_v27 = vsel %vm1086_vm1, %v1413_v13, 0.0  ;;  %v2654_v38 = vmul.f32 0.6931472, %v3943_v7  ;;  %v2114_v2 = vand.u32 2147483647, %v6383_v23  ;;  %v1921_v10 = vmax.f32 %v6362_v45, 0.0 }
 0x26a   : > { %7548 = vst [vmem:[#allocation71_spill] sm:$0xff] %v6399_v24  ;;  %1602 = vadd.xlane.f32.xlu0 %v1601_v27  ;;  %vm6404_vm13 = vcmp.lt.f32.partialorder %v2658_v15, 0.0004427343  ;;  %v1985_v51 = vmul.f32 %v6362_v45, %v530_v18  ;;  %v2177_v55 = vsub.f32 0.0, %v2113_v37  ;;  %v3332_v35 = vsel %vm1844_vm12, %v3060_v53, 0.0  ;;  %v1525_v15 = vpop.xlane.xlu2 %1524  ;;  %v7551_v18 = vld [vmem:[#allocation34_spill] sm:$0xff] }
 0x26b   : > { %v2660_v0 = vsel %vm6404_vm13, %v2657_v41, %v2654_v38  ;;  %v1922_v46 = vmax.f32 %v6383_v23, 0.0  ;;  %v1986_v1 = vmul.f32 %v6383_v23, %v531_v4  ;;  %v6417_v57 = vadd.f32 %v3181_v59, %v6290_v43  ;;  %v7552_v27 = vld [vmem:[#allocation38_spill] sm:$0xff]  ;;  %v534_v23 = vld [vmem:[%s4641_s7 + $0x1b0] sm:$0xff] }
 0x26c   : > { %3944 = vpow2.f32 %v2221_v36  ;;  %v3119_v56 = vsel %vm1837_vm10, %v2925_v47, 0.0  ;;  %v2118_v37 = vand.u32 2147483647, %v6399_v24  ;;  %v6423_v13 = vsel %vm3153_vm4, %v3122_v6, 0.0 }
 0x26d   : > { %v6426_v58 = vsel %vm3153_vm4, %v3325_v22, 0.0  ;;  %v2178_v53 = vsub.f32 0.0, %v2114_v2  ;;  %v2634_v7 = vadd.f32 1.0, %v7551_v18  ;;  %v2932_v4 = vadd.f32 %v2660_v0, %v7552_v27  ;;  %v1182_v0 = vpop.xlane.xlu1 %1181  ;;  %v7555_v27 = vld [vmem:[#allocation37_spill] sm:$0xff] }
 0x26e   : > { %v6431_v43 = vsel %vm3153_vm4, %v3332_v35, 0.0  ;;  %v6433_v36 = vsub.f32 %v1921_v10, %v1985_v51  ;;  %v2637_v59 = vmul.f32 -0.5, %v7551_v18  ;;  %v6438_v47 = vsel %vm3153_vm4, %v3119_v56, 0.0 }
 0x26f   : > { %v2291_v6 = vmul.f32 1.442695, %v2177_v55  ;;  %v6440_v38 = vsub.f32 %v1922_v46, %v1986_v1  ;;  %v1926_v22 = vmax.f32 %v6399_v24, 0.0  ;;  %v2182_v41 = vsub.f32 0.0, %v2118_v37 }
 0x270   : > { %7553 = vst [vmem:[#allocation34_spill] sm:$0xff] %v6433_v36  ;;  %v1713_v2 = vadd.s32 280, %v4611_v60  ;;  %3946 = vlog2.f32 %v2634_v7  ;;  %v1646_v42 = vadd.f32 %v5924_v48, %v1522_v39  ;;  %v2293_v10 = vmul.f32 1.442695, %v2178_v53  ;;  %v1248_v36 = vpop.xlane.xlu0 %1247  ;;  %v7556_v7 = vld [vmem:[#allocation26_spill] sm:$0xff] }
 0x271   : > { %7554 = vst [vmem:[#allocation38_spill] sm:$0xff] %v6440_v38  ;;  %v1990_v51 = vmul.f32 %v6399_v24, %v535_v31  ;;  %v1714_v35 = vadd.s32 288, %v4611_v60  ;;  %v2643_v56 = vadd.f32 1.0, %v7555_v27  ;;  %v3126_v46 = vsel %vm1844_vm12, %v2932_v4, 0.0 }
 0x272   : > { %v6448_v55 = vpop.eup %3944  ;;  %v2638_v1 = vadd.f32 1.0, %v2637_v59  ;;  %v2640_v37 = vand.u32 2147483647, %v7551_v18  ;;  %v2994_v38 = vsub.f32 %v7556_v7, %v1646_v42  ;;  %v2646_v39 = vmul.f32 -0.5, %v7555_v27  ;;  %v511_v7 = vld [vmem:[%s4641_s7 + $0xf8] sm:$0xff] }
 0x273   : > { %3948 = vlog2.f32 %v2643_v56  ;;  %v1647_v53 = vadd.f32 %v5924_v48, %v1525_v15  ;;  %v6457_v31 = vadd.f32 %v6359_v12, %v1182_v0  ;;  %v2301_v24 = vmul.f32 1.442695, %v2182_v41  ;;  %v7559_v56 = vld [vmem:[#allocation28_spill] sm:$0xff]  ;;  %v1251_v15 = vpop.xlane.xlu2 %1250 }
 0x274   : > { %3950 = vpow2.f32 %v2291_v6  ;;  %v1778_v45 = vadd.s32 %v4619_v3, %v1713_v2  ;;  %v6461_v14 = vadd.f32 %v6359_v12, %v1248_v36  ;;  %v6463_v4 = vsub.f32 %v1926_v22, %v1990_v51 }
 0x275   : > { %v6466_v59 = vadd.s32 %v4619_v3, %v1714_v35  ;;  %v2649_v42 = vand.u32 2147483647, %v7555_v27  ;;  %v2995_v48 = vsub.f32 %v7559_v56, %v1647_v53  ;;  %v6471_v6 = vsel %vm3153_vm4, %v3126_v46, 0.0 }
 0x276   : > { %7557 = vst [vmem:[#allocation37_spill] sm:$0xff] %v6461_v14  ;;  %v3947_v0 = vpop.eup %3946  ;;  %3952 = vpow2.f32 %v2293_v10  ;;  %v3058_v41 = vmul.f32 %v2994_v38, %v2994_v38  ;;  %v2094_v36 = vand.u32 2147483647, %v6457_v31  ;;  %v2639_v22 = vmul.f32 %v7551_v18, %v2638_v1 }
 0x277   : > { %7558 = vst [vmem:[#allocation26_spill] sm:$0xff] %v6463_v4  ;;  %v2636_v2 = vmul.f32 0.6931472, %v3947_v0  ;;  %vm6475_vm1 = vcmp.lt.f32.partialorder %v2640_v37, 0.0004427343  ;;  %v2647_v35 = vadd.f32 1.0, %v2646_v39  ;;  %3954 = vpow2.f32 %v2301_v24 }
 0x278   : > { %vm1842_vm14 = vcmp.lt.s32.totalorder %v1778_v45, 200  ;;  %v2116_v53 = vand.u32 2147483647, %v6461_v14  ;;  %v6482_v46 = vadd.f32 %v6359_v12, %v1251_v15  ;;  %vm1843_vm15 = vcmp.lt.s32.totalorder %v6466_v59, 200  ;;  %v533_v15 = vld [vmem:[%s4641_s7 + $0x1a8] sm:$0xff] }
 0x279   : > { %v3949_v38 = vpop.eup %3948  ;;  %v2642_v10 = vsel %vm6475_vm1, %v2639_v22, %v2636_v2  ;;  %vm6487_vm0 = vcmp.lt.f32.partialorder %v2649_v42, 0.0004427343  ;;  %v3059_v1 = vmul.f32 %v2995_v48, %v2995_v48  ;;  %v3330_v37 = vsel %vm1842_vm14, %v3058_v41, 0.0  ;;  %v7567_v48 = vld [vmem:[#allocation30_spill] sm:$0xff] }
 0x27a   : > { %7562 = vst [vmem:[#allocation28_spill] sm:$0xff] %v6482_v46  ;;  %v6491_v24 = vpop.eup %3950  ;;  %v2645_v39 = vmul.f32 0.6931472, %v3949_v38  ;;  %v2158_v56 = vsub.f32 0.0, %v2094_v36  ;;  %v1694_v0 = vadd.s32 128, %v4611_v60  ;;  %v2648_v51 = vmul.f32 %v7555_v27, %v2647_v35  ;;  %v1462_v38 = vpop.xlane.xlu1 %1461 }
 0x27b   : > { %7565 = vst [vmem:[#allocation72_spill] sm:$0xff] %v6491_v24  ;;  %v1902_v2 = vmax.f32 %v6457_v31, 0.0  ;;  %v1966_v22 = vmul.f32 %v6457_v31, %v511_v7  ;;  %v1924_v42 = vmax.f32 %v6461_v14, 0.0  ;;  %v2930_v29 = vadd.f32 %v2642_v10, %v7567_v48 }
 0x27c   : > { %v6500_v4 = vpop.eup %3952  ;;  %v2180_v24 = vsub.f32 0.0, %v2116_v53  ;;  %v2117_v41 = vand.u32 2147483647, %v6482_v46  ;;  %v1693_v36 = vadd.s32 120, %v4611_v60  ;;  %v6507_v63 = vsel %vm3153_vm4, %v3330_v37, 0.0 }
 0x27d   : > { %7566 = vst [vmem:[#allocation73_spill] sm:$0xff] %v6500_v4  ;;  %v2651_v27 = vsel %vm6487_vm0, %v2648_v51, %v2645_v39  ;;  %v3331_v35 = vsel %vm1843_vm15, %v3059_v1, 0.0  ;;  %v1988_v7 = vmul.f32 %v6461_v14, %v533_v15  ;;  %v6514_v4 = vpop.eup %3954  ;;  %v2253_v53 = vmul.f32 1.442695, %v2158_v56  ;;  %v6519_v37 = vld [vmem:[#allocation4] ss:$0 sm:$0xff] }
 0x27e   : > { %7568 = vst [vmem:[#allocation30_spill] sm:$0xff] %v6514_v4  ;;  %v1925_v10 = vmax.f32 %v6482_v46, 0.0  ;;  %v2181_v48 = vsub.f32 0.0, %v2117_v41  ;;  %v1759_v19 = vadd.s32 %v4619_v3, %v1694_v0  ;;  %v1989_v52 = vmul.f32 %v6482_v46, %v534_v23  ;;  %v7569_v51 = vld [vmem:[#allocation35_spill] sm:$0xff] }
 0x27f   : > { %v1626_v18 = vadd.f32 %v6519_v37, %v1462_v38  ;;  %v2454_v39 = vadd.f32 1.0, %v6448_v55  ;;  %v2457_v1 = vmul.f32 -0.5, %v6448_v55  ;;  %v3124_v15 = vsel %vm1842_vm14, %v2930_v29, 0.0 }
 0x280   : > { %v2931_v14 = vadd.f32 %v2651_v27, %v7569_v51  ;;  %v2297_v56 = vmul.f32 1.442695, %v2180_v24  ;;  %v1758_v4 = vadd.s32 %v4619_v3, %v1693_v36  ;;  %v6528_v41 = vsel %vm3153_vm4, %v3331_v35, 0.0  ;;  %v7572_v36 = vld [vmem:[#allocation50_spill] sm:$0xff]  ;;  %v1531_v35 = vpop.xlane.xlu0 %1530  ;;  %v1534_v51 = vpop.xlane.xlu2 %1533 }
 0x281   : > { %v6530_v0 = vsub.f32 %v1902_v2, %v1966_v22  ;;  %v6532_v23 = vsub.f32 %v1924_v42, %v1988_v7  ;;  %3956 = vlog2.f32 %v2454_v39  ;;  %v2299_v38 = vmul.f32 1.442695, %v2181_v48  ;;  %v7573_v22 = vld [vmem:[#allocation18_spill] sm:$0xff]  ;;  %v7574_v7 = vld [vmem:[#allocation11_spill] sm:$0xff] }
 0x282   : > { %3958 = vpow2.f32 %v2253_v53  ;;  %vm1823_vm2 = vcmp.lt.s32.totalorder %v1759_v19, 200  ;;  %v2458_v46 = vadd.f32 1.0, %v2457_v1  ;;  %v6535_v45 = vsel %vm3153_vm4, %v3124_v15, 0.0 }
 0x283   : > { %7570 = vst [vmem:[#allocation35_spill] sm:$0xff] %v6532_v23  ;;  %v6537_v29 = vsub.f32 %v1925_v10, %v1989_v52  ;;  %v2974_v24 = vsub.f32 %v6294_v62, %v1626_v18  ;;  %v2661_v27 = vadd.f32 1.0, %v7572_v36  ;;  %v3125_v2 = vsel %vm1843_vm15, %v2931_v14, 0.0  ;;  %v7575_v10 = vld [vmem:[#allocation53_spill] sm:$0xff] }
 0x284   : > { %3960 = vpow2.f32 %v2297_v56  ;;  %vm1822_vm3 = vcmp.lt.s32.totalorder %v1758_v4, 200  ;;  %v3105_v42 = vsel %vm1823_vm2, %v7573_v22, 0.0  ;;  %v3311_v19 = vsel %vm1823_vm2, %v7574_v7, 0.0 }
 0x285   : > { %7571 = vst [vmem:[#allocation74_spill] sm:$0xff] %v6537_v29  ;;  %v2460_v53 = vand.u32 2147483647, %v6448_v55  ;;  %v3038_v48 = vmul.f32 %v2974_v24, %v2974_v24  ;;  %3962 = vlog2.f32 %v2661_v27  ;;  %v2459_v52 = vmul.f32 %v6448_v55, %v2458_v46 }
 0x286   : > { %3964 = vpow2.f32 %v2299_v38  ;;  %v1716_v62 = vadd.s32 304, %v4611_v60  ;;  %v2670_v18 = vadd.f32 1.0, %v7575_v10  ;;  %v2664_v39 = vmul.f32 -0.5, %v7572_v36 }
 0x287   : > { %v3957_v59 = vpop.eup %3956  ;;  %v3310_v14 = vsel %vm1822_vm3, %v3038_v48, 0.0  ;;  %v2667_v1 = vand.u32 2147483647, %v7572_v36  ;;  %v1649_v15 = vadd.f32 %v6519_v37, %v1531_v35  ;;  %v1717_v55 = vadd.s32 312, %v4611_v60 }
 0x288   : > { %v6553_v56 = vpop.eup %3958  ;;  %v2456_v24 = vmul.f32 0.6931472, %v3957_v59  ;;  %v3388_v38 = vsel %vm3153_vm4, %v3310_v14, 0.0  ;;  %v2673_v46 = vmul.f32 -0.5, %v7575_v10  ;;  %v6559_v27 = vsel %vm3153_vm4, %v3125_v2, 0.0 }
 0x289   : > { %vm2461_vm5 = vcmp.lt.f32.partialorder %v2460_v53, 0.0004427343  ;;  %v3389_v22 = vadd.f32 %v3388_v38, %v6303_v44  ;;  %3966 = vlog2.f32 %v2670_v18  ;;  %v3185_v35 = vsel %vm3153_vm4, %v3105_v42, 0.0  ;;  %v7580_v42 = vld [vmem:[#allocation41_spill] sm:$0xff] }
 0x28a   : > { %v6562_v7 = vpop.eup %3960  ;;  %v3390_v48 = vsel %vm3153_vm4, %v3311_v19, 0.0  ;;  %v2462_v59 = vsel %vm2461_vm5, %v2459_v52, %v2456_v24  ;;  %v1650_v14 = vadd.f32 %v6519_v37, %v1534_v51  ;;  %v6569_v2 = vadd.s32 %v4619_v3, %v1716_v62  ;;  %v1537_v51 = vpop.xlane.xlu1 %1536  ;;  %v7581_v24 = vld [vmem:[#allocation22_spill] sm:$0xff] }
 0x28b   : > { %7576 = vst [vmem:[#allocation50_spill] sm:$0xff] %v6562_v7  ;;  %v3963_v23 = vpop.eup %3962  ;;  %v2910_v29 = vadd.f32 %v2462_v59, %v6351_v11  ;;  %v3391_v30 = vadd.f32 %v3390_v48, %v3389_v22  ;;  %v2665_v53 = vadd.f32 1.0, %v2664_v39  ;;  %vm6573_vm6 = vcmp.lt.f32.partialorder %v2667_v1, 0.0004427343  ;;  %v7582_v39 = vld [vmem:[#allocation57_spill] sm:$0xff] }
 0x28c   : > { %v6571_v50 = vpop.eup %3964  ;;  %v2997_v18 = vsub.f32 %v7580_v42, %v1649_v15  ;;  %v6579_v19 = vadd.s32 %v4619_v3, %v1717_v55  ;;  %v2674_v52 = vadd.f32 1.0, %v2673_v46  ;;  %v2676_v62 = vand.u32 2147483647, %v7575_v10  ;;  %v7583_v59 = vld [vmem:[#allocation45_spill] sm:$0xff]  ;;  %v7584_v46 = vld [vmem:[#allocation24_spill] sm:$0xff] }
 0x28d   : > { %7577 = vst [vmem:[#allocation18_spill] sm:$0xff] %v6571_v50  ;;  %v3104_v11 = vsel %vm1822_vm3, %v2910_v29, 0.0  ;;  %v3393_v38 = vadd.f32 %v7581_v24, %v3391_v30  ;;  %v2679_v22 = vadd.f32 1.0, %v7582_v39  ;;  %v2663_v48 = vmul.f32 0.6931472, %v3963_v23  ;;  %v7585_v23 = vld [vmem:[#allocation31_spill] sm:$0xff] }
 0x28e   : > { %v3183_v1 = vsel %vm3153_vm4, %v3104_v11, 0.0  ;;  %v2998_v7 = vsub.f32 %v7583_v59, %v1650_v14  ;;  %v2682_v15 = vmul.f32 -0.5, %v7582_v39  ;;  %vm1845_vm7 = vcmp.lt.s32.totalorder %v6569_v2, 200  ;;  %v1257_v59 = vpop.xlane.xlu0 %1256 }
 0x28f   : > { %v3967_v42 = vpop.eup %3966  ;;  %v3184_v55 = vadd.f32 %v3183_v1, %v6417_v57  ;;  %v3395_v50 = vadd.f32 %v7584_v46, %v3393_v38  ;;  %3968 = vlog2.f32 %v2679_v22  ;;  %v2666_v30 = vmul.f32 %v7572_v36, %v2665_v53  ;;  %v7589_v1 = vld [vmem:[#allocation33_spill] sm:$0xff] }
 0x290   : > { %v3061_v4 = vmul.f32 %v2997_v18, %v2997_v18  ;;  %v2672_v29 = vmul.f32 0.6931472, %v3967_v42  ;;  %v1718_v24 = vadd.s32 320, %v4611_v60  ;;  %vm1846_vm8 = vcmp.lt.s32.totalorder %v6579_v19, 200  ;;  %v7588_v18 = vld [vmem:[#allocation25_spill] sm:$0xff] }
 0x291   : > { %v3186_v11 = vadd.f32 %v3185_v35, %v3184_v55  ;;  %v3397_v54 = vadd.f32 %v7585_v23, %v3395_v50  ;;  %v2675_v14 = vmul.f32 %v7575_v10, %v2674_v52  ;;  %v2669_v57 = vsel %vm6573_vm6, %v2666_v30, %v2663_v48  ;;  %v1260_v10 = vpop.xlane.xlu2 %1259  ;;  %v7593_v30 = vld [vmem:[#allocation43_spill] sm:$0xff]  ;;  %v7595_v23 = vld [vmem:[#allocation49_spill] sm:$0xff] }
 0x292   : > { %vm6598_vm9 = vcmp.lt.f32.partialorder %v2676_v62, 0.0004427343  ;;  %v3062_v36 = vmul.f32 %v2998_v7, %v2998_v7  ;;  %v2683_v53 = vadd.f32 1.0, %v2682_v15  ;;  %v1651_v42 = vadd.f32 %v6519_v37, %v1537_v51  ;;  %v7591_v15 = vld [vmem:[#allocation27_spill] sm:$0xff]  ;;  %v1263_v38 = vpop.xlane.xlu1 %1262 }
 0x293   : > { %v3188_v22 = vadd.f32 %v7588_v18, %v3186_v11  ;;  %v3399_v35 = vadd.f32 %v7589_v1, %v3397_v54  ;;  %v2678_v50 = vsel %vm6598_vm9, %v2675_v14, %v2672_v29  ;;  %v3333_v44 = vsel %vm1845_vm7, %v3061_v4, 0.0  ;;  %v7592_v54 = vld [vmem:[#allocation40_spill] sm:$0xff]  ;;  %v7594_v51 = vld [vmem:[#allocation47_spill] sm:$0xff] }
 0x294   : > { %v1783_v52 = vadd.s32 %v4619_v3, %v1718_v24  ;;  %v2685_v62 = vand.u32 2147483647, %v7582_v39  ;;  %v6612_v7 = vadd.f32 %v6359_v12, %v1257_v59  ;;  %v2933_v29 = vadd.f32 %v2669_v57, %v7593_v30  ;;  %v7597_v18 = vld [vmem:[#allocation32_spill] sm:$0xff] }
 0x295   : > { %v3969_v48 = vpop.eup %3968  ;;  %v3190_v55 = vadd.f32 %v7591_v15, %v3188_v22  ;;  %v3401_v46 = vadd.f32 %v7592_v54, %v3399_v35  ;;  %v2999_v11 = vsub.f32 %v7594_v51, %v1651_v42  ;;  %v2934_v14 = vadd.f32 %v2678_v50, %v7595_v23  ;;  %v7598_v1 = vld [vmem:[#allocation44_spill] sm:$0xff] }
 0x296   : > { %7590 = vst [vmem:[#allocation11_spill] sm:$0xff] %v6612_v7  ;;  %v3334_v4 = vsel %vm1846_vm8, %v3062_v36, 0.0  ;;  %v2681_v24 = vmul.f32 0.6931472, %v3969_v48  ;;  %v6622_v59 = vadd.f32 %v6359_v12, %v1260_v10  ;;  %v2684_v57 = vmul.f32 %v7582_v39, %v2683_v53  ;;  %v536_v48 = vld [vmem:[%s4641_s7 + $0x1c0] sm:$0xff]  ;;  %v7601_v15 = vld [vmem:[#allocation36_spill] sm:$0xff] }
 0x297   : > { %v3192_v22 = vadd.f32 %v7597_v18, %v3190_v55  ;;  %v6626_v35 = vadd.f32 %v7598_v1, %v3401_v46  ;;  %v2119_v42 = vand.u32 2147483647, %v6612_v7  ;;  %v6631_v50 = vsel %vm3153_vm4, %v3333_v44, 0.0  ;;  %v537_v53 = vld [vmem:[%s4641_s7 + $0x1c8] sm:$0xff]  ;;  %v7604_v18 = vld [vmem:[#allocation52_spill] sm:$0xff] }
 0x298   : > { %7596 = vst [vmem:[#allocation53_spill] sm:$0xff] %v6622_v59  ;;  %vm1847_vm10 = vcmp.lt.s32.totalorder %v1783_v52, 200  ;;  %vm6633_vm11 = vcmp.lt.f32.partialorder %v2685_v62, 0.0004427343  ;;  %v3063_v10 = vmul.f32 %v2999_v11, %v2999_v11  ;;  %v3127_v55 = vsel %vm1845_vm7, %v2933_v29, 0.0  ;;  %v7603_v11 = vld [vmem:[#allocation42_spill] sm:$0xff] }
 0x299   : > { %v3194_v54 = vadd.f32 %v7601_v15, %v3192_v22  ;;  %v2687_v39 = vsel %vm6633_vm11, %v2684_v57, %v2681_v24  ;;  %v6645_v44 = vadd.f32 %v6359_v12, %v1263_v38  ;;  %v3128_v62 = vsel %vm1846_vm8, %v2934_v14, 0.0  ;;  %v7605_v1 = vld [vmem:[#allocation46_spill] sm:$0xff] }
 0x29a   : > { %v6650_v46 = vsel %vm3153_vm4, %v3334_v4, 0.0  ;;  %v2183_v30 = vsub.f32 0.0, %v2119_v42  ;;  %v2120_v51 = vand.u32 2147483647, %v6622_v59  ;;  %v1927_v29 = vmax.f32 %v6612_v7, 0.0  ;;  %v1540_v4 = vpop.xlane.xlu0 %1539  ;;  %v538_v42 = vld [vmem:[%s4641_s7 + $0x1d0] sm:$0xff] }
 0x29b   : > { %7602 = vst [vmem:[#allocation41_spill] sm:$0xff] %v6645_v44  ;;  %v3196_v2 = vadd.f32 %v7603_v11, %v3194_v54  ;;  %v1991_v23 = vmul.f32 %v6612_v7, %v536_v48  ;;  %v1928_v24 = vmax.f32 %v6622_v59, 0.0  ;;  %v2935_v38 = vadd.f32 %v2687_v39, %v7604_v18 }
 0x29c   : > { %v3335_v22 = vsel %vm1847_vm10, %v3063_v10, 0.0  ;;  %v1992_v19 = vmul.f32 %v6622_v59, %v537_v53  ;;  %v2184_v14 = vsub.f32 0.0, %v2120_v51  ;;  %v2121_v36 = vand.u32 2147483647, %v6645_v44 }
 0x29d   : > { %v3198_v57 = vadd.f32 %v7605_v1, %v3196_v2  ;;  %v1719_v15 = vadd.s32 328, %v4611_v60  ;;  %v2688_v54 = vadd.f32 1.0, %v5874_v9  ;;  %v6666_v48 = vsel %vm3153_vm4, %v3127_v55, 0.0 }
 0x29e   : > { %v6669_v39 = vsel %vm3153_vm4, %v3128_v62, 0.0  ;;  %v2303_v10 = vmul.f32 1.442695, %v2183_v30  ;;  %v2691_v53 = vmul.f32 -0.5, %v5874_v9  ;;  %v6673_v51 = vsel %vm3153_vm4, %v3335_v22, 0.0  ;;  %v1543_v62 = vpop.xlane.xlu2 %1542 }
 0x29f   : > { %v6675_v11 = vsub.f32 %v1927_v29, %v1991_v23  ;;  %3970 = vlog2.f32 %v2688_v54  ;;  %v1652_v2 = vadd.f32 %v6519_v37, %v1540_v4  ;;  %v6678_v18 = vsub.f32 %v1928_v24, %v1992_v19  ;;  %v7608_v19 = vld [vmem:[#allocation54_spill] sm:$0xff] }
 0x2a0   : > { %v2305_v1 = vmul.f32 1.442695, %v2184_v14  ;;  %v1929_v55 = vmax.f32 %v6645_v44, 0.0  ;;  %v1993_v7 = vmul.f32 %v6645_v44, %v538_v42  ;;  %v3129_v30 = vsel %vm1847_vm10, %v2935_v38, 0.0 }
 0x2a1   : > { %7606 = vst [vmem:[#allocation22_spill] sm:$0xff] %v6675_v11  ;;  %v2185_v59 = vsub.f32 0.0, %v2121_v36  ;;  %v6684_v16 = vadd.s32 %v4619_v3, %v1719_v15  ;;  %v2697_v29 = vadd.f32 1.0, %v5937_v33  ;;  %3972 = vpow2.f32 %v2303_v10  ;;  %v7610_v10 = vld [vmem:[#allocation60_spill] sm:$0xff] }
 0x2a2   : > { %7607 = vst [vmem:[#allocation57_spill] sm:$0xff] %v6678_v18  ;;  %v2692_v23 = vadd.f32 1.0, %v2691_v53  ;;  %v2694_v22 = vand.u32 2147483647, %v5874_v9  ;;  %v1720_v24 = vadd.s32 336, %v4611_v60  ;;  %v3000_v14 = vsub.f32 %v7608_v19, %v1652_v2 }
 0x2a3   : > { %3974 = vlog2.f32 %v2697_v29  ;;  %v2700_v4 = vmul.f32 -0.5, %v5937_v33  ;;  %v1653_v52 = vadd.f32 %v6519_v37, %v1543_v62  ;;  %v6693_v38 = vsel %vm3153_vm4, %v3129_v30, 0.0  ;;  %v1510_v29 = vpop.xlane.xlu1 %1509 }
 0x2a4   : > { %3976 = vpow2.f32 %v2305_v1  ;;  %v6695_v42 = vsub.f32 %v1929_v55, %v1993_v7  ;;  %v2598_v36 = vadd.f32 1.0, %v6553_v56  ;;  %v2307_v54 = vmul.f32 1.442695, %v2185_v59 }
 0x2a5   : > { %v3971_v15 = vpop.eup %3970  ;;  %vm1848_vm12 = vcmp.lt.s32.totalorder %v6684_v16, 200  ;;  %v3001_v53 = vsub.f32 %v7610_v10, %v1653_v52  ;;  %v2601_v2 = vmul.f32 -0.5, %v6553_v56  ;;  %v2693_v62 = vmul.f32 %v5874_v9, %v2692_v23  ;;  %v7614_v23 = vld [vmem:[#allocation51_spill] sm:$0xff] }
 0x2a6   : > { %7609 = vst [vmem:[#allocation45_spill] sm:$0xff] %v6695_v42  ;;  %v2690_v19 = vmul.f32 0.6931472, %v3971_v15  ;;  %vm6702_vm13 = vcmp.lt.f32.partialorder %v2694_v22, 0.0004427343  ;;  %v6707_v7 = vadd.s32 %v4619_v3, %v1720_v24  ;;  %v3064_v1 = vmul.f32 %v3000_v14, %v3000_v14  ;;  %v7615_v14 = vld [vmem:[#allocation48_spill] sm:$0xff] }
 0x2a7   : > { %v2701_v55 = vadd.f32 1.0, %v2700_v4  ;;  %v2703_v59 = vand.u32 2147483647, %v5937_v33  ;;  %3978 = vlog2.f32 %v2598_v36  ;;  %v6710_v11 = vpop.eup %3972  ;;  %v1709_v15 = vadd.s32 248, %v4611_v60 }
 0x2a8   : > { %7613 = vst [vmem:[#allocation24_spill] sm:$0xff] %v6710_v11  ;;  %v2696_v52 = vsel %vm6702_vm13, %v2693_v62, %v2690_v19  ;;  %v1642_v9 = vadd.f32 %v6519_v37, %v1510_v29  ;;  %v3200_v22 = vadd.f32 %v7614_v23, %v3198_v57  ;;  %3980 = vpow2.f32 %v2307_v54  ;;  %v7616_v62 = vld [vmem:[#allocation56_spill] sm:$0xff]  ;;  %v1230_v11 = vpop.xlane.xlu0 %1229  ;;  %v7617_v29 = vld [vmem:[#allocation58_spill] sm:$0xff] }
 0x2a9   : > { %v3975_v10 = vpop.eup %3974  ;;  %v3065_v24 = vmul.f32 %v3001_v53, %v3001_v53  ;;  %v2602_v18 = vadd.f32 1.0, %v2601_v2  ;;  %v3405_v4 = vadd.f32 %v7615_v14, %v6626_v35  ;;  %vm1849_vm1 = vcmp.lt.s32.totalorder %v6707_v7, 200  ;;  %v7618_v53 = vld [vmem:[#allocation55_spill] sm:$0xff]  ;;  %v527_v23 = vld [vmem:[%s4641_s7 + $0x178] sm:$0xff] }
 0x2aa   : > { %v6719_v42 = vpop.eup %3976  ;;  %v2699_v36 = vmul.f32 0.6931472, %v3975_v10  ;;  %v2990_v19 = vsub.f32 %v6457_v31, %v1642_v9  ;;  %v3202_v30 = vadd.f32 %v7616_v62, %v3200_v22  ;;  %v2936_v44 = vadd.f32 %v2696_v52, %v7617_v29  ;;  %v7621_v9 = vld [vmem:[#allocation62_spill] sm:$0xff]  ;;  %v1269_v10 = vpop.xlane.xlu2 %1268 }
 0x2ab   : > { %v2702_v57 = vmul.f32 %v5937_v33, %v2701_v55  ;;  %v2604_v54 = vand.u32 2147483647, %v6553_v56  ;;  %v3407_v2 = vadd.f32 %v7618_v53, %v3405_v4  ;;  %v3336_v35 = vsel %vm1848_vm12, %v3064_v1, 0.0  ;;  %v7622_v4 = vld [vmem:[#allocation59_spill] sm:$0xff] }
 0x2ac   : > { %vm6730_vm14 = vcmp.lt.f32.partialorder %v2703_v59, 0.0004427343  ;;  %v1774_v31 = vadd.s32 %v4619_v3, %v1709_v15  ;;  %v3204_v22 = vadd.f32 %v7621_v9, %v3202_v30  ;;  %v3337_v55 = vsel %vm1849_vm1, %v3065_v24, 0.0 }
 0x2ad   : > { %v3979_v14 = vpop.eup %3978  ;;  %v2705_v33 = vsel %vm6730_vm14, %v2702_v57, %v2699_v36  ;;  %v2603_v52 = vmul.f32 %v6553_v56, %v2602_v18  ;;  %v3409_v1 = vadd.f32 %v7622_v4, %v3407_v2  ;;  %v3054_v62 = vmul.f32 %v2990_v19, %v2990_v19  ;;  %v7623_v57 = vld [vmem:[#allocation63_spill] sm:$0xff]  ;;  %v7624_v19 = vld [vmem:[#allocation64_spill] sm:$0xff] }
 0x2ae   : > { %v2600_v59 = vmul.f32 0.6931472, %v3979_v14  ;;  %v3206_v29 = vadd.f32 %v6027_v32, %v3204_v22  ;;  %v6744_v15 = vadd.f32 %v6359_v12, %v1230_v11  ;;  %v6746_v30 = vpop.eup %3980  ;;  %v3130_v36 = vsel %vm1848_vm12, %v2936_v44, 0.0  ;;  %v7625_v44 = vld [vmem:[#allocation66_spill] sm:$0xff] }
 0x2af   : > { %vm2605_vm15 = vcmp.lt.f32.partialorder %v2604_v54, 0.0004427343  ;;  %v3411_v24 = vadd.f32 %v7623_v57, %v3409_v1  ;;  %v6752_v56 = vadd.f32 %v6359_v12, %v1269_v10  ;;  %v6755_v18 = vsel %vm3153_vm4, %v3336_v35, 0.0 }
 0x2b0   : > { %v2937_v53 = vadd.f32 %v2705_v33, %v7624_v19  ;;  %v2606_v32 = vsel %vm2605_vm15, %v2603_v52, %v2600_v59  ;;  %v3208_v11 = vadd.f32 %v6086_v21, %v3206_v29  ;;  %v6760_v2 = vsel %vm3153_vm4, %v3337_v55, 0.0  ;;  %v1266_v59 = vpop.xlane.xlu0 %1265 }
 0x2b1   : > { %vm1838_vm0 = vcmp.lt.s32.totalorder %v1774_v31, 200  ;;  %v2926_v16 = vadd.f32 %v2606_v32, %v6530_v0  ;;  %v3413_v54 = vadd.f32 %v7625_v44, %v3411_v24  ;;  %v6766_v9 = vsel %vm3153_vm4, %v3130_v36, 0.0  ;;  %v7626_v31 = vld [vmem:[#allocation65_spill] sm:$0xff]  ;;  %v1546_v0 = vpop.xlane.xlu1 %1545 }
 0x2b2   : > { %v3210_v35 = vadd.f32 %v6155_v61, %v3208_v11  ;;  %v3326_v22 = vsel %vm1838_vm0, %v3054_v62, 0.0  ;;  %v2110_v10 = vand.u32 2147483647, %v6744_v15  ;;  %v1918_v21 = vmax.f32 %v6744_v15, 0.0 }
 0x2b3   : > { %v3415_v14 = vadd.f32 %v6140_v26, %v3413_v54  ;;  %v2123_v33 = vand.u32 2147483647, %v6752_v56  ;;  %v2706_v55 = vadd.f32 1.0, %v7626_v31  ;;  %v3131_v52 = vsel %vm1849_vm1, %v2937_v53, 0.0  ;;  %v540_v53 = vld [vmem:[%s4641_s7 + $0x1e0] sm:$0xff] }
 0x2b4   : > { %v3120_v4 = vsel %vm1838_vm0, %v2926_v16, 0.0  ;;  %v3212_v1 = vadd.f32 %v6201_v49, %v3210_v35  ;;  %v1982_v61 = vmul.f32 %v6744_v15, %v527_v23  ;;  %v3420_v26 = vsel %vm3153_vm4, %v3326_v22, 0.0  ;;  %v7627_v22 = vld [vmem:[#allocation61_spill] sm:$0xff] }
 0x2b5   : > { %v3417_v62 = vadd.f32 %v6196_v20, %v3415_v14  ;;  %3982 = vlog2.f32 %v2706_v55  ;;  %v2709_v29 = vmul.f32 -0.5, %v7626_v31  ;;  %v2174_v57 = vsub.f32 0.0, %v2110_v10 }
 0x2b6   : > { %v3214_v36 = vadd.f32 %v6438_v47, %v3212_v1  ;;  %v1721_v7 = vadd.s32 344, %v4611_v60  ;;  %v1654_v24 = vadd.f32 %v6519_v37, %v1546_v0  ;;  %v3215_v19 = vsel %vm3153_vm4, %v3120_v4, 0.0  ;;  %v7629_v4 = vld [vmem:[#allocation14_spill] sm:$0xff] }
 0x2b7   : > { %v3419_v49 = vadd.f32 %v6426_v58, %v3417_v62  ;;  %v2187_v32 = vsub.f32 0.0, %v2123_v33  ;;  %v6788_v20 = vadd.f32 %v6359_v12, %v1266_v59  ;;  %v6791_v11 = vsel %vm3153_vm4, %v3131_v52, 0.0  ;;  %v7628_v58 = vld [vmem:[#allocation21_spill] sm:$0xff] }
 0x2b8   : > { %v3216_v16 = vadd.f32 %v3215_v19, %v3214_v36  ;;  %v6793_v44 = vsub.f32 %v1918_v21, %v1982_v61  ;;  %v2710_v47 = vadd.f32 1.0, %v2709_v29  ;;  %v1931_v23 = vmax.f32 %v6752_v56, 0.0  ;;  %v1552_v19 = vpop.xlane.xlu2 %1551 }
 0x2b9   : > { %v3421_v54 = vadd.f32 %v3420_v26, %v3419_v49  ;;  %v2712_v35 = vand.u32 2147483647, %v7626_v31  ;;  %v3002_v10 = vsub.f32 %v7627_v22, %v1654_v24  ;;  %v2285_v33 = vmul.f32 1.442695, %v2174_v57  ;;  %v7632_v22 = vld [vmem:[#allocation10_spill] sm:$0xff] }
 0x2ba   : > { %v3218_v14 = vadd.f32 %v7628_v58, %v3216_v16  ;;  %v1995_v55 = vmul.f32 %v6752_v56, %v540_v53  ;;  %v1786_v0 = vadd.s32 %v4619_v3, %v1721_v7  ;;  %v2311_v21 = vmul.f32 1.442695, %v2187_v32  ;;  %v1272_v16 = vpop.xlane.xlu1 %1271 }
 0x2bb   : > { %v3983_v52 = vpop.eup %3982  ;;  %v3423_v1 = vadd.f32 %v7629_v4, %v3421_v54  ;;  %v2122_v61 = vand.u32 2147483647, %v6788_v20  ;;  %v2724_v59 = vadd.f32 1.0, %v6224_v8  ;;  %v2711_v29 = vmul.f32 %v7626_v31, %v2710_v47  ;;  %v539_v54 = vld [vmem:[%s4641_s7 + $0x1d8] sm:$0xff] }
 0x2bc   : > { %v3220_v62 = vadd.f32 %v6423_v13, %v3218_v14  ;;  %v2708_v26 = vmul.f32 0.6931472, %v3983_v52  ;;  %v2727_v36 = vmul.f32 -0.5, %v6224_v8  ;;  %vm6808_vm2 = vcmp.lt.f32.partialorder %v2712_v35, 0.0004427343 }
 0x2bd   : > { %v3425_v57 = vadd.f32 %v6349_v34, %v3423_v1  ;;  %v3066_v24 = vmul.f32 %v3002_v10, %v3002_v10  ;;  %3984 = vlog2.f32 %v2724_v59  ;;  %v6813_v53 = vsub.f32 %v1931_v23, %v1995_v55 }
 0x2be   : > { %v3222_v49 = vadd.f32 %v6297_v28, %v3220_v62  ;;  %v2714_v13 = vsel %vm6808_vm2, %v2711_v29, %v2708_v26  ;;  %v1723_v31 = vadd.s32 360, %v4611_v60  ;;  %3986 = vpow2.f32 %v2285_v33 }
 0x2bf   : > { %v3427_v32 = vadd.f32 %v6288_v25, %v3425_v57  ;;  %vm1850_vm3 = vcmp.lt.s32.totalorder %v1786_v0, 200  ;;  %v2186_v34 = vsub.f32 0.0, %v2122_v61  ;;  %3988 = vpow2.f32 %v2311_v21 }
 0x2c0   : > { %v3224_v47 = vadd.f32 %v6535_v45, %v3222_v49  ;;  %v2728_v35 = vadd.f32 1.0, %v2727_v36  ;;  %v1656_v28 = vadd.f32 %v6519_v37, %v1552_v19  ;;  %v2938_v10 = vadd.f32 %v2714_v13, %v7632_v22  ;;  %v541_v49 = vld [vmem:[%s4641_s7 + $0x1e8] sm:$0xff] }
 0x2c1   : > { %v3429_v23 = vadd.f32 %v6507_v63, %v3427_v32  ;;  %v3338_v58 = vsel %vm1850_vm3, %v3066_v24, 0.0  ;;  %v1930_v14 = vmax.f32 %v6788_v20, 0.0  ;;  %v1788_v33 = vadd.s32 %v4619_v3, %v1723_v31  ;;  %v1549_v24 = vpop.xlane.xlu0 %1548 }
 0x2c2   : > { %v3226_v25 = vadd.f32 %v6559_v27, %v3224_v47  ;;  %v2730_v55 = vand.u32 2147483647, %v6224_v8  ;;  %v6830_v45 = vadd.f32 %v6359_v12, %v1272_v16  ;;  %v6834_v63 = vmul.f32 %v6788_v20, %v539_v54 }
 0x2c3   : > { %v3985_v52 = vpop.eup %3984  ;;  %v3431_v4 = vadd.f32 %v6528_v41, %v3429_v23  ;;  %v2309_v1 = vmul.f32 1.442695, %v2186_v34  ;;  %v3004_v21 = vsub.f32 %v6120_v40, %v1656_v28  ;;  %v3444_v27 = vsel %vm3153_vm4, %v3338_v58, 0.0 }
 0x2c4   : > { %v3228_v61 = vadd.f32 %v6471_v6, %v3226_v25  ;;  %v2726_v59 = vmul.f32 0.6931472, %v3985_v52  ;;  %v2729_v62 = vmul.f32 %v6224_v8, %v2728_v35  ;;  %v6840_v26 = vpop.eup %3986  ;;  %v3132_v29 = vsel %vm1850_vm3, %v2938_v10, 0.0  ;;  %v7635_v10 = vld [vmem:[#allocation67_spill] sm:$0xff]  ;;  %v7636_v52 = vld [vmem:[#allocation17_spill] sm:$0xff] }
 0x2c5   : > { %v3433_v41 = vadd.f32 %v6431_v43, %v3431_v4  ;;  %v1722_v36 = vadd.s32 352, %v4611_v60  ;;  %v2715_v57 = vadd.f32 1.0, %v6188_v5  ;;  %v6846_v7 = vpop.eup %3988  ;;  %vm1852_vm5 = vcmp.lt.s32.totalorder %v1788_v33, 200 }
 0x2c6   : > { %v3230_v40 = vadd.f32 %v6666_v48, %v3228_v61  ;;  %vm6849_vm6 = vcmp.lt.f32.partialorder %v2730_v55, 0.0004427343  ;;  %v2124_v8 = vand.u32 2147483647, %v6830_v45  ;;  %3990 = vpow2.f32 %v2309_v1 }
 0x2c7   : > { %v3435_v0 = vadd.f32 %v6631_v50, %v3433_v41  ;;  %v2732_v43 = vsel %vm6849_vm6, %v2729_v62, %v2726_v59  ;;  %v3068_v19 = vmul.f32 %v3004_v21, %v3004_v21  ;;  %v3239_v13 = vsel %vm3153_vm4, %v3132_v29, 0.0 }
 0x2c8   : > { %v3232_v48 = vadd.f32 %v6669_v39, %v3230_v40  ;;  %3992 = vlog2.f32 %v2715_v57  ;;  %v2718_v31 = vmul.f32 -0.5, %v6188_v5  ;;  %v1932_v34 = vmax.f32 %v6830_v45, 0.0  ;;  %v1278_v39 = vpop.xlane.xlu2 %1277  ;;  %v1555_v40 = vpop.xlane.xlu1 %1554 }
 0x2c9   : > { %v3437_v32 = vadd.f32 %v6650_v46, %v3435_v0  ;;  %v1787_v16 = vadd.s32 %v4619_v3, %v1722_v36  ;;  %v1655_v50 = vadd.f32 %v6519_v37, %v1549_v24  ;;  %v2940_v54 = vadd.f32 %v2732_v43, %v6167_v17 }
 0x2ca   : > { %v3234_v47 = vadd.f32 %v6693_v38, %v3232_v48  ;;  %v6868_v35 = vmul.f32 %v6830_v45, %v541_v49  ;;  %v2188_v28 = vsub.f32 0.0, %v2124_v8  ;;  %v3340_v22 = vsel %vm1852_vm5, %v3068_v19, 0.0 }
 0x2cb   : > { %v3439_v23 = vadd.f32 %v6673_v51, %v3437_v32  ;;  %v2719_v46 = vadd.f32 1.0, %v2718_v31  ;;  %v3003_v58 = vsub.f32 %v7635_v10, %v1655_v50  ;;  %v2721_v55 = vand.u32 2147483647, %v6188_v5  ;;  %v4049_v31 = vld [vmem:[#allocation3] ss:$0 sm:$0xff] }
 0x2cc   : > { %v3236_v25 = vadd.f32 %v6766_v9, %v3234_v47  ;;  %v1724_v38 = vadd.s32 368, %v4611_v60  ;;  %v2733_v17 = vadd.f32 1.0, %v7636_v52  ;;  %v6877_v4 = vpop.eup %3990  ;;  %vm1851_vm7 = vcmp.lt.s32.totalorder %v1787_v16, 200 }
 0x2cd   : > { %v3441_v1 = vadd.f32 %v6755_v18, %v3439_v23  ;;  %v3067_v21 = vmul.f32 %v3003_v58, %v3003_v58  ;;  %v2736_v51 = vmul.f32 -0.5, %v7636_v52  ;;  %v3134_v62 = vsel %vm1852_vm5, %v2940_v54, 0.0  ;;  %v7638_v54 = vld [vmem:[#allocation8_spill] sm:$0xff] }
 0x2ce   : > { %v3993_v61 = vpop.eup %3992  ;;  %v3238_v59 = vadd.f32 %v6791_v11, %v3236_v25  ;;  %v2313_v9 = vmul.f32 1.442695, %v2188_v28  ;;  %3994 = vlog2.f32 %v2733_v17  ;;  %v2720_v36 = vmul.f32 %v6188_v5, %v2719_v46  ;;  %v1275_v11 = vpop.xlane.xlu0 %1274 }
 0x2cf   : > { %v3443_v29 = vadd.f32 %v6760_v2, %v3441_v1  ;;  %v2717_v41 = vmul.f32 0.6931472, %v3993_v61  ;;  %v3339_v57 = vsel %vm1851_vm7, %v3067_v21, 0.0  ;;  %vm2722_vm8 = vcmp.lt.f32.partialorder %v2721_v55, 0.0004427343  ;;  %v7637_v2 = vld [vmem:[#allocation9_spill] sm:$0xff] }
 0x2d0   : > { %v3240_v18 = vadd.f32 %v3239_v13, %v3238_v59  ;;  %v6887_v6 = vadd.f32 %v6359_v12, %v1278_v39  ;;  %v1789_v8 = vadd.s32 %v4619_v3, %v1724_v38  ;;  %v3448_v24 = vsel %vm3153_vm4, %v3340_v22, 0.0  ;;  %v1564_v39 = vpop.xlane.xlu2 %1563  ;;  %v7639_v1 = vld [vmem:[#allocation20_spill] sm:$0xff] }
 0x2d1   : > { %v3445_v33 = vadd.f32 %v3444_v27, %v3443_v29  ;;  %v2723_v0 = vsel %vm2722_vm8, %v2720_v36, %v2717_v41  ;;  %v2737_v43 = vadd.f32 1.0, %v2736_v51  ;;  %v3446_v5 = vsel %vm3153_vm4, %v3339_v57, 0.0  ;;  %v7640_v51 = vld [vmem:[#allocation68_spill] sm:$0xff] }
 0x2d2   : > { %v2939_v19 = vadd.f32 %v2723_v0, %v7637_v2  ;;  %v2739_v49 = vand.u32 2147483647, %v7636_v52  ;;  %v1657_v13 = vadd.f32 %v6519_v37, %v1555_v40  ;;  %v3243_v48 = vsel %vm3153_vm4, %v3134_v62, 0.0  ;;  %v543_v57 = vld [vmem:[%s4641_s7 + $0x1f8] sm:$0xff] }
 0x2d3   : > { %3996 = vpow2.f32 %v2313_v9  ;;  %v3447_v12 = vadd.f32 %v3446_v5, %v3445_v33  ;;  %v6896_v32 = vadd.f32 %v4049_v31, %v1275_v11  ;;  %v2126_v47 = vand.u32 2147483647, %v6887_v6  ;;  %v7641_v0 = vld [vmem:[#allocation13_spill] sm:$0xff]  ;;  %v7642_v5 = vld [vmem:[#allocation19_spill] sm:$0xff] }
 0x2d4   : > { %v3995_v27 = vpop.eup %3994  ;;  %v3133_v50 = vsel %vm1851_vm7, %v2939_v19, 0.0  ;;  %vm1853_vm9 = vcmp.lt.s32.totalorder %v1789_v8, 200  ;;  %v3005_v28 = vsub.f32 %v7638_v54, %v1657_v13  ;;  %v2738_v46 = vmul.f32 %v7636_v52, %v2737_v43 }
 0x2d5   : > { %v3241_v23 = vsel %vm3153_vm4, %v3133_v50, 0.0  ;;  %v2735_v22 = vmul.f32 0.6931472, %v3995_v27  ;;  %v3449_v10 = vadd.f32 %v3448_v24, %v3447_v12  ;;  %vm2740_vm10 = vcmp.lt.f32.partialorder %v2739_v49, 0.0004427343  ;;  %v1561_v24 = vpop.xlane.xlu1 %1560 }
 0x2d6   : > { %v3242_v58 = vadd.f32 %v3241_v23, %v3240_v18  ;;  %v3069_v25 = vmul.f32 %v3005_v28, %v3005_v28  ;;  %v1727_v55 = vadd.s32 392, %v4611_v60  ;;  %v2125_v38 = vand.u32 2147483647, %v6896_v32 }
 0x2d7   : > { %v2741_v16 = vsel %vm2740_vm10, %v2738_v46, %v2735_v22  ;;  %v1660_v17 = vadd.f32 %v6519_v37, %v1564_v39  ;;  %v2760_v21 = vadd.f32 1.0, %v7639_v1  ;;  %v2763_v52 = vmul.f32 -0.5, %v7639_v1  ;;  %v7643_v39 = vld [vmem:[#allocation12_spill] sm:$0xff]  ;;  %v1558_v22 = vpop.xlane.xlu0 %1557 }
 0x2d8   : > { %v2941_v61 = vadd.f32 %v2741_v16, %v7640_v51  ;;  %v3244_v59 = vadd.f32 %v3243_v48, %v3242_v58  ;;  %v3341_v62 = vsel %vm1853_vm9, %v3069_v25, 0.0  ;;  %v6915_v29 = vsub.f32 %v1930_v14, %v6834_v63 }
 0x2d9   : > { %v6910_v9 = vpop.eup %3996  ;;  %v6920_v41 = vsub.f32 %v1932_v34, %v6868_v35  ;;  %v3450_v36 = vsel %vm3153_vm4, %v3341_v62, 0.0  ;;  %3998 = vlog2.f32 %v2760_v21  ;;  %v1934_v40 = vmax.f32 %v6887_v6, 0.0 }
 0x2da   : > { %v2190_v18 = vsub.f32 0.0, %v2126_v47  ;;  %v3135_v11 = vsel %vm1853_vm9, %v2941_v61, 0.0  ;;  %v6926_v33 = vadd.f32 %v3450_v36, %v3449_v10  ;;  %v1792_v63 = vadd.s32 %v4619_v3, %v1727_v55 }
 0x2db   : > { %v3245_v14 = vsel %vm3153_vm4, %v3135_v11, 0.0  ;;  %v3008_v43 = vsub.f32 %v7641_v0, %v1660_v17  ;;  %v1726_v34 = vadd.s32 384, %v4611_v60  ;;  %v2189_v2 = vsub.f32 0.0, %v2125_v38  ;;  %v1573_v38 = vpop.xlane.xlu2 %1572 }
 0x2dc   : > { %v6932_v35 = vadd.f32 %v3245_v14, %v3244_v59  ;;  %v2764_v19 = vadd.f32 1.0, %v2763_v52  ;;  %v2751_v49 = vadd.f32 1.0, %v7642_v5  ;;  %v6936_v8 = vmul.f32 %v6887_v6, %v543_v57  ;;  %v7644_v59 = vld [vmem:[#allocation16_spill] sm:$0xff] }
 0x2dd   : > { %v2766_v13 = vand.u32 2147483647, %v7639_v1  ;;  %v2754_v48 = vmul.f32 -0.5, %v7642_v5  ;;  %v1659_v12 = vadd.f32 %v6519_v37, %v1561_v24  ;;  %v6941_v31 = vmul.f32 1.442695, %v2190_v18 }
 0x2de   : > { %4000 = vlog2.f32 %v2751_v49  ;;  %v1725_v27 = vadd.s32 376, %v4611_v60  ;;  %v2742_v50 = vadd.f32 1.0, %v6840_v26  ;;  %vm1856_vm11 = vcmp.lt.s32.totalorder %v1792_v63, 200 }
 0x2df   : > { %v3999_v47 = vpop.eup %3998  ;;  %v3072_v54 = vmul.f32 %v3008_v43, %v3008_v43  ;;  %v1791_v28 = vadd.s32 %v4619_v3, %v1726_v34  ;;  %v3007_v23 = vsub.f32 %v7643_v39, %v1659_v12  ;;  %v6947_v46 = vmul.f32 1.442695, %v2189_v2  ;;  %v7647_v34 = vld [vmem:[#allocation29_spill] sm:$0xff] }
 0x2e0   : > { %v2762_v10 = vmul.f32 0.6931472, %v3999_v47  ;;  %v2765_v58 = vmul.f32 %v7639_v1, %v2764_v19  ;;  %v2757_v25 = vand.u32 2147483647, %v7642_v5  ;;  %vm2767_vm12 = vcmp.lt.f32.partialorder %v2766_v13, 0.0004427343 }
 0x2e1   : > { %v2755_v55 = vadd.f32 1.0, %v2754_v48  ;;  %4002 = vlog2.f32 %v2742_v50  ;;  %v2745_v16 = vmul.f32 -0.5, %v6840_v26  ;;  %v3071_v21 = vmul.f32 %v3007_v23, %v3007_v23 }
 0x2e2   : > { %v2768_v17 = vsel %vm2767_vm12, %v2765_v58, %v2762_v10  ;;  %v1790_v51 = vadd.s32 %v4619_v3, %v1725_v27  ;;  %v1658_v61 = vadd.f32 %v6519_v37, %v1558_v22  ;;  %v3344_v52 = vsel %vm1856_vm11, %v3072_v54, 0.0  ;;  %v7648_v54 = vld [vmem:[#allocation69_spill] sm:$0xff]  ;;  %v7649_v22 = vld [vmem:[#allocation15_spill] sm:$0xff] }
 0x2e3   : > { %v2944_v62 = vadd.f32 %v2768_v17, %v7644_v59  ;;  %vm1855_vm13 = vcmp.lt.s32.totalorder %v1791_v28, 200  ;;  %v1730_v1 = vadd.s32 416, %v4611_v60  ;;  %vm6957_vm1 = vcmp.lt.f32.partialorder %v2757_v25, 0.0004427343 }
 0x2e4   : > { %v4001_v36 = vpop.eup %4000  ;;  %v2746_v18 = vadd.f32 1.0, %v2745_v16  ;;  %v3006_v11 = vsub.f32 %v6744_v15, %v1658_v61  ;;  %v1663_v24 = vadd.f32 %v6519_v37, %v1573_v38  ;;  %v2756_v0 = vmul.f32 %v7642_v5, %v2755_v55  ;;  %v1570_v38 = vpop.xlane.xlu1 %1569 }
 0x2e5   : > { %v2753_v14 = vmul.f32 0.6931472, %v4001_v36  ;;  %v2748_v43 = vand.u32 2147483647, %v6840_v26  ;;  %v2787_v2 = vadd.f32 1.0, %v7647_v34  ;;  %v3343_v19 = vsel %vm1855_vm13, %v3071_v21, 0.0 }
 0x2e6   : > { %vm1854_vm14 = vcmp.lt.s32.totalorder %v1790_v51, 200  ;;  %v3070_v49 = vmul.f32 %v3006_v11, %v3006_v11  ;;  %v2790_v13 = vmul.f32 -0.5, %v7647_v34  ;;  %v3138_v12 = vsel %vm1856_vm11, %v2944_v62, 0.0  ;;  %v7650_v62 = vld [vmem:[#allocation73_spill] sm:$0xff] }
 0x2e7   : > { %v4003_v48 = vpop.eup %4002  ;;  %v2759_v15 = vsel %vm6957_vm1, %v2756_v0, %v2753_v14  ;;  %v1795_v27 = vadd.s32 %v4619_v3, %v1730_v1  ;;  %4004 = vlog2.f32 %v2787_v2  ;;  %v2747_v50 = vmul.f32 %v6840_v26, %v2746_v18 }
 0x2e8   : > { %v2744_v5 = vmul.f32 0.6931472, %v4003_v48  ;;  %v3342_v47 = vsel %vm1854_vm14, %v3070_v49, 0.0  ;;  %v3011_v39 = vsub.f32 %v7648_v54, %v1663_v24  ;;  %v3456_v23 = vsel %vm3153_vm4, %v3344_v52, 0.0  ;;  %v1567_v54 = vpop.xlane.xlu0 %1566 }
 0x2e9   : > { %v2943_v10 = vadd.f32 %v2759_v15, %v7649_v22  ;;  %vm2749_vm15 = vcmp.lt.f32.partialorder %v2748_v43, 0.0004427343  ;;  %v3452_v63 = vsel %vm3153_vm4, %v3342_v47, 0.0  ;;  %v3454_v58 = vsel %vm3153_vm4, %v3343_v19, 0.0  ;;  %v7651_v43 = vld [vmem:[#allocation23_spill] sm:$0xff] }
 0x2ea   : > { %v2750_v25 = vsel %vm2749_vm15, %v2747_v50, %v2744_v5  ;;  %v3453_v55 = vadd.f32 %v3452_v63, %v6926_v33  ;;  %v2791_v16 = vadd.f32 1.0, %v2790_v13  ;;  %v3251_v26 = vsel %vm3153_vm4, %v3138_v12, 0.0  ;;  %v7652_v13 = vld [vmem:[#allocation72_spill] sm:$0xff]  ;;  %v7653_v12 = vld [vmem:[#allocation70_spill] sm:$0xff] }
 0x2eb   : > { %v2942_v17 = vadd.f32 %v2750_v25, %v6793_v44  ;;  %vm1859_vm0 = vcmp.lt.s32.totalorder %v1795_v27, 200  ;;  %v2793_v21 = vand.u32 2147483647, %v7647_v34  ;;  %v3075_v59 = vmul.f32 %v3011_v39, %v3011_v39  ;;  %v1582_v27 = vpop.xlane.xlu2 %1581 }
 0x2ec   : > { %v3455_v61 = vadd.f32 %v3454_v58, %v3453_v55  ;;  %v2778_v52 = vadd.f32 1.0, %v7650_v62  ;;  %v2781_v1 = vmul.f32 -0.5, %v7650_v62  ;;  %v3137_v57 = vsel %vm1855_vm13, %v2943_v10, 0.0 }
 0x2ed   : > { %v4005_v36 = vpop.eup %4004  ;;  %v3136_v33 = vsel %vm1854_vm14, %v2942_v17, 0.0  ;;  %v1729_v18 = vadd.s32 408, %v4611_v60  ;;  %v1662_v11 = vadd.f32 %v6519_v37, %v1570_v38  ;;  %v2792_v14 = vmul.f32 %v7647_v34, %v2791_v16  ;;  %v7010_v17 = vld [vmem:[#allocation4] ss:$0 sm:$0xff] }
 0x2ee   : > { %v3247_v44 = vsel %vm3153_vm4, %v3136_v33, 0.0  ;;  %v2789_v24 = vmul.f32 0.6931472, %v4005_v36  ;;  %4006 = vlog2.f32 %v2778_v52  ;;  %vm2794_vm2 = vcmp.lt.f32.partialorder %v2793_v21, 0.0004427343  ;;  %v7654_v21 = vld [vmem:[#allocation30_spill] sm:$0xff] }
 0x2ef   : > { %v3248_v0 = vadd.f32 %v3247_v44, %v6932_v35  ;;  %v3010_v2 = vsub.f32 %v7651_v43, %v1662_v11  ;;  %v1728_v28 = vadd.s32 400, %v4611_v60  ;;  %v3249_v51 = vsel %vm3153_vm4, %v3137_v57, 0.0  ;;  %v7655_v52 = vld [vmem:[#allocation39_spill] sm:$0xff]  ;;  %v7656_v11 = vld [vmem:[#allocation38_spill] sm:$0xff] }
 0x2f0   : > { %v2795_v19 = vsel %vm2794_vm2, %v2792_v14, %v2789_v24  ;;  %v2782_v49 = vadd.f32 1.0, %v2781_v1  ;;  %v2769_v48 = vadd.f32 1.0, %v7652_v13  ;;  %v3347_v5 = vsel %vm1859_vm0, %v3075_v59, 0.0 }
 0x2f1   : > { %v3250_v37 = vadd.f32 %v3249_v51, %v3248_v0  ;;  %v2947_v15 = vadd.f32 %v2795_v19, %v7653_v12  ;;  %v2772_v34 = vmul.f32 -0.5, %v7652_v13  ;;  %v1794_v35 = vadd.s32 %v4619_v3, %v1729_v18  ;;  %v7657_v51 = vld [vmem:[#allocation18_spill] sm:$0xff] }
 0x2f2   : > { %v2784_v50 = vand.u32 2147483647, %v7650_v62  ;;  %4008 = vlog2.f32 %v2769_v48  ;;  %v3457_v47 = vadd.f32 %v3456_v23, %v3455_v61  ;;  %v3074_v39 = vmul.f32 %v3010_v2, %v3010_v2 }
 0x2f3   : > { %4010 = vpow2.f32 %v6941_v31  ;;  %v1793_v22 = vadd.s32 %v4619_v3, %v1728_v28  ;;  %v3252_v10 = vadd.f32 %v3251_v26, %v3250_v37  ;;  %v1933_v58 = vmax.f32 %v6896_v32, 0.0 }
 0x2f4   : > { %v4007_v63 = vpop.eup %4006  ;;  %4012 = vpow2.f32 %v6947_v46  ;;  %v7006_v25 = vsel %vm3153_vm4, %v3347_v5, 0.0  ;;  %v2783_v55 = vmul.f32 %v7650_v62, %v2782_v49  ;;  %v3141_v16 = vsel %vm1859_vm0, %v2947_v15, 0.0  ;;  %v7658_v15 = vld [vmem:[#allocation34_spill] sm:$0xff] }
 0x2f5   : > { %v2780_v23 = vmul.f32 0.6931472, %v4007_v63  ;;  %v2773_v38 = vadd.f32 1.0, %v2772_v34  ;;  %v1661_v31 = vadd.f32 %v7010_v17, %v1567_v54  ;;  %vm1858_vm3 = vcmp.lt.s32.totalorder %v1794_v35, 200  ;;  %v1579_v54 = vpop.xlane.xlu1 %1578 }
 0x2f6   : > { %vm2785_vm5 = vcmp.lt.f32.partialorder %v2784_v50, 0.0004427343  ;;  %v2775_v26 = vand.u32 2147483647, %v7652_v13  ;;  %v2814_v61 = vadd.f32 1.0, %v7654_v21  ;;  %v3346_v59 = vsel %vm1858_vm3, %v3074_v39, 0.0 }
 0x2f7   : > { %v2786_v46 = vsel %vm2785_vm5, %v2783_v55, %v2780_v23  ;;  %vm1857_vm6 = vcmp.lt.s32.totalorder %v1793_v22, 200  ;;  %v3009_v62 = vsub.f32 %v7655_v52, %v1661_v31  ;;  %v3257_v36 = vsel %vm3153_vm4, %v3141_v16, 0.0  ;;  %v7661_v31 = vld [vmem:[#allocation71_spill] sm:$0xff] }
 0x2f8   : > { %v4009_v1 = vpop.eup %4008  ;;  %v1733_v57 = vadd.s32 440, %v4611_v60  ;;  %4014 = vlog2.f32 %v2814_v61  ;;  %v2817_v33 = vmul.f32 -0.5, %v7654_v21  ;;  %v2946_v44 = vadd.f32 %v2786_v46, %v7656_v11  ;;  %v7662_v61 = vld [vmem:[#allocation50_spill] sm:$0xff] }
 0x2f9   : > { %v7020_v18 = vpop.eup %4010  ;;  %v2771_v24 = vmul.f32 0.6931472, %v4009_v1  ;;  %v2774_v14 = vmul.f32 %v7652_v13, %v2773_v38  ;;  %v3073_v0 = vmul.f32 %v3009_v62, %v3009_v62  ;;  %vm2776_vm7 = vcmp.lt.f32.partialorder %v2775_v26, 0.0004427343 }
 0x2fa   : > { %v7024_v43 = vpop.eup %4012  ;;  %v1666_v2 = vadd.f32 %v7010_v17, %v1582_v27  ;;  %v2820_v28 = vand.u32 2147483647, %v7654_v21  ;;  %v2805_v19 = vadd.f32 1.0, %v7657_v51  ;;  %v3460_v49 = vsel %vm3153_vm4, %v3346_v59, 0.0 }
 0x2fb   : > { %v2777_v48 = vsel %vm2776_vm7, %v2774_v14, %v2771_v24  ;;  %v3345_v37 = vsel %vm1857_vm6, %v3073_v0, 0.0  ;;  %v1732_v12 = vadd.s32 432, %v4611_v60  ;;  %v1798_v34 = vadd.s32 %v4619_v3, %v1733_v57  ;;  %v1576_v57 = vpop.xlane.xlu0 %1575 }
 0x2fc   : > { %v2945_v5 = vadd.f32 %v2777_v48, %v7658_v15  ;;  %v3458_v13 = vsel %vm3153_vm4, %v3345_v37, 0.0  ;;  %v2818_v50 = vadd.f32 1.0, %v2817_v33  ;;  %v3140_v39 = vsel %vm1858_vm3, %v2946_v44, 0.0 }
 0x2fd   : > { %v3459_v63 = vadd.f32 %v3458_v13, %v3457_v47  ;;  %4016 = vlog2.f32 %v2805_v19  ;;  %v2808_v55 = vmul.f32 -0.5, %v7657_v51  ;;  %vm7038_vm8 = vcmp.lt.f32.partialorder %v2820_v28, 0.0004427343  ;;  %v7664_v13 = vld [vmem:[#allocation26_spill] sm:$0xff] }
 0x2fe   : > { %v4015_v16 = vpop.eup %4014  ;;  %v3139_v23 = vsel %vm1857_vm6, %v2945_v5, 0.0  ;;  %v3014_v26 = vsub.f32 %v7661_v31, %v1666_v2  ;;  %v2796_v46 = vadd.f32 1.0, %v7662_v61  ;;  %v1665_v47 = vadd.f32 %v7010_v17, %v1579_v54 }
 0x2ff   : > { %v3253_v59 = vsel %vm3153_vm4, %v3139_v23, 0.0  ;;  %v3461_v52 = vadd.f32 %v3460_v49, %v3459_v63  ;;  %v2816_v35 = vmul.f32 0.6931472, %v4015_v16  ;;  %v3255_v62 = vsel %vm3153_vm4, %v3140_v39, 0.0  ;;  %v1591_v39 = vpop.xlane.xlu2 %1590 }
 0x300   : > { %v3254_v27 = vadd.f32 %v3253_v59, %v3252_v10  ;;  %v2819_v22 = vmul.f32 %v7654_v21, %v2818_v50  ;;  %v2809_v1 = vadd.f32 1.0, %v2808_v55  ;;  %v2811_v33 = vand.u32 2147483647, %v7657_v51  ;;  %v7663_v10 = vld [vmem:[#allocation28_spill] sm:$0xff] }
 0x301   : > { %v1731_v11 = vadd.s32 424, %v4611_v60  ;;  %4018 = vlog2.f32 %v2796_v46  ;;  %v2799_v44 = vmul.f32 -0.5, %v7662_v61  ;;  %v3078_v0 = vmul.f32 %v3014_v26, %v3014_v26  ;;  %v7666_v26 = vld [vmem:[#allocation74_spill] sm:$0xff] }
 0x302   : > { %v3256_v24 = vadd.f32 %v3255_v62, %v3254_v27  ;;  %v2822_v14 = vsel %vm7038_vm8, %v2819_v22, %v2816_v35  ;;  %v1797_v2 = vadd.s32 %v4619_v3, %v1732_v12  ;;  %v3013_v19 = vsub.f32 %v7663_v10, %v1665_v47 }
 0x303   : > { %v4017_v28 = vpop.eup %4016  ;;  %v2800_v21 = vadd.f32 1.0, %v2799_v44  ;;  %v3463_v49 = vadd.f32 %v7006_v25, %v3461_v52  ;;  %v1664_v48 = vadd.f32 %v7010_v17, %v1576_v57  ;;  %vm1862_vm9 = vcmp.lt.s32.totalorder %v1798_v34, 200  ;;  %v7665_v25 = vld [vmem:[#allocation37_spill] sm:$0xff] }
 0x304   : > { %v2807_v37 = vmul.f32 0.6931472, %v4017_v28  ;;  %v2810_v15 = vmul.f32 %v7657_v51, %v2809_v1  ;;  %v3258_v5 = vadd.f32 %v3257_v36, %v3256_v24  ;;  %v2950_v50 = vadd.f32 %v2822_v14, %v7664_v13  ;;  %v1588_v1 = vpop.xlane.xlu1 %1587 }
 0x305   : > { %vm2812_vm10 = vcmp.lt.f32.partialorder %v2811_v33, 0.0004427343  ;;  %v1796_v54 = vadd.s32 %v4619_v3, %v1731_v11  ;;  %v2802_v12 = vand.u32 2147483647, %v7662_v61  ;;  %v3350_v63 = vsel %vm1862_vm9, %v3078_v0, 0.0  ;;  %v7667_v33 = vld [vmem:[#allocation35_spill] sm:$0xff] }
 0x306   : > { %vm1861_vm11 = vcmp.lt.s32.totalorder %v1797_v2, 200  ;;  %v2813_v55 = vsel %vm2812_vm10, %v2810_v15, %v2807_v37  ;;  %v3012_v16 = vsub.f32 %v7665_v25, %v1664_v48  ;;  %v3077_v38 = vmul.f32 %v3013_v19, %v3013_v19  ;;  %v7668_v0 = vld [vmem:[#allocation41_spill] sm:$0xff] }
 0x307   : > { %v4019_v23 = vpop.eup %4018  ;;  %v2801_v31 = vmul.f32 %v7662_v61, %v2800_v21  ;;  %v2841_v36 = vadd.f32 1.0, %v6746_v30  ;;  %v2844_v51 = vmul.f32 -0.5, %v6746_v30  ;;  %v2949_v46 = vadd.f32 %v2813_v55, %v7666_v26 }
 0x308   : > { %v2798_v59 = vmul.f32 0.6931472, %v4019_v23  ;;  %v3076_v52 = vmul.f32 %v3012_v16, %v3012_v16  ;;  %v1669_v35 = vadd.f32 %v7010_v17, %v1591_v39  ;;  %v3144_v47 = vsel %vm1862_vm9, %v2950_v50, 0.0  ;;  %v7671_v23 = vld [vmem:[#allocation53_spill] sm:$0xff] }
 0x309   : > { %vm1860_vm12 = vcmp.lt.s32.totalorder %v1796_v54, 200  ;;  %vm2803_vm13 = vcmp.lt.f32.partialorder %v2802_v12, 0.0004427343  ;;  %4020 = vlog2.f32 %v2841_v36  ;;  %v1736_v61 = vadd.s32 464, %v4611_v60 }
 0x30a   : > { %v2804_v62 = vsel %vm2803_vm13, %v2801_v31, %v2798_v59  ;;  %v3348_v27 = vsel %vm1860_vm12, %v3076_v52, 0.0  ;;  %v2847_v22 = vand.u32 2147483647, %v6746_v30  ;;  %v3349_v57 = vsel %vm1861_vm11, %v3077_v38, 0.0  ;;  %v1585_v31 = vpop.xlane.xlu0 %1584 }
 0x30b   : > { %v2948_v11 = vadd.f32 %v2804_v62, %v7667_v33  ;;  %v3464_v44 = vsel %vm3153_vm4, %v3348_v27, 0.0  ;;  %v2845_v24 = vadd.f32 1.0, %v2844_v51  ;;  %v3143_v34 = vsel %vm1861_vm11, %v2949_v46, 0.0  ;;  %v7672_v46 = vld [vmem:[#allocation24_spill] sm:$0xff] }
 0x30c   : > { %v3465_v14 = vadd.f32 %v3464_v44, %v3463_v49  ;;  %v3017_v28 = vsub.f32 %v7668_v0, %v1669_v35  ;;  %v2832_v10 = vadd.f32 1.0, %v6719_v42  ;;  %v1735_v21 = vadd.s32 456, %v4611_v60 }
 0x30d   : > { %v3142_v19 = vsel %vm1860_vm12, %v2948_v11, 0.0  ;;  %v2835_v48 = vmul.f32 -0.5, %v6719_v42  ;;  %v1668_v37 = vadd.f32 %v7010_v17, %v1588_v1  ;;  %v3466_v15 = vsel %vm3153_vm4, %v3349_v57, 0.0 }
 0x30e   : > { %v3259_v13 = vsel %vm3153_vm4, %v3142_v19, 0.0  ;;  %v1801_v2 = vadd.s32 %v4619_v3, %v1736_v61  ;;  %vm7085_vm1 = vcmp.lt.f32.partialorder %v2847_v22, 0.0004427343  ;;  %v3261_v54 = vsel %vm3153_vm4, %v3143_v34, 0.0  ;;  %v1600_v61 = vpop.xlane.xlu2 %1599  ;;  %v7673_v22 = vld [vmem:[#allocation45_spill] sm:$0xff] }
 0x30f   : > { %v4021_v50 = vpop.eup %4020  ;;  %v3260_v12 = vadd.f32 %v3259_v13, %v3258_v5  ;;  %v2846_v39 = vmul.f32 %v6746_v30, %v2845_v24  ;;  %4022 = vlog2.f32 %v2832_v10  ;;  %v3467_v55 = vadd.f32 %v3466_v15, %v3465_v14 }
 0x310   : > { %v2843_v25 = vmul.f32 0.6931472, %v4021_v50  ;;  %v3081_v16 = vmul.f32 %v3017_v28, %v3017_v28  ;;  %v3016_v38 = vsub.f32 %v7671_v23, %v1668_v37  ;;  %v7093_v51 = vadd.s32 %v4619_v3, %v1735_v21  ;;  %v7674_v21 = vld [vmem:[#allocation11_spill] sm:$0xff]  ;;  %v1597_v50 = vpop.xlane.xlu1 %1596 }
 0x311   : > { %v3262_v36 = vadd.f32 %v3261_v54, %v3260_v12  ;;  %v2836_v26 = vadd.f32 1.0, %v2835_v48  ;;  %v2823_v59 = vadd.f32 1.0, %v7672_v46  ;;  %v3263_v52 = vsel %vm3153_vm4, %v3144_v47, 0.0 }
 0x312   : > { %v3468_v5 = vsel %vm3153_vm4, %v3350_v63, 0.0  ;;  %v2849_v30 = vsel %vm7085_vm1, %v2846_v39, %v2843_v25  ;;  %v2826_v35 = vmul.f32 -0.5, %v7672_v46  ;;  %vm1865_vm14 = vcmp.lt.s32.totalorder %v1801_v2, 200 }
 0x313   : > { %v1734_v62 = vadd.s32 448, %v4611_v60  ;;  %4024 = vlog2.f32 %v2823_v59  ;;  %v7102_v27 = vadd.f32 %v3263_v52, %v3262_v36  ;;  %v2953_v1 = vadd.f32 %v2849_v30, %v7673_v22  ;;  %v7677_v59 = vld [vmem:[#allocation57_spill] sm:$0xff] }
 0x314   : > { %v2838_v57 = vand.u32 2147483647, %v6719_v42  ;;  %v3080_v33 = vmul.f32 %v3016_v38, %v3016_v38  ;;  %v3469_v47 = vadd.f32 %v3468_v5, %v3467_v55  ;;  %v3353_v63 = vsel %vm1865_vm14, %v3081_v16, 0.0  ;;  %v1594_v38 = vpop.xlane.xlu0 %1593 }
 0x315   : > { %v4023_v11 = vpop.eup %4022  ;;  %vm1864_vm15 = vcmp.lt.s32.totalorder %v7093_v51, 200  ;;  %v2837_v44 = vmul.f32 %v6719_v42, %v2836_v26  ;;  %v1667_v24 = vadd.f32 %v7010_v17, %v1585_v31  ;;  %v2827_v14 = vadd.f32 1.0, %v2826_v35  ;;  %v7678_v35 = vld [vmem:[#allocation22_spill] sm:$0xff] }
 0x316   : > { %v2834_v34 = vmul.f32 0.6931472, %v4023_v11  ;;  %v1739_v0 = vadd.s32 488, %v4611_v60  ;;  %v1672_v28 = vadd.f32 %v7010_v17, %v1600_v61  ;;  %v1799_v10 = vadd.s32 %v4619_v3, %v1734_v62 }
 0x317   : > { %v2829_v19 = vand.u32 2147483647, %v7672_v46  ;;  %v3015_v48 = vsub.f32 %v7674_v21, %v1667_v24  ;;  %v2868_v37 = vadd.f32 1.0, %v6910_v9  ;;  %v3147_v15 = vsel %vm1865_vm14, %v2953_v1, 0.0 }
 0x318   : > { %vm7117_vm0 = vcmp.lt.f32.partialorder %v2838_v57, 0.0004427343  ;;  %v3352_v13 = vsel %vm1864_vm15, %v3080_v33, 0.0  ;;  %v2871_v49 = vmul.f32 -0.5, %v6910_v9  ;;  %v7127_v55 = vadd.s32 %v4619_v3, %v1739_v0  ;;  %v1606_v42 = vpop.xlane.xlu1 %1605 }
 0x319   : > { %v4025_v54 = vpop.eup %4024  ;;  %v2840_v12 = vsel %vm7117_vm0, %v2837_v44, %v2834_v34  ;;  %v3079_v39 = vmul.f32 %v3015_v48, %v3015_v48  ;;  %4026 = vlog2.f32 %v2868_v37  ;;  %v2828_v25 = vmul.f32 %v7672_v46, %v2827_v14 }
 0x31a   : > { %v2825_v2 = vmul.f32 0.6931472, %v4025_v54  ;;  %v2874_v16 = vand.u32 2147483647, %v6910_v9  ;;  %v3020_v23 = vsub.f32 %v6830_v45, %v1672_v28  ;;  %v3474_v31 = vsel %vm3153_vm4, %v3353_v63, 0.0 }
 0x31b   : > { %v3472_v36 = vsel %vm3153_vm4, %v3352_v13, 0.0  ;;  %vm1863_vm2 = vcmp.lt.s32.totalorder %v1799_v10, 200  ;;  %vm2830_vm3 = vcmp.lt.f32.partialorder %v2829_v19, 0.0004427343  ;;  %v7135_v26 = vsel %vm3153_vm4, %v3147_v15, 0.0 }
 0x31c   : > { %v2952_v52 = vadd.f32 %v2840_v12, %v7677_v59  ;;  %v2831_v5 = vsel %vm2830_vm3, %v2828_v25, %v2825_v2  ;;  %v3351_v30 = vsel %vm1863_vm2, %v3079_v39, 0.0  ;;  %vm1868_vm5 = vcmp.lt.s32.totalorder %v7127_v55, 200  ;;  %v1603_v39 = vpop.xlane.xlu0 %1602 }
 0x31d   : > { %v2951_v46 = vadd.f32 %v2831_v5, %v7678_v35  ;;  %v2872_v62 = vadd.f32 1.0, %v2871_v49  ;;  %v1738_v45 = vadd.s32 480, %v4611_v60  ;;  %vm7141_vm6 = vcmp.lt.f32.partialorder %v2874_v16, 0.0004427343 }
 0x31e   : > { %v3084_v22 = vmul.f32 %v3020_v23, %v3020_v23  ;;  %v2859_v1 = vadd.f32 1.0, %v6846_v7  ;;  %v2862_v57 = vmul.f32 -0.5, %v6846_v7  ;;  %v3470_v63 = vsel %vm3153_vm4, %v3351_v30, 0.0 }
 0x31f   : > { %v4027_v33 = vpop.eup %4026  ;;  %v3145_v11 = vsel %vm1863_vm2, %v2951_v46, 0.0  ;;  %v1671_v44 = vadd.f32 %v7010_v17, %v1597_v50  ;;  %v2850_v24 = vadd.f32 1.0, %v6877_v4  ;;  %v3146_v34 = vsel %vm1864_vm15, %v2952_v52, 0.0 }
 0x320   : > { %v3471_v14 = vadd.f32 %v3470_v63, %v3469_v47  ;;  %4028 = vlog2.f32 %v2859_v1  ;;  %v1737_v0 = vadd.s32 472, %v4611_v60  ;;  %v3265_v28 = vsel %vm3153_vm4, %v3145_v11, 0.0 }
 0x321   : > { %v2870_v10 = vmul.f32 0.6931472, %v4027_v33  ;;  %v1803_v19 = vadd.s32 %v4619_v3, %v1738_v45  ;;  %v2865_v21 = vand.u32 2147483647, %v6846_v7  ;;  %v3266_v48 = vadd.f32 %v3265_v28, %v7102_v27 }
 0x322   : > { %v2863_v37 = vadd.f32 1.0, %v2862_v57  ;;  %4030 = vlog2.f32 %v2850_v24  ;;  %v2853_v15 = vmul.f32 -0.5, %v6877_v4  ;;  %v3267_v51 = vsel %vm3153_vm4, %v3146_v34, 0.0 }
 0x323   : > { %v2873_v47 = vmul.f32 %v6910_v9, %v2872_v62  ;;  %v3356_v13 = vsel %vm1868_vm5, %v3084_v22, 0.0  ;;  %v3019_v49 = vsub.f32 %v6752_v56, %v1671_v44  ;;  %v3473_v50 = vadd.f32 %v3472_v36, %v3471_v14 }
 0x324   : > { %v1802_v54 = vadd.s32 %v4619_v3, %v1737_v0  ;;  %v2854_v12 = vadd.f32 1.0, %v2853_v15  ;;  %v1670_v27 = vadd.f32 %v7010_v17, %v1594_v38  ;;  %vm1867_vm7 = vcmp.lt.s32.totalorder %v1803_v19, 200 }
 0x325   : > { %vm7165_vm8 = vcmp.lt.f32.partialorder %v2865_v21, 0.0004427343  ;;  %v2856_v25 = vand.u32 2147483647, %v6877_v4  ;;  %v1674_v9 = vadd.f32 %v7010_v17, %v1606_v42  ;;  %v3268_v23 = vadd.f32 %v3267_v51, %v3266_v48 }
 0x326   : > { %v4029_v16 = vpop.eup %4028  ;;  %v2876_v56 = vsel %vm7141_vm6, %v2873_v47, %v2870_v10  ;;  %v2864_v36 = vmul.f32 %v6846_v7, %v2863_v37  ;;  %v3018_v59 = vsub.f32 %v6788_v20, %v1670_v27  ;;  %v3083_v52 = vmul.f32 %v3019_v49, %v3019_v49  ;;  %v542_v10 = vld [vmem:[%s4641_s7 + $0x1f0] sm:$0xff]  ;;  %s7225_s7 = sshll.u32 %s4121_s12, 7  ;;  %s3516_s12 = scalar_lea.sflag [#allocation6], %s371_s27 }
 0x327   : > { %v2861_v38 = vmul.f32 0.6931472, %v4029_v16  ;;  %v1740_v5 = vadd.s32 496, %v4611_v60  ;;  %v1673_v30 = vadd.f32 %v7010_v17, %v1603_v39  ;;  %vm1866_vm9 = vcmp.lt.s32.totalorder %v1802_v54, 200  ;;  %s7228_s6 = scalar_lea.smem [#allocation2], %s7225_s7  ;;  %s3293_s24 = sadd.s32 1, %s7225_s7 }
 0x328   : > { %v4031_v35 = vpop.eup %4030  ;;  %v2855_v46 = vmul.f32 %v6877_v4, %v2854_v12  ;;  %v3475_v62 = vadd.f32 %v3474_v31, %v3473_v50  ;;  %v3082_v45 = vmul.f32 %v3018_v59, %v3018_v59  ;;  %vm2857_vm10 = vcmp.lt.f32.partialorder %v2856_v25, 0.0004427343  ;;  %412 = sst [smem:[%s7228_s6]] %s4131_s16  ;;  %s3571_s18 = scalar_lea.smem %s7228_s6, 1 [#allocation2] }
 0x329   : > { %v2867_v61 = vsel %vm7165_vm8, %v2864_v36, %v2861_v38  ;;  %v2852_v22 = vmul.f32 0.6931472, %v4031_v35  ;;  %v3022_v7 = vsub.f32 %v6887_v6, %v1674_v9  ;;  %v1805_v1 = vadd.s32 %v4619_v3, %v1740_v5  ;;  %415 = sst [smem:[%s3571_s18]] %s4131_s16 }
 0x32a   : > { %v3354_v20 = vsel %vm1866_vm9, %v3082_v45, 0.0  ;;  %v3021_v17 = vsub.f32 %v6896_v32, %v1673_v30  ;;  %v1741_v57 = vadd.s32 504, %v4611_v60  ;;  %v2955_v4 = vadd.f32 %v2867_v61, %v6813_v53  ;;  %s3088_s21 = sld [smem:[#allocation2 + %s7225_s7]] }
 0x32b   : > { %v2858_v31 = vsel %vm2857_vm10, %v2855_v46, %v2852_v22  ;;  %v3476_v33 = vsel %vm3153_vm4, %v3354_v20, 0.0  ;;  %v2877_v11 = vadd.f32 1.0, %v7024_v43  ;;  %v2956_v63 = vadd.f32 %v2876_v56, %v6920_v41 }
 0x32c   : > { %v2954_v44 = vadd.f32 %v2858_v31, %v6915_v29  ;;  %v3270_v24 = vadd.f32 %v7135_v26, %v3268_v23  ;;  %v3085_v34 = vmul.f32 %v3021_v17, %v3021_v17  ;;  %v3355_v14 = vsel %vm1867_vm7, %v3083_v52, 0.0 }
 0x32d   : > { %v3086_v0 = vmul.f32 %v3022_v7, %v3022_v7  ;;  %4032 = vlog2.f32 %v2877_v11  ;;  %v2880_v28 = vmul.f32 -0.5, %v7024_v43  ;;  %v3477_v21 = vadd.f32 %v3476_v33, %v3475_v62 }
 0x32e   : > { %v3148_v53 = vsel %vm1866_vm9, %v2954_v44, 0.0  ;;  %v1806_v48 = vadd.s32 %v4619_v3, %v1741_v57  ;;  %v2886_v37 = vadd.f32 1.0, %v7020_v18  ;;  %v3149_v41 = vsel %vm1867_vm7, %v2955_v4, 0.0 }
 0x32f   : > { %v3271_v29 = vsel %vm3153_vm4, %v3148_v53, 0.0  ;;  %vm1869_vm11 = vcmp.lt.s32.totalorder %v1805_v1, 200  ;;  %v2889_v26 = vmul.f32 -0.5, %v7020_v18  ;;  %v2881_v51 = vadd.f32 1.0, %v2880_v28 }
 0x330   : > { %v3272_v15 = vadd.f32 %v3271_v29, %v3270_v24  ;;  %v3357_v42 = vsel %vm1869_vm11, %v3085_v34, 0.0  ;;  %4034 = vlog2.f32 %v2886_v37  ;;  %v1997_v47 = vmul.f32 %v6896_v32, %v542_v10 }
 0x331   : > { %v3480_v49 = vsel %vm3153_vm4, %v3356_v13, 0.0  ;;  %v3478_v3 = vsel %vm3153_vm4, %v3355_v14, 0.0  ;;  %v2883_v50 = vand.u32 2147483647, %v7024_v43  ;;  %v3150_v19 = vsel %vm1868_vm5, %v2956_v63, 0.0 }
 0x332   : > { %v3273_v54 = vsel %vm3153_vm4, %v3149_v41, 0.0  ;;  %vm1870_vm12 = vcmp.lt.s32.totalorder %v1806_v48, 200  ;;  %v3479_v12 = vadd.f32 %v3478_v3, %v3477_v21  ;;  %v2890_v39 = vadd.f32 1.0, %v2889_v26 }
 0x333   : > { %v4033_v27 = vpop.eup %4032  ;;  %v3274_v2 = vadd.f32 %v3273_v54, %v3272_v15  ;;  %v3358_v25 = vsel %vm1870_vm12, %v3086_v0, 0.0  ;;  %v3482_v9 = vsel %vm3153_vm4, %v3357_v42, 0.0  ;;  %v2882_v13 = vmul.f32 %v7024_v43, %v2881_v51 }
 0x334   : > { %v2879_v16 = vmul.f32 0.6931472, %v4033_v27  ;;  %v2892_v23 = vand.u32 2147483647, %v7020_v18  ;;  %v3481_v56 = vadd.f32 %v3480_v49, %v3479_v12  ;;  %v2061_v55 = vsub.f32 %v1933_v58, %v1997_v47 }
 0x335   : > { %vm2884_vm13 = vcmp.lt.f32.partialorder %v2883_v50, 0.0004427343  ;;  %v3275_v38 = vsel %vm3153_vm4, %v3150_v19, 0.0  ;;  %v3484_v5 = vsel %vm3153_vm4, %v3358_v25, 0.0  ;;  %v2891_v35 = vmul.f32 %v7020_v18, %v2890_v39 }
 0x336   : > { %v4035_v36 = vpop.eup %4034  ;;  %v2885_v59 = vsel %vm2884_vm13, %v2882_v13, %v2879_v16  ;;  %v3483_v52 = vadd.f32 %v3482_v9, %v3481_v56  ;;  %v3276_v43 = vadd.f32 %v3275_v38, %v3274_v2  ;;  %v2062_v62 = vsub.f32 %v1934_v40, %v6936_v8 }
 0x337   : > { %v2888_v30 = vmul.f32 0.6931472, %v4035_v36  ;;  %v2957_v46 = vadd.f32 %v2885_v59, %v2061_v55  ;;  %vm2893_vm1 = vcmp.lt.f32.partialorder %v2892_v23, 0.0004427343  ;;  %v7683_v0 = vlaneseq }
 0x338   : > { %v3485_v32 = vadd.f32 %v3484_v5, %v3483_v52 }
 0x339   : > { %v2894_v58 = vsel %vm2893_vm1, %v2891_v35, %v2888_v30  ;;  %v3151_v45 = vsel %vm1869_vm11, %v2957_v46, 0.0  ;;  %v3502_v28 = vand.u32 127, %v7683_v0 }
 0x33a   : > { %v2958_v61 = vadd.f32 %v2894_v58, %v2062_v62  ;;  %v3277_v22 = vsel %vm3153_vm4, %v3151_v45, 0.0  ;;  %3486 = vadd.xlane.f32.xlu0 %v3485_v32 }
 0x33b   : > { %v3278_v7 = vadd.f32 %v3277_v22, %v3276_v43  ;;  %vm3507_vm14 = vcmp.eq.s32.totalorder %v3502_v28, 1  ;;  %vm3504_vm15 = vcmp.eq.s32.totalorder %v3502_v28, 0 }
 0x33c   : > { %v3152_v20 = vsel %vm1870_vm12, %v2958_v61, 0.0 }
 0x33d   : > { %v3279_v18 = vsel %vm3153_vm4, %v3152_v20, 0.0  ;;  %vm3503_vm4 = vcmp.eq.s32.totalorder %v4611_v60, 0 }
 0x33e   : > { %v3280_v17 = vadd.f32 %v3279_v18, %v3278_v7  ;;  %vm3508_vm0 = vmand %vm3503_vm4, %vm3507_vm14 }
 0x33f   : > { %vm3505_vm2 = vmand %vm3503_vm4, %vm3504_vm15 }
 0x340   : > { %3281 = vadd.xlane.f32.xlu2 %v3280_v17 }
 0x3ad   : > { %v3487_v6 = vpop.xlane.xlu0 %3486 }
 0x3ae   : > { %v3488_v40 = vrot.slane %v3487_v6, 4 }
 0x3b0   : > { %v3489_v8 = vadd.f32 %v3488_v40, %v3487_v6 }
 0x3b2   : > { %v3490_v1 = vrot.slane %v3489_v8, 2 }
 0x3b3   : > { %v3282_v57 = vpop.xlane.xlu2 %3281 }
 0x3b4   : > { %v3283_v4 = vrot.slane %v3282_v57, 4  ;;  %v3491_v31 = vadd.f32 %v3490_v1, %v3489_v8 }
 0x3b6   : > { %v3284_v33 = vadd.f32 %v3283_v4, %v3282_v57  ;;  %v3492_v63 = vrot.slane %v3491_v31, 1 }
 0x3b8   : > { %v3285_v11 = vrot.slane %v3284_v33, 2  ;;  %v3493_v34 = vadd.f32 %v3492_v63, %v3491_v31 }
 0x3ba   : > { %v3286_v44 = vadd.f32 %v3285_v11, %v3284_v33 }
 0x3bc   : > { %v3287_v24 = vrot.slane %v3286_v44, 1 }
 0x3be   : > { %v3288_v14 = vadd.f32 %v3287_v24, %v3286_v44 }
 0x3c0   : > { %3715 = vpush %v3288_v14 }
 0x3c1   : > { %3717 = vpush %v3493_v34 }
 0x3f1   : > { %s3716_s22 = spop %3715 }
 0x3f2   : > { %s3290_s23 = sadd.f32 %s3716_s22, %s3088_s21  ;;  %s3718_s26 = spop %3717 }
 0x3f3   : > { %s3526_s21 = scalar_lea.hbm %s7286_s8, %s3700_s30  ;;  %s373_s22 = scalar_lea.vmem [#allocation5], %s3625_s29 }
 0x3f4   : > { %3292 = sst [smem:[%s7228_s6]] %s3290_s23  ;;  %s3528_s23 = sshll.u32 %s373_s22, 4  ;;  %s3529_s23 = int_to_ptr.vmem [resolvable:$true] %s3528_s23 }
 0x3f5   : > { %s3294_s25 = sld [smem:[#allocation2 + %s3293_s24]] }
 0x3fb   : > { %s3495_s28 = sadd.f32 %s3718_s26, %s3294_s25  ;;  %s3530_s25 = sshll.u32 %s3526_s21, 4  ;;  %s3531_s25 = int_to_ptr.hbm [resolvable:$true] %s3530_s25 }
 0x3fd   : > { %3497 = sst [smem:[%s3571_s18]] %s3495_s28  ;;  %s4071_s18 = scalar_lea.hbm %s7286_s8, 16 }
 0x3fe   : > { %s3506_s16 = sld [smem:[#allocation2 + %s7225_s7]]  ;;  %s4065_s7 = sshra.s32 %s3531_s25, 4  ;;  %s4066_s7 = int_to_ptr.hbm [resolvable:$true] %s4065_s7 }
 0x3ff   : > { %s3509_s0 = sld [smem:[#allocation2 + %s3293_s24]]  ;;  %s4067_s6 = scalar_lea.hbm %s4066_s7, 8 }
 0x400   : > { %p4068_p13 = scmp.ne.s32.totalorder %s4066_s7, %s4067_s6  ;;  %p4072_p2 = scmp.lt.s32.totalorder %s4066_s7, %s7286_s8 }
 0x401   : > { %p4073_p3 = scmp.lt.s32.totalorder %s4071_s18, %s4067_s6 }
 0x402   : > { %p4069_p0 = pnand %p4068_p13, %p4223_p4 }
 0x403   : > { %p4074_p5 = por %p4073_p3, %p4072_p2 }
 0x404   : > { %v3512_v10 = vstv %s3506_s16  ;;  %p4070_p1 = pneg %p4069_p0 }
 0x405   : > { %v3510_v53 = vstv %s3509_s0 }
 0x406   : > { %v3511_v21 = vsel %vm3508_vm0, %v3510_v53, 0.0  ;;  %p4075_p6 = pnand %p4074_p5, %p4070_p1 }
 0x407   : > { %v3513_v48 = vsel %vm3505_vm2, %v3512_v10, %v3511_v21 }
 0x408   : > { %3514 = vst [vmem:[%s373_s22] sm:$0xff] %v3513_v48 }
 0x409   : > { %4078 = shalt.err (!%p4075_p6)
}
 0x40a   : > { %3719 = dma.vmem_to_hbm [thread:$0]  (%p4223_p4), %s3529_s23, 128, %s3531_s25, %s3516_s12  }
 0x40b PF: > { %p3725_p7 = scmp.ge.s32.totalorder %s4129_s14, 2  ;;  %s3542_s0 = sand.u32 1, %s4109_s9  }
 0x40c   : > { %s3543_s27 = scalar_lea.sflag [#allocation6], %s3542_s0 }
 0x40d   : > { %p3722_p9 = pnand %p3725_p7, %p4230_p8 }
 0x40f   : > { %p3723_p10 = pneg %p3722_p9 }
 0x411   : > { %4104 = dma.done.wait (%p3723_p10), %s3543_s27, 128  }
 0x412   : > { %4106 = vsyncadd (%p3723_p10), %s3543_s27, 4294967168  ;;  %s25_s14 = sadd.s32 1, %s4129_s14   ;;  %s7684_s9 = smov %s4113_s10 }
 0x413   : > { %p22_p11 = scmp.ge.s32.totalorder %s25_s14, 4   ;;  %s7685_s10 = smov %s4117_s11 }
 0x414   : > { %s7686_s11 = smov %s4236_s20  ;;  %s7687_s12 = smov %s4125_s13 }
 0x415   : > { %s7688_s13 = smov %s7690_s15  ;;  %24 = sbr.rel (!%p22_p11) target bundleno = 8 (0x8), region = 102 }
 0x41a   :  { %3549 = vsyncpa [#allocation6], 1 }
 0x41b   :  { %3551 = vsyncpa [#allocation6 + $0x1], 1 }

</bundles_post_ra>
